<compile_context>
chip_gen: v6e
topology: v6e:2x2x1
jax: 0.10.0
libtpu: 0.0.40
codegen_flags: <defaults>
</compile_context>

<pallas_src>
import math
import functools

import jax
import jax.numpy as jnp
from jax import lax
from jax.experimental import pallas as pl
from jax.experimental.pallas import tpu as pltpu


F32 = jnp.float32
BF16 = jnp.bfloat16
NEG_INF = -1e30
LN_EPS = 1e-5        # in-layer nn.LayerNorm default eps
PROJ_LN_EPS = 1e-12  # module-level no-affine `layer_norm` helper


def _cparams(sem):
    return pltpu.CompilerParams(dimension_semantics=sem,
                                vmem_limit_bytes=32 * 1024 * 1024)


# ----------------------------------------------------------------------------
# Fused MonoEncoder stack: one pallas_call, grid over transformer layers.
# ----------------------------------------------------------------------------

def _encoder_stack_kernel(x_ref, bias_ref,
                          wqkv_ref, bqkv_ref, wo_ref, bo_ref,
                          ln1g_ref, ln1b_ref,
                          w1_ref, b1_ref, w2_ref, b2_ref,
                          ln2g_ref, ln2b_ref,
                          out_ref,
                          h_scr, qkv_scr, attn_scr,
                          *, batch, seq, heads, head_dim, eps):
    D = heads * head_dim

    @pl.when(pl.program_id(0) == 0)
    def _():
        h_scr[...] = x_ref[...]                       # load embeddings once

    x = h_scr[...]                                    # (B*S, D) f32, resident in VMEM
    scale = 1.0 / math.sqrt(head_dim)

    # --- fused QKV projection: single lane-dense (D, 3D) matmul -------------
    qkv_scr[...] = (jnp.dot(x.astype(BF16), wqkv_ref[...],
                            preferred_element_type=jnp.float32) + bqkv_ref[...])

    # --- per-(batch, head) attention; heads sliced from lanes in-kernel -----
    for b in range(batch):
        r0 = b * seq
        kp_bias = bias_ref[b:b + 1, :]                # (1, S) additive key-pad bias
        for h in range(heads):
            c = h * head_dim
            q = qkv_scr[r0:r0 + seq, c:c + head_dim] * scale
            k = qkv_scr[r0:r0 + seq, D + c:D + c + head_dim]
            v = qkv_scr[r0:r0 + seq, 2 * D + c:2 * D + c + head_dim]
            s = lax.dot_general(q.astype(BF16), k.astype(BF16),
                                dimension_numbers=(((1,), (1,)), ((), ())),
                                preferred_element_type=jnp.float32)   # q @ k^T
            s = s + kp_bias
            s = s - jnp.max(s, axis=-1, keepdims=True)
            p = jnp.exp(s)
            p = p * pl.reciprocal(jnp.sum(p, axis=-1, keepdims=True), approx=True)
            attn_scr[r0:r0 + seq, c:c + head_dim] = jnp.dot(
                p.astype(BF16), v.astype(BF16), preferred_element_type=jnp.float32)

    # --- output projection + residual + post-LN (affine) --------------------
    o = (jnp.dot(attn_scr[...].astype(BF16), wo_ref[...],
                 preferred_element_type=jnp.float32) + bo_ref[...])
    z = x + o
    mu = jnp.mean(z, axis=-1, keepdims=True)
    var = jnp.mean((z - mu) ** 2, axis=-1, keepdims=True)
    z = (z - mu) * lax.rsqrt(var + eps) * ln1g_ref[...] + ln1b_ref[...]

    # --- feed-forward: w1 + erf-GELU + w2 + residual + post-LN ---------------
    hmid = (jnp.dot(z.astype(BF16), w1_ref[...],
                    preferred_element_type=jnp.float32) + b1_ref[...])
    hmid = hmid * 0.5 * (1.0 + lax.erf(hmid * (1.0 / math.sqrt(2.0))))
    y = (jnp.dot(hmid.astype(BF16), w2_ref[...],
                 preferred_element_type=jnp.float32) + b2_ref[...])
    z2 = z + y
    mu = jnp.mean(z2, axis=-1, keepdims=True)
    var = jnp.mean((z2 - mu) ** 2, axis=-1, keepdims=True)
    z2 = (z2 - mu) * lax.rsqrt(var + eps) * ln2g_ref[...] + ln2b_ref[...]

    h_scr[...] = z2                                   # carried to the next layer
    out_ref[...] = z2


def sinusoidal_positions(seq_len, dim):
    half = dim // 2
    freq = jnp.exp(jnp.arange(half, dtype=F32) * -(math.log(10000.0) / (half - 1)))
    pos = jnp.arange(seq_len, dtype=F32)[:, None] * freq[None, :]
    emb = jnp.concatenate([jnp.sin(pos), jnp.cos(pos)], axis=1)
    if dim % 2 == 1:
        emb = jnp.pad(emb, ((0, 0), (0, 1)))
    return emb  # (seq_len, dim)


def mono_encoder(p, input_ids, *, num_heads, padding_idx):
    """MonoEncoder: scaled embedding + sinusoidal positions + L post-norm layers."""
    S, B = input_ids.shape
    D = p['tok'].shape[1]
    assert D % num_heads == 0
    Dh = D // num_heads
    L = p['wqkv'].shape[0]
    Ff = p['w1'].shape[2]
    M = B * S

    # Embedding gather + positions: JAX glue (no dense compute).  Positional
    # embeddings are added on padding positions too, as in the fairseq-style reference.
    x = math.sqrt(D) * jnp.take(p['tok'], input_ids, axis=0)         # (S, B, D)
    x = x + sinusoidal_positions(S, D)[:, None, :]
    x = x.transpose(1, 0, 2).reshape(M, D).astype(F32)               # batch-major rows

    pad = (input_ids == padding_idx).T                               # (B, S)
    bias = jnp.where(pad, F32(NEG_INF), F32(0.0))                    # shared across heads

    row = lambda l: (0, 0)
    per_layer = lambda l: (l, 0, 0)

    flops = L * (2 * M * D * 3 * D + B * num_heads * 4 * S * S * Dh
                 + 2 * M * D * D + 4 * M * D * Ff)
    transc = L * (B * num_heads * S * S + M * Ff)
    bytes_acc = (2 * M * D * 4 + B * S * 4
                 + L * 2 * (D * 3 * D + D * D + 2 * D * Ff)          # bf16 weights
                 + L * 4 * (3 * D + D + Ff + 5 * D))                 # f32 biases / LN

    kern = functools.partial(_encoder_stack_kernel, batch=B, seq=S,
                             heads=num_heads, head_dim=Dh, eps=LN_EPS)
    out = pl.pallas_call(
        kern,
        grid=(L,),
        in_specs=[
            pl.BlockSpec((M, D), row),
            pl.BlockSpec((B, S), row),
            pl.BlockSpec((None, D, 3 * D), per_layer),
            pl.BlockSpec((None, 1, 3 * D), per_layer),
            pl.BlockSpec((None, D, D), per_layer),
            pl.BlockSpec((None, 1, D), per_layer),
            pl.BlockSpec((None, 1, D), per_layer),
            pl.BlockSpec((None, 1, D), per_layer),
            pl.BlockSpec((None, D, Ff), per_layer),
            pl.BlockSpec((None, 1, Ff), per_layer),
            pl.BlockSpec((None, Ff, D), per_layer),
            pl.BlockSpec((None, 1, D), per_layer),
            pl.BlockSpec((None, 1, D), per_layer),
            pl.BlockSpec((None, 1, D), per_layer),
        ],
        out_specs=pl.BlockSpec((M, D), row),
        out_shape=jax.ShapeDtypeStruct((M, D), F32),
        scratch_shapes=[pltpu.VMEM((M, D), F32),        # activation carried across layers
                        pltpu.VMEM((M, 3 * D), F32),    # fused QKV
                        pltpu.VMEM((M, D), F32)],       # attention output
        compiler_params=_cparams(("arbitrary",)),        # layers are sequential
        cost_estimate=pl.CostEstimate(flops=flops, transcendentals=transc,
                                      bytes_accessed=bytes_acc),
    )(x, bias, p['wqkv'], p['bqkv'], p['wo'], p['bo'],
      p['ln1g'], p['ln1b'], p['w1'], p['b1'], p['w2'], p['b2'],
      p['ln2g'], p['ln2b'])
    return out.reshape(B, S, D), pad


# ----------------------------------------------------------------------------
# Generic row-tiled linear (pre-transposed bf16 weight kept resident).
# ----------------------------------------------------------------------------

def _linear_kernel(x_ref, w_ref, b_ref, o_ref):
    y = jnp.dot(x_ref[...].astype(BF16), w_ref[...],
                preferred_element_type=jnp.float32) + b_ref[...]
    o_ref[...] = y.astype(o_ref.dtype)


def pallas_linear(x, w_t, b):
    """x @ w_t + b, w_t pre-transposed to (in, out) bf16, b as (1, out) f32."""
    M, K = x.shape
    K2, N = w_t.shape
    assert K == K2
    tm = M if (M <= 512 or M % 512) else 512
    return pl.pallas_call(
        _linear_kernel,
        grid=(M // tm,),
        in_specs=[pl.BlockSpec((tm, K), lambda i: (i, 0)),
                  pl.BlockSpec((K, N), lambda i: (0, 0)),    # weight resident
                  pl.BlockSpec((1, N), lambda i: (0, 0))],
        out_specs=pl.BlockSpec((tm, N), lambda i: (i, 0)),
        out_shape=jax.ShapeDtypeStruct((M, N), F32),
        compiler_params=_cparams(("parallel",)),
        cost_estimate=pl.CostEstimate(flops=2 * M * K * N, transcendentals=0,
                                      bytes_accessed=4 * (M * K + M * N) + 2 * K * N),
    )(x, w_t, b)


# ----------------------------------------------------------------------------
# Fused projection + no-affine layer_norm (ProjEncoder / ProjEncoder_spc head).
# ----------------------------------------------------------------------------

def _proj_ln_kernel(x_ref, w_ref, b_ref, o_ref, *, eps):
    y = jnp.dot(x_ref[...].astype(BF16), w_ref[...],
                preferred_element_type=jnp.float32) + b_ref[...]
    mu = jnp.mean(y, axis=-1, keepdims=True)
    var = jnp.mean((y - mu) ** 2, axis=-1, keepdims=True)
    o_ref[...] = ((y - mu) * lax.rsqrt(var + eps)).astype(o_ref.dtype)


def proj_layer_norm(x, w_t, b, *, eps=PROJ_LN_EPS):
    M, K = x.shape
    N = w_t.shape[1]
    return pl.pallas_call(
        functools.partial(_proj_ln_kernel, eps=eps),
        grid=(1,),
        in_specs=[pl.BlockSpec((M, K), lambda i: (0, 0)),
                  pl.BlockSpec((K, N), lambda i: (0, 0)),
                  pl.BlockSpec((1, N), lambda i: (0, 0))],
        out_specs=pl.BlockSpec((M, N), lambda i: (0, 0)),
        out_shape=jax.ShapeDtypeStruct((M, N), F32),
        compiler_params=_cparams(("arbitrary",)),
    )(x, w_t, b)


# ----------------------------------------------------------------------------
# MatchingModel head: scores = q @ r^T, log_softmax, label-smoothed NLL, acc.
# ----------------------------------------------------------------------------

def _matching_kernel(q_ref, r_ref, scores_ref, loss_ref, acc_ref, *, label_smoothing):
    q = q_ref[...]
    r = r_ref[...]
    s = lax.dot_general(q, r, dimension_numbers=(((1,), (1,)), ((), ())),
                        preferred_element_type=jnp.float32)          # (B, B) = q @ r.T
    scores_ref[...] = s
    bsz = s.shape[0]

    m = jnp.max(s, axis=-1, keepdims=True)
    z = s - m
    logp = z - jnp.log(jnp.sum(jnp.exp(z), axis=-1, keepdims=True))  # log_softmax

    rows = lax.broadcasted_iota(jnp.int32, s.shape, 0)
    cols = lax.broadcasted_iota(jnp.int32, s.shape, 1)
    diag = rows == cols                                              # gold = arange(bsz)

    nll = -jnp.sum(jnp.where(diag, logp, 0.0), axis=-1, keepdims=True)   # (B, 1)
    smooth = -jnp.sum(logp, axis=-1, keepdims=True)                      # (B, 1)
    eps_i = label_smoothing / bsz
    per_row = (1.0 - label_smoothing) * nll + eps_i * smooth             # fairseq formula
    loss_ref[...] = jnp.sum(per_row, axis=0, keepdims=True) / bsz        # sum=True, /bsz

    # acc: gold row is "correct" iff its diagonal score equals the row max
    # (exact-tie handling may differ from torch.argmax's first-index rule).
    diag_s = jnp.max(jnp.where(diag, s, NEG_INF), axis=-1, keepdims=True)
    correct = (diag_s >= m).astype(jnp.float32)
    acc_ref[...] = jnp.sum(correct, axis=0, keepdims=True) / bsz


def matching_head(q, r, *, label_smoothing):
    B = q.shape[0]
    O = q.shape[1]
    scores, loss, acc = pl.pallas_call(
        functools.partial(_matching_kernel, label_smoothing=label_smoothing),
        grid=(1,),
        in_specs=(pl.BlockSpec((B, O), lambda i: (0, 0)),
                  pl.BlockSpec((B, O), lambda i: (0, 0))),
        out_specs=(pl.BlockSpec((B, B), lambda i: (0, 0)),
                   pl.BlockSpec((1, 1), lambda i: (0, 0)),
                   pl.BlockSpec((1, 1), lambda i: (0, 0))),
        out_shape=(jax.ShapeDtypeStruct((B, B), F32),
                   jax.ShapeDtypeStruct((1, 1), F32),
                   jax.ShapeDtypeStruct((1, 1), F32)),
        compiler_params=_cparams(("arbitrary",)),
    )(q, r)
    return scores, loss[0, 0], acc[0, 0]


# ----------------------------------------------------------------------------
# RnnEncoder stand-in for ProjEncoder_spc.
# ----------------------------------------------------------------------------

def gru_encoder(p, input_ids, *, padding_idx):
    # TODO(synk): RnnEncoder's source (modules/encoder.py) is not in the spec; this is a
    # standard 2-layer unidirectional GRU (hidden=512) + Linear(hidden->embed_dim) stand-in,
    # with the recurrence kept in lax.scan (sequential dependence has no Pallas win here).
    S, B = input_ids.shape
    E = p['tok'].shape[1]
    x = jnp.take(p['tok'], input_ids, axis=0).astype(F32)            # (S, B, E)

    h_in = x
    for lp in p['layers']:
        H = lp['w_hh'].shape[0]
        M = S * B
        # time-parallel input projection via Pallas (x @ W_ih^T + b_ih, pre-transposed)
        xp = pallas_linear(h_in.reshape(M, h_in.shape[-1]), lp['w_ih'], lp['b_ih'])
        xp = xp.reshape(S, B, 3 * H)
        w_hh_t, b_hh = lp['w_hh'], lp['b_hh']

        def step(h, xp_t, w_hh_t=w_hh_t, b_hh=b_hh, H=H):
            hp = h @ w_hh_t + b_hh                                    # (B, 3H)
            rg = jax.nn.sigmoid(xp_t[:, :H] + hp[:, :H])
            zg = jax.nn.sigmoid(xp_t[:, H:2 * H] + hp[:, H:2 * H])
            ng = jnp.tanh(xp_t[:, 2 * H:] + rg * hp[:, 2 * H:])
            h_new = (1.0 - zg) * ng + zg * h
            return h_new, h_new

        _, h_in = lax.scan(step, jnp.zeros((B, H), F32), xp)          # (S, B, H)

    H = h_in.shape[-1]
    eq = pallas_linear(h_in.reshape(S * B, H), p['w_out'], p['b_out']).reshape(S, B, E)
    mask = (input_ids == padding_idx)
    return eq, mask


# ----------------------------------------------------------------------------
# Parameters (weights pre-transposed (in, out); biases stored as (1, N)).
# ----------------------------------------------------------------------------

def init_params(key, *, vocab_eq, vocab_resp, layers, embed_dim, ff_embed_dim,
                output_dim, rnn_hidden=512, rnn_layers=2, padding_idx=0):
    keys = iter(jax.random.split(key, 64))

    def nrm(shape, dtype=F32, std=0.02):
        return (std * jax.random.normal(next(keys), shape, F32)).astype(dtype)

    D, Ff, L = embed_dim, ff_embed_dim, layers

    tok_r = nrm((vocab_resp, D)).at[padding_idx].set(0.0)             # nn.Embedding padding row
    response = dict(
        tok=tok_r,
        wqkv=nrm((L, D, 3 * D), BF16), bqkv=jnp.zeros((L, 1, 3 * D), F32),
        wo=nrm((L, D, D), BF16),       bo=jnp.zeros((L, 1, D), F32),
        ln1g=jnp.ones((L, 1, D), F32), ln1b=jnp.zeros((L, 1, D), F32),
        w1=nrm((L, D, Ff), BF16),      b1=jnp.zeros((L, 1, Ff), F32),
        w2=nrm((L, Ff, D), BF16),      b2=jnp.zeros((L, 1, D), F32),
        ln2g=jnp.ones((L, 1, D), F32), ln2b=jnp.zeros((L, 1, D), F32),
        proj_w=nrm((D, output_dim), BF16),            # nn.init.normal_(std=0.02)
        proj_b=jnp.zeros((1, output_dim), F32),       # nn.init.constant_(0.0)
    )

    tok_q = nrm((vocab_eq, D)).at[padding_idx].set(0.0)
    rnn_layer_params = []
    in_dim = D
    for _ in range(rnn_layers):
        rnn_layer_params.append(dict(
            w_ih=nrm((in_dim, 3 * rnn_hidden), BF16),
            b_ih=jnp.zeros((1, 3 * rnn_hidden), F32),
            w_hh=nrm((rnn_hidden, 3 * rnn_hidden), F32),
            b_hh=jnp.zeros((3 * rnn_hidden,), F32),
        ))
        in_dim = rnn_hidden
    query = dict(
        rnn=dict(tok=tok_q, layers=rnn_layer_params,
                 w_out=nrm((rnn_hidden, D), BF16), b_out=jnp.zeros((1, D), F32)),
        proj_w=nrm((D, output_dim), BF16),
        proj_b=jnp.zeros((1, output_dim), F32),
    )
    return dict(query=query, response=response)


# ----------------------------------------------------------------------------
# MatchingModel.forward
# ----------------------------------------------------------------------------

def matching_model_forward(params, eq_orig, wd_orig, response, *,
                           num_heads, padding_idx=0, label_smoothing=0.0):
    # --- query side: ProjEncoder_spc (wd_orig is accepted but unused, as in the reference)
    eq, _ = gru_encoder(params['query']['rnn'], eq_orig, padding_idx=padding_idx)
    q_vec = jnp.mean(eq, axis=0)                                      # torch.mean(eq, 0)
    q = proj_layer_norm(q_vec, params['query']['proj_w'], params['query']['proj_b'])

    # --- response side: ProjEncoder (MonoEncoder transformer)
    src, _ = mono_encoder(params['response'], response,
                          num_heads=num_heads, padding_idx=padding_idx)   # (B, S, D)
    r = proj_layer_norm(src[:, 0, :], params['response']['proj_w'],
                        params['response']['proj_b'])                 # src[0, :, :] -> proj -> LN

    # q_src = mean(q_src, 0) and r_src = r_src[0] are computed but unused in the reference.
    scores, loss, acc = matching_head(q, r, label_smoothing=label_smoothing)
    # NOTE: the reference forward() returns None; we return (loss, acc, scores) for inspection.
    return loss, acc, scores


# ----------------------------------------------------------------------------

if __name__ == "__main__":
    vocab_eq, vocab_resp = 40, 50
    layers, embed_dim, ff_embed_dim, num_heads = 2, 32, 64, 2
    output_dim = 16
    seq_len, batch = 8, 2
    padding_idx = 0

    key = jax.random.PRNGKey(0)
    kp, k1, k2, k3 = jax.random.split(key, 4)
    params = init_params(kp, vocab_eq=vocab_eq, vocab_resp=vocab_resp,
                         layers=layers, embed_dim=embed_dim,
                         ff_embed_dim=ff_embed_dim, output_dim=output_dim,
                         padding_idx=padding_idx)

    eq_orig = jax.random.randint(k1, (seq_len, batch), 1, vocab_eq, dtype=jnp.int32)
    wd_orig = jax.random.randint(k2, (seq_len, batch), 1, vocab_eq, dtype=jnp.int32)
    response = jax.random.randint(k3, (seq_len, batch), 1, vocab_resp, dtype=jnp.int32)
    response = response.at[-2:, 1].set(padding_idx)    # exercise the key-padding mask

    fwd = jax.jit(functools.partial(matching_model_forward, num_heads=num_heads,
                                    padding_idx=padding_idx, label_smoothing=0.1))
    loss, acc, scores = jax.block_until_ready(fwd(params, eq_orig, wd_orig, response))

    assert scores.shape == (batch, batch), scores.shape
    assert bool(jnp.isfinite(loss)) and bool(jnp.isfinite(acc))
    assert bool(jnp.all(jnp.isfinite(scores)))
    print("KERNEL_OK")
</pallas_src>

<mosaic_0001>
module attributes {stable_mosaic.version = 11 : i64} {
  func.func @_proj_ln_kernel(%arg0: i32, %arg1: memref<2x32xf32, #tpu.memory_space<vmem>>, %arg2: memref<32x16xbf16, #tpu.memory_space<vmem>>, %arg3: memref<1x16xf32, #tpu.memory_space<vmem>>, %arg4: memref<2x16xf32, #tpu.memory_space<vmem>>) attributes {dimension_semantics = [#tpu.dimension_semantics<arbitrary>], iteration_bounds = array<i64: 1>, scalar_prefetch = 0 : i64, scratch_operands = 0 : i64, tpu.core_type = #tpu.core_type<tc>, window_params = [{pipeline_mode = #tpu.pipeline_mode<synchronous>, transform_indices = @transform_0, window_bounds = array<i64: 2, 32>}, {pipeline_mode = #tpu.pipeline_mode<synchronous>, transform_indices = @transform_1, window_bounds = array<i64: 32, 16>}, {pipeline_mode = #tpu.pipeline_mode<synchronous>, transform_indices = @transform_2, window_bounds = array<i64: 1, 16>}, {pipeline_mode = #tpu.pipeline_mode<synchronous>, transform_indices = @transform_3, window_bounds = array<i64: 2, 16>}]} {
    %c0 = arith.constant 0 : index
    %c0_0 = arith.constant 0 : index
    %0 = vector.load %arg1[%c0, %c0_0] : memref<2x32xf32, #tpu.memory_space<vmem>>, vector<2x32xf32>
    %1 = arith.truncf %0 : vector<2x32xf32> to vector<2x32xbf16>
    %c0_1 = arith.constant 0 : index
    %c0_2 = arith.constant 0 : index
    %2 = vector.load %arg2[%c0_1, %c0_2] : memref<32x16xbf16, #tpu.memory_space<vmem>>, vector<32x16xbf16>
    %cst = arith.constant dense<0.000000e+00> : vector<2x16xf32>
    %3 = tpu.matmul %1, %2, %cst {dimension_numbers = #tpu.dot_dimension_numbers<[1], [0], [0], [1], [0, 0, 1, 1], [], []>} : vector<2x32xbf16>, vector<32x16xbf16>, vector<2x16xf32> -> vector<2x16xf32>
    %c0_3 = arith.constant 0 : index
    %c0_4 = arith.constant 0 : index
    %4 = vector.load %arg3[%c0_3, %c0_4] : memref<1x16xf32, #tpu.memory_space<vmem>>, vector<1x16xf32>
    %5 = vector.broadcast %4 : vector<1x16xf32> to vector<2x16xf32>
    %6 = arith.addf %3, %5 : vector<2x16xf32>
    %cst_5 = arith.constant dense<0.000000e+00> : vector<2xf32>
    %7 = vector.multi_reduction <add>, %6, %cst_5 [1] : vector<2x16xf32> to vector<2xf32>
    %8 = vector.shape_cast %7 : vector<2xf32> to vector<2x1xf32>
    %cst_6 = arith.constant 1.600000e+01 : f32
    %9 = vector.broadcast %cst_6 : f32 to vector<2x1xf32>
    %10 = arith.divf %8, %9 : vector<2x1xf32>
    %11 = vector.broadcast %10 : vector<2x1xf32> to vector<2x16xf32>
    %12 = arith.subf %6, %11 : vector<2x16xf32>
    %13 = arith.mulf %12, %12 : vector<2x16xf32>
    %cst_7 = arith.constant dense<0.000000e+00> : vector<2xf32>
    %14 = vector.multi_reduction <add>, %13, %cst_7 [1] : vector<2x16xf32> to vector<2xf32>
    %15 = vector.shape_cast %14 : vector<2xf32> to vector<2x1xf32>
    %cst_8 = arith.constant 1.600000e+01 : f32
    %16 = vector.broadcast %cst_8 : f32 to vector<2x1xf32>
    %17 = arith.divf %15, %16 : vector<2x1xf32>
    %18 = vector.broadcast %10 : vector<2x1xf32> to vector<2x16xf32>
    %19 = arith.subf %6, %18 : vector<2x16xf32>
    %cst_9 = arith.constant 9.99999996E-13 : f32
    %20 = vector.broadcast %cst_9 : f32 to vector<2x1xf32>
    %21 = arith.addf %17, %20 : vector<2x1xf32>
    %22 = math.rsqrt %21 : vector<2x1xf32>
    %23 = vector.broadcast %22 : vector<2x1xf32> to vector<2x16xf32>
    %24 = arith.mulf %19, %23 : vector<2x16xf32>
    %c0_10 = arith.constant 0 : index
    %c0_11 = arith.constant 0 : index
    %25 = vector.load %arg4[%c0_10, %c0_11] : memref<2x16xf32, #tpu.memory_space<vmem>>, vector<2x16xf32>
    tpu.vector_store %arg4[%c0_10, %c0_11], %24 {strides = array<i32>} : memref<2x16xf32, #tpu.memory_space<vmem>>, vector<2x16xf32>,
    return
  }
  func.func @transform_0(%arg0: i32) -> (i32, i32) {
    %c0_i32 = arith.constant 0 : i32
    %c0_i32_0 = arith.constant 0 : i32
    %c0_i32_1 = arith.constant 0 : i32
    return %c0_i32, %c0_i32_0 : i32, i32
  }
  func.func @transform_1(%arg0: i32) -> (i32, i32) {
    %c0_i32 = arith.constant 0 : i32
    %c0_i32_0 = arith.constant 0 : i32
    %c0_i32_1 = arith.constant 0 : i32
    return %c0_i32, %c0_i32_0 : i32, i32
  }
  func.func @transform_2(%arg0: i32) -> (i32, i32) {
    %c0_i32 = arith.constant 0 : i32
    %c0_i32_0 = arith.constant 0 : i32
    %c0_i32_1 = arith.constant 0 : i32
    return %c0_i32, %c0_i32_0 : i32, i32
  }
  func.func @transform_3(%arg0: i32) -> (i32, i32) {
    %c0_i32 = arith.constant 0 : i32
    %c0_i32_0 = arith.constant 0 : i32
    %c0_i32_1 = arith.constant 0 : i32
    return %c0_i32, %c0_i32_0 : i32, i32
  }
}

module attributes {stable_mosaic.version = 11 : i64} {
  func.func @_encoder_stack_kernel(%arg0: i32, %arg1: memref<16x32xf32, #tpu.memory_space<vmem>>, %arg2: memref<2x8xf32, #tpu.memory_space<vmem>>, %arg3: memref<1x32x96xbf16, #tpu.memory_space<vmem>>, %arg4: memref<1x1x96xf32, #tpu.memory_space<vmem>>, %arg5: memref<1x32x32xbf16, #tpu.memory_space<vmem>>, %arg6: memref<1x1x32xf32, #tpu.memory_space<vmem>>, %arg7: memref<1x1x32xf32, #tpu.memory_space<vmem>>, %arg8: memref<1x1x32xf32, #tpu.memory_space<vmem>>, %arg9: memref<1x32x64xbf16, #tpu.memory_space<vmem>>, %arg10: memref<1x1x64xf32, #tpu.memory_space<vmem>>, %arg11: memref<1x64x32xbf16, #tpu.memory_space<vmem>>, %arg12: memref<1x1x32xf32, #tpu.memory_space<vmem>>, %arg13: memref<1x1x32xf32, #tpu.memory_space<vmem>>, %arg14: memref<1x1x32xf32, #tpu.memory_space<vmem>>, %arg15: memref<16x32xf32, #tpu.memory_space<vmem>>, %arg16: memref<16x32xf32, #tpu.memory_space<vmem>>, %arg17: memref<16x96xf32, #tpu.memory_space<vmem>>, %arg18: memref<16x32xf32, #tpu.memory_space<vmem>>) attributes {dimension_semantics = [#tpu.dimension_semantics<arbitrary>], iteration_bounds = array<i64: 2>, scalar_prefetch = 0 : i64, scratch_operands = 3 : i64, tpu.core_type = #tpu.core_type<tc>, window_params = [{pipeline_mode = #tpu.pipeline_mode<synchronous>, transform_indices = @transform_0, window_bounds = array<i64: 16, 32>}, {pipeline_mode = #tpu.pipeline_mode<synchronous>, transform_indices = @transform_1, window_bounds = array<i64: 2, 8>}, {transform_indices = @transform_2, window_bounds = array<i64: 1, 32, 96>}, {transform_indices = @transform_3, window_bounds = array<i64: 1, 1, 96>}, {transform_indices = @transform_4, window_bounds = array<i64: 1, 32, 32>}, {transform_indices = @transform_5, window_bounds = array<i64: 1, 1, 32>}, {transform_indices = @transform_6, window_bounds = array<i64: 1, 1, 32>}, {transform_indices = @transform_7, window_bounds = array<i64: 1, 1, 32>}, {transform_indices = @transform_8, window_bounds = array<i64: 1, 32, 64>}, {transform_indices = @transform_9, window_bounds = array<i64: 1, 1, 64>}, {transform_indices = @transform_10, window_bounds = array<i64: 1, 64, 32>}, {transform_indices = @transform_11, window_bounds = array<i64: 1, 1, 32>}, {transform_indices = @transform_12, window_bounds = array<i64: 1, 1, 32>}, {transform_indices = @transform_13, window_bounds = array<i64: 1, 1, 32>}, {pipeline_mode = #tpu.pipeline_mode<synchronous>, transform_indices = @transform_14, window_bounds = array<i64: 16, 32>}]} {
    %c0_i32 = arith.constant 0 : i32
    %0 = arith.cmpi eq, %arg0, %c0_i32 : i32
    %1 = arith.extui %0 : i1 to i32
    %c0_i32_0 = arith.constant 0 : i32
    %2 = arith.cmpi ne, %1, %c0_i32_0 : i32
    scf.if %2 {
      %c0_111 = arith.constant 0 : index
      %c0_112 = arith.constant 0 : index
      %200 = vector.load %arg1[%c0_111, %c0_112] : memref<16x32xf32, #tpu.memory_space<vmem>>, vector<16x32xf32>
      %c0_113 = arith.constant 0 : index
      %c0_114 = arith.constant 0 : index
      %201 = vector.load %arg16[%c0_113, %c0_114] : memref<16x32xf32, #tpu.memory_space<vmem>>, vector<16x32xf32>
      tpu.vector_store %arg16[%c0_113, %c0_114], %200 {strides = array<i32>} : memref<16x32xf32, #tpu.memory_space<vmem>>, vector<16x32xf32>,
    } else {
    }
    %c0 = arith.constant 0 : index
    %c0_1 = arith.constant 0 : index
    %3 = vector.load %arg16[%c0, %c0_1] : memref<16x32xf32, #tpu.memory_space<vmem>>, vector<16x32xf32>
    %4 = arith.truncf %3 : vector<16x32xf32> to vector<16x32xbf16>
    %c0_2 = arith.constant 0 : index
    %c0_3 = arith.constant 0 : index
    %c0_4 = arith.constant 0 : index
    %5 = vector.load %arg3[%c0_2, %c0_3, %c0_4] : memref<1x32x96xbf16, #tpu.memory_space<vmem>>, vector<1x32x96xbf16>
    %6 = vector.shape_cast %5 : vector<1x32x96xbf16> to vector<32x96xbf16>
    %cst = arith.constant dense<0.000000e+00> : vector<16x96xf32>
    %7 = tpu.matmul %4, %6, %cst {dimension_numbers = #tpu.dot_dimension_numbers<[1], [0], [0], [1], [0, 0, 1, 1], [], []>} : vector<16x32xbf16>, vector<32x96xbf16>, vector<16x96xf32> -> vector<16x96xf32>
    %c0_5 = arith.constant 0 : index
    %c0_6 = arith.constant 0 : index
    %c0_7 = arith.constant 0 : index
    %8 = vector.load %arg4[%c0_5, %c0_6, %c0_7] : memref<1x1x96xf32, #tpu.memory_space<vmem>>, vector<1x1x96xf32>
    %9 = vector.shape_cast %8 : vector<1x1x96xf32> to vector<1x96xf32>
    %10 = vector.broadcast %9 : vector<1x96xf32> to vector<16x96xf32>
    %11 = arith.addf %7, %10 : vector<16x96xf32>
    %c0_8 = arith.constant 0 : index
    %c0_9 = arith.constant 0 : index
    %12 = vector.load %arg17[%c0_8, %c0_9] : memref<16x96xf32, #tpu.memory_space<vmem>>, vector<16x96xf32>
    tpu.vector_store %arg17[%c0_8, %c0_9], %11 {strides = array<i32>} : memref<16x96xf32, #tpu.memory_space<vmem>>, vector<16x96xf32>,
    %c0_10 = arith.constant 0 : index
    %c0_11 = arith.constant 0 : index
    %13 = vector.load %arg2[%c0_10, %c0_11] : memref<2x8xf32, #tpu.memory_space<vmem>>, vector<1x8xf32>
    %c0_12 = arith.constant 0 : index
    %c0_13 = arith.constant 0 : index
    %14 = vector.load %arg17[%c0_12, %c0_13] : memref<16x96xf32, #tpu.memory_space<vmem>>, vector<8x16xf32>
    %cst_14 = arith.constant 2.500000e-01 : f32
    %15 = vector.broadcast %cst_14 : f32 to vector<8x16xf32>
    %16 = arith.mulf %14, %15 : vector<8x16xf32>
    %c0_15 = arith.constant 0 : index
    %c32 = arith.constant 32 : index
    %17 = vector.load %arg17[%c0_15, %c32] : memref<16x96xf32, #tpu.memory_space<vmem>>, vector<8x16xf32>
    %c0_16 = arith.constant 0 : index
    %c64 = arith.constant 64 : index
    %18 = vector.load %arg17[%c0_16, %c64] : memref<16x96xf32, #tpu.memory_space<vmem>>, vector<8x16xf32>
    %19 = arith.truncf %16 : vector<8x16xf32> to vector<8x16xbf16>
    %20 = arith.truncf %17 : vector<8x16xf32> to vector<8x16xbf16>
    %cst_17 = arith.constant dense<0.000000e+00> : vector<8x8xf32>
    %21 = tpu.matmul %19, %20, %cst_17 {dimension_numbers = #tpu.dot_dimension_numbers<[1], [1], [0], [0], [0, 0, 1, 0], [], []>} : vector<8x16xbf16>, vector<8x16xbf16>, vector<8x8xf32> -> vector<8x8xf32>
    %22 = vector.broadcast %13 : vector<1x8xf32> to vector<8x8xf32>
    %23 = arith.addf %21, %22 : vector<8x8xf32>
    %cst_18 = arith.constant dense<0xFF800000> : vector<8xf32>
    %24 = vector.multi_reduction <maximumf>, %23, %cst_18 [1] : vector<8x8xf32> to vector<8xf32>
    %25 = vector.shape_cast %24 : vector<8xf32> to vector<8x1xf32>
    %26 = vector.broadcast %25 : vector<8x1xf32> to vector<8x8xf32>
    %27 = arith.subf %23, %26 : vector<8x8xf32>
    %28 = math.exp %27 : vector<8x8xf32>
    %cst_19 = arith.constant dense<0.000000e+00> : vector<8xf32>
    %29 = vector.multi_reduction <add>, %28, %cst_19 [1] : vector<8x8xf32> to vector<8xf32>
    %30 = vector.shape_cast %29 : vector<8xf32> to vector<8x1xf32>
    %31 = tpu.reciprocal %30 {approx = true} : vector<8x1xf32> -> vector<8x1xf32>
    %32 = vector.broadcast %31 : vector<8x1xf32> to vector<8x8xf32>
    %33 = arith.mulf %28, %32 : vector<8x8xf32>
    %34 = arith.truncf %33 : vector<8x8xf32> to vector<8x8xbf16>
    %35 = arith.truncf %18 : vector<8x16xf32> to vector<8x16xbf16>
    %cst_20 = arith.constant dense<0.000000e+00> : vector<8x16xf32>
    %36 = tpu.matmul %34, %35, %cst_20 {dimension_numbers = #tpu.dot_dimension_numbers<[1], [0], [0], [1], [0, 0, 1, 1], [], []>} : vector<8x8xbf16>, vector<8x16xbf16>, vector<8x16xf32> -> vector<8x16xf32>
    %c0_21 = arith.constant 0 : index
    %c0_22 = arith.constant 0 : index
    %37 = vector.load %arg18[%c0_21, %c0_22] : memref<16x32xf32, #tpu.memory_space<vmem>>, vector<8x16xf32>
    tpu.vector_store %arg18[%c0_21, %c0_22], %36 {strides = array<i32>} : memref<16x32xf32, #tpu.memory_space<vmem>>, vector<8x16xf32>,
    %c0_23 = arith.constant 0 : index
    %c16 = arith.constant 16 : index
    %38 = vector.load %arg17[%c0_23, %c16] : memref<16x96xf32, #tpu.memory_space<vmem>>, vector<8x16xf32>
    %cst_24 = arith.constant 2.500000e-01 : f32
    %39 = vector.broadcast %cst_24 : f32 to vector<8x16xf32>
    %40 = arith.mulf %38, %39 : vector<8x16xf32>
    %c0_25 = arith.constant 0 : index
    %c48 = arith.constant 48 : index
    %41 = vector.load %arg17[%c0_25, %c48] : memref<16x96xf32, #tpu.memory_space<vmem>>, vector<8x16xf32>
    %c0_26 = arith.constant 0 : index
    %c80 = arith.constant 80 : index
    %42 = vector.load %arg17[%c0_26, %c80] : memref<16x96xf32, #tpu.memory_space<vmem>>, vector<8x16xf32>
    %43 = arith.truncf %40 : vector<8x16xf32> to vector<8x16xbf16>
    %44 = arith.truncf %41 : vector<8x16xf32> to vector<8x16xbf16>
    %cst_27 = arith.constant dense<0.000000e+00> : vector<8x8xf32>
    %45 = tpu.matmul %43, %44, %cst_27 {dimension_numbers = #tpu.dot_dimension_numbers<[1], [1], [0], [0], [0, 0, 1, 0], [], []>} : vector<8x16xbf16>, vector<8x16xbf16>, vector<8x8xf32> -> vector<8x8xf32>
    %46 = vector.broadcast %13 : vector<1x8xf32> to vector<8x8xf32>
    %47 = arith.addf %45, %46 : vector<8x8xf32>
    %cst_28 = arith.constant dense<0xFF800000> : vector<8xf32>
    %48 = vector.multi_reduction <maximumf>, %47, %cst_28 [1] : vector<8x8xf32> to vector<8xf32>
    %49 = vector.shape_cast %48 : vector<8xf32> to vector<8x1xf32>
    %50 = vector.broadcast %49 : vector<8x1xf32> to vector<8x8xf32>
    %51 = arith.subf %47, %50 : vector<8x8xf32>
    %52 = math.exp %51 : vector<8x8xf32>
    %cst_29 = arith.constant dense<0.000000e+00> : vector<8xf32>
    %53 = vector.multi_reduction <add>, %52, %cst_29 [1] : vector<8x8xf32> to vector<8xf32>
    %54 = vector.shape_cast %53 : vector<8xf32> to vector<8x1xf32>
    %55 = tpu.reciprocal %54 {approx = true} : vector<8x1xf32> -> vector<8x1xf32>
    %56 = vector.broadcast %55 : vector<8x1xf32> to vector<8x8xf32>
    %57 = arith.mulf %52, %56 : vector<8x8xf32>
    %58 = arith.truncf %57 : vector<8x8xf32> to vector<8x8xbf16>
    %59 = arith.truncf %42 : vector<8x16xf32> to vector<8x16xbf16>
    %cst_30 = arith.constant dense<0.000000e+00> : vector<8x16xf32>
    %60 = tpu.matmul %58, %59, %cst_30 {dimension_numbers = #tpu.dot_dimension_numbers<[1], [0], [0], [1], [0, 0, 1, 1], [], []>} : vector<8x8xbf16>, vector<8x16xbf16>, vector<8x16xf32> -> vector<8x16xf32>
    %c0_31 = arith.constant 0 : index
    %c16_32 = arith.constant 16 : index
    %61 = vector.load %arg18[%c0_31, %c16_32] : memref<16x32xf32, #tpu.memory_space<vmem>>, vector<8x16xf32>
    tpu.vector_store %arg18[%c0_31, %c16_32], %60 {strides = array<i32>} : memref<16x32xf32, #tpu.memory_space<vmem>>, vector<8x16xf32>,
    %c1 = arith.constant 1 : index
    %c0_33 = arith.constant 0 : index
    %62 = vector.load %arg2[%c1, %c0_33] : memref<2x8xf32, #tpu.memory_space<vmem>>, vector<1x8xf32>
    %c8 = arith.constant 8 : index
    %c0_34 = arith.constant 0 : index
    %63 = vector.load %arg17[%c8, %c0_34] : memref<16x96xf32, #tpu.memory_space<vmem>>, vector<8x16xf32>
    %cst_35 = arith.constant 2.500000e-01 : f32
    %64 = vector.broadcast %cst_35 : f32 to vector<8x16xf32>
    %65 = arith.mulf %63, %64 : vector<8x16xf32>
    %c8_36 = arith.constant 8 : index
    %c32_37 = arith.constant 32 : index
    %66 = vector.load %arg17[%c8_36, %c32_37] : memref<16x96xf32, #tpu.memory_space<vmem>>, vector<8x16xf32>
    %c8_38 = arith.constant 8 : index
    %c64_39 = arith.constant 64 : index
    %67 = vector.load %arg17[%c8_38, %c64_39] : memref<16x96xf32, #tpu.memory_space<vmem>>, vector<8x16xf32>
    %68 = arith.truncf %65 : vector<8x16xf32> to vector<8x16xbf16>
    %69 = arith.truncf %66 : vector<8x16xf32> to vector<8x16xbf16>
    %cst_40 = arith.constant dense<0.000000e+00> : vector<8x8xf32>
    %70 = tpu.matmul %68, %69, %cst_40 {dimension_numbers = #tpu.dot_dimension_numbers<[1], [1], [0], [0], [0, 0, 1, 0], [], []>} : vector<8x16xbf16>, vector<8x16xbf16>, vector<8x8xf32> -> vector<8x8xf32>
    %71 = vector.broadcast %62 : vector<1x8xf32> to vector<8x8xf32>
    %72 = arith.addf %70, %71 : vector<8x8xf32>
    %cst_41 = arith.constant dense<0xFF800000> : vector<8xf32>
    %73 = vector.multi_reduction <maximumf>, %72, %cst_41 [1] : vector<8x8xf32> to vector<8xf32>
    %74 = vector.shape_cast %73 : vector<8xf32> to vector<8x1xf32>
    %75 = vector.broadcast %74 : vector<8x1xf32> to vector<8x8xf32>
    %76 = arith.subf %72, %75 : vector<8x8xf32>
    %77 = math.exp %76 : vector<8x8xf32>
    %cst_42 = arith.constant dense<0.000000e+00> : vector<8xf32>
    %78 = vector.multi_reduction <add>, %77, %cst_42 [1] : vector<8x8xf32> to vector<8xf32>
    %79 = vector.shape_cast %78 : vector<8xf32> to vector<8x1xf32>
    %80 = tpu.reciprocal %79 {approx = true} : vector<8x1xf32> -> vector<8x1xf32>
    %81 = vector.broadcast %80 : vector<8x1xf32> to vector<8x8xf32>
    %82 = arith.mulf %77, %81 : vector<8x8xf32>
    %83 = arith.truncf %82 : vector<8x8xf32> to vector<8x8xbf16>
    %84 = arith.truncf %67 : vector<8x16xf32> to vector<8x16xbf16>
    %cst_43 = arith.constant dense<0.000000e+00> : vector<8x16xf32>
    %85 = tpu.matmul %83, %84, %cst_43 {dimension_numbers = #tpu.dot_dimension_numbers<[1], [0], [0], [1], [0, 0, 1, 1], [], []>} : vector<8x8xbf16>, vector<8x16xbf16>, vector<8x16xf32> -> vector<8x16xf32>
    %c8_44 = arith.constant 8 : index
    %c0_45 = arith.constant 0 : index
    %86 = vector.load %arg18[%c8_44, %c0_45] : memref<16x32xf32, #tpu.memory_space<vmem>>, vector<8x16xf32>
    tpu.vector_store %arg18[%c8_44, %c0_45], %85 {strides = array<i32>} : memref<16x32xf32, #tpu.memory_space<vmem>>, vector<8x16xf32>,
    %c8_46 = arith.constant 8 : index
    %c16_47 = arith.constant 16 : index
    %87 = vector.load %arg17[%c8_46, %c16_47] : memref<16x96xf32, #tpu.memory_space<vmem>>, vector<8x16xf32>
    %cst_48 = arith.constant 2.500000e-01 : f32
    %88 = vector.broadcast %cst_48 : f32 to vector<8x16xf32>
    %89 = arith.mulf %87, %88 : vector<8x16xf32>
    %c8_49 = arith.constant 8 : index
    %c48_50 = arith.constant 48 : index
    %90 = vector.load %arg17[%c8_49, %c48_50] : memref<16x96xf32, #tpu.memory_space<vmem>>, vector<8x16xf32>
    %c8_51 = arith.constant 8 : index
    %c80_52 = arith.constant 80 : index
    %91 = vector.load %arg17[%c8_51, %c80_52] : memref<16x96xf32, #tpu.memory_space<vmem>>, vector<8x16xf32>
    %92 = arith.truncf %89 : vector<8x16xf32> to vector<8x16xbf16>
    %93 = arith.truncf %90 : vector<8x16xf32> to vector<8x16xbf16>
    %cst_53 = arith.constant dense<0.000000e+00> : vector<8x8xf32>
    %94 = tpu.matmul %92, %93, %cst_53 {dimension_numbers = #tpu.dot_dimension_numbers<[1], [1], [0], [0], [0, 0, 1, 0], [], []>} : vector<8x16xbf16>, vector<8x16xbf16>, vector<8x8xf32> -> vector<8x8xf32>
    %95 = vector.broadcast %62 : vector<1x8xf32> to vector<8x8xf32>
    %96 = arith.addf %94, %95 : vector<8x8xf32>
    %cst_54 = arith.constant dense<0xFF800000> : vector<8xf32>
    %97 = vector.multi_reduction <maximumf>, %96, %cst_54 [1] : vector<8x8xf32> to vector<8xf32>
    %98 = vector.shape_cast %97 : vector<8xf32> to vector<8x1xf32>
    %99 = vector.broadcast %98 : vector<8x1xf32> to vector<8x8xf32>
    %100 = arith.subf %96, %99 : vector<8x8xf32>
    %101 = math.exp %100 : vector<8x8xf32>
    %cst_55 = arith.constant dense<0.000000e+00> : vector<8xf32>
    %102 = vector.multi_reduction <add>, %101, %cst_55 [1] : vector<8x8xf32> to vector<8xf32>
    %103 = vector.shape_cast %102 : vector<8xf32> to vector<8x1xf32>
    %104 = tpu.reciprocal %103 {approx = true} : vector<8x1xf32> -> vector<8x1xf32>
    %105 = vector.broadcast %104 : vector<8x1xf32> to vector<8x8xf32>
    %106 = arith.mulf %101, %105 : vector<8x8xf32>
    %107 = arith.truncf %106 : vector<8x8xf32> to vector<8x8xbf16>
    %108 = arith.truncf %91 : vector<8x16xf32> to vector<8x16xbf16>
    %cst_56 = arith.constant dense<0.000000e+00> : vector<8x16xf32>
    %109 = tpu.matmul %107, %108, %cst_56 {dimension_numbers = #tpu.dot_dimension_numbers<[1], [0], [0], [1], [0, 0, 1, 1], [], []>} : vector<8x8xbf16>, vector<8x16xbf16>, vector<8x16xf32> -> vector<8x16xf32>
    %c8_57 = arith.constant 8 : index
    %c16_58 = arith.constant 16 : index
    %110 = vector.load %arg18[%c8_57, %c16_58] : memref<16x32xf32, #tpu.memory_space<vmem>>, vector<8x16xf32>
    tpu.vector_store %arg18[%c8_57, %c16_58], %109 {strides = array<i32>} : memref<16x32xf32, #tpu.memory_space<vmem>>, vector<8x16xf32>,
    %c0_59 = arith.constant 0 : index
    %c0_60 = arith.constant 0 : index
    %111 = vector.load %arg18[%c0_59, %c0_60] : memref<16x32xf32, #tpu.memory_space<vmem>>, vector<16x32xf32>
    %112 = arith.truncf %111 : vector<16x32xf32> to vector<16x32xbf16>
    %c0_61 = arith.constant 0 : index
    %c0_62 = arith.constant 0 : index
    %c0_63 = arith.constant 0 : index
    %113 = vector.load %arg5[%c0_61, %c0_62, %c0_63] : memref<1x32x32xbf16, #tpu.memory_space<vmem>>, vector<1x32x32xbf16>
    %114 = vector.shape_cast %113 : vector<1x32x32xbf16> to vector<32x32xbf16>
    %cst_64 = arith.constant dense<0.000000e+00> : vector<16x32xf32>
    %115 = tpu.matmul %112, %114, %cst_64 {dimension_numbers = #tpu.dot_dimension_numbers<[1], [0], [0], [1], [0, 0, 1, 1], [], []>} : vector<16x32xbf16>, vector<32x32xbf16>, vector<16x32xf32> -> vector<16x32xf32>
    %c0_65 = arith.constant 0 : index
    %c0_66 = arith.constant 0 : index
    %c0_67 = arith.constant 0 : index
    %116 = vector.load %arg6[%c0_65, %c0_66, %c0_67] : memref<1x1x32xf32, #tpu.memory_space<vmem>>, vector<1x1x32xf32>
    %117 = vector.shape_cast %116 : vector<1x1x32xf32> to vector<1x32xf32>
    %118 = vector.broadcast %117 : vector<1x32xf32> to vector<16x32xf32>
    %119 = arith.addf %115, %118 : vector<16x32xf32>
    %120 = arith.addf %3, %119 : vector<16x32xf32>
    %cst_68 = arith.constant dense<0.000000e+00> : vector<16xf32>
    %121 = vector.multi_reduction <add>, %120, %cst_68 [1] : vector<16x32xf32> to vector<16xf32>
    %122 = vector.shape_cast %121 : vector<16xf32> to vector<16x1xf32>
    %cst_69 = arith.constant 3.200000e+01 : f32
    %123 = vector.broadcast %cst_69 : f32 to vector<16x1xf32>
    %124 = arith.divf %122, %123 : vector<16x1xf32>
    %125 = vector.broadcast %124 : vector<16x1xf32> to vector<16x32xf32>
    %126 = arith.subf %120, %125 : vector<16x32xf32>
    %127 = arith.mulf %126, %126 : vector<16x32xf32>
    %cst_70 = arith.constant dense<0.000000e+00> : vector<16xf32>
    %128 = vector.multi_reduction <add>, %127, %cst_70 [1] : vector<16x32xf32> to vector<16xf32>
    %129 = vector.shape_cast %128 : vector<16xf32> to vector<16x1xf32>
    %cst_71 = arith.constant 3.200000e+01 : f32
    %130 = vector.broadcast %cst_71 : f32 to vector<16x1xf32>
    %131 = arith.divf %129, %130 : vector<16x1xf32>
    %132 = vector.broadcast %124 : vector<16x1xf32> to vector<16x32xf32>
    %133 = arith.subf %120, %132 : vector<16x32xf32>
    %cst_72 = arith.constant 9.99999974E-6 : f32
    %134 = vector.broadcast %cst_72 : f32 to vector<16x1xf32>
    %135 = arith.addf %131, %134 : vector<16x1xf32>
    %136 = math.rsqrt %135 : vector<16x1xf32>
    %137 = vector.broadcast %136 : vector<16x1xf32> to vector<16x32xf32>
    %138 = arith.mulf %133, %137 : vector<16x32xf32>
    %c0_73 = arith.constant 0 : index
    %c0_74 = arith.constant 0 : index
    %c0_75 = arith.constant 0 : index
    %139 = vector.load %arg7[%c0_73, %c0_74, %c0_75] : memref<1x1x32xf32, #tpu.memory_space<vmem>>, vector<1x1x32xf32>
    %140 = vector.shape_cast %139 : vector<1x1x32xf32> to vector<1x32xf32>
    %141 = vector.broadcast %140 : vector<1x32xf32> to vector<16x32xf32>
    %142 = arith.mulf %138, %141 : vector<16x32xf32>
    %c0_76 = arith.constant 0 : index
    %c0_77 = arith.constant 0 : index
    %c0_78 = arith.constant 0 : index
    %143 = vector.load %arg8[%c0_76, %c0_77, %c0_78] : memref<1x1x32xf32, #tpu.memory_space<vmem>>, vector<1x1x32xf32>
    %144 = vector.shape_cast %143 : vector<1x1x32xf32> to vector<1x32xf32>
    %145 = vector.broadcast %144 : vector<1x32xf32> to vector<16x32xf32>
    %146 = arith.addf %142, %145 : vector<16x32xf32>
    %147 = arith.truncf %146 : vector<16x32xf32> to vector<16x32xbf16>
    %c0_79 = arith.constant 0 : index
    %c0_80 = arith.constant 0 : index
    %c0_81 = arith.constant 0 : index
    %148 = vector.load %arg9[%c0_79, %c0_80, %c0_81] : memref<1x32x64xbf16, #tpu.memory_space<vmem>>, vector<1x32x64xbf16>
    %149 = vector.shape_cast %148 : vector<1x32x64xbf16> to vector<32x64xbf16>
    %cst_82 = arith.constant dense<0.000000e+00> : vector<16x64xf32>
    %150 = tpu.matmul %147, %149, %cst_82 {dimension_numbers = #tpu.dot_dimension_numbers<[1], [0], [0], [1], [0, 0, 1, 1], [], []>} : vector<16x32xbf16>, vector<32x64xbf16>, vector<16x64xf32> -> vector<16x64xf32>
    %c0_83 = arith.constant 0 : index
    %c0_84 = arith.constant 0 : index
    %c0_85 = arith.constant 0 : index
    %151 = vector.load %arg10[%c0_83, %c0_84, %c0_85] : memref<1x1x64xf32, #tpu.memory_space<vmem>>, vector<1x1x64xf32>
    %152 = vector.shape_cast %151 : vector<1x1x64xf32> to vector<1x64xf32>
    %153 = vector.broadcast %152 : vector<1x64xf32> to vector<16x64xf32>
    %154 = arith.addf %150, %153 : vector<16x64xf32>
    %cst_86 = arith.constant 5.000000e-01 : f32
    %155 = vector.broadcast %cst_86 : f32 to vector<16x64xf32>
    %156 = arith.mulf %154, %155 : vector<16x64xf32>
    %cst_87 = arith.constant 0.707106769 : f32
    %157 = vector.broadcast %cst_87 : f32 to vector<16x64xf32>
    %158 = arith.mulf %154, %157 : vector<16x64xf32>
    %159 = math.erf %158 : vector<16x64xf32>
    %cst_88 = arith.constant 1.000000e+00 : f32
    %160 = vector.broadcast %cst_88 : f32 to vector<16x64xf32>
    %161 = arith.addf %160, %159 : vector<16x64xf32>
    %162 = arith.mulf %156, %161 : vector<16x64xf32>
    %163 = arith.truncf %162 : vector<16x64xf32> to vector<16x64xbf16>
    %c0_89 = arith.constant 0 : index
    %c0_90 = arith.constant 0 : index
    %c0_91 = arith.constant 0 : index
    %164 = vector.load %arg11[%c0_89, %c0_90, %c0_91] : memref<1x64x32xbf16, #tpu.memory_space<vmem>>, vector<1x64x32xbf16>
    %165 = vector.shape_cast %164 : vector<1x64x32xbf16> to vector<64x32xbf16>
    %cst_92 = arith.constant dense<0.000000e+00> : vector<16x32xf32>
    %166 = tpu.matmul %163, %165, %cst_92 {dimension_numbers = #tpu.dot_dimension_numbers<[1], [0], [0], [1], [0, 0, 1, 1], [], []>} : vector<16x64xbf16>, vector<64x32xbf16>, vector<16x32xf32> -> vector<16x32xf32>
    %c0_93 = arith.constant 0 : index
    %c0_94 = arith.constant 0 : index
    %c0_95 = arith.constant 0 : index
    %167 = vector.load %arg12[%c0_93, %c0_94, %c0_95] : memref<1x1x32xf32, #tpu.memory_space<vmem>>, vector<1x1x32xf32>
    %168 = vector.shape_cast %167 : vector<1x1x32xf32> to vector<1x32xf32>
    %169 = vector.broadcast %168 : vector<1x32xf32> to vector<16x32xf32>
    %170 = arith.addf %166, %169 : vector<16x32xf32>
    %171 = arith.addf %146, %170 : vector<16x32xf32>
    %cst_96 = arith.constant dense<0.000000e+00> : vector<16xf32>
    %172 = vector.multi_reduction <add>, %171, %cst_96 [1] : vector<16x32xf32> to vector<16xf32>
    %173 = vector.shape_cast %172 : vector<16xf32> to vector<16x1xf32>
    %cst_97 = arith.constant 3.200000e+01 : f32
    %174 = vector.broadcast %cst_97 : f32 to vector<16x1xf32>
    %175 = arith.divf %173, %174 : vector<16x1xf32>
    %176 = vector.broadcast %175 : vector<16x1xf32> to vector<16x32xf32>
    %177 = arith.subf %171, %176 : vector<16x32xf32>
    %178 = arith.mulf %177, %177 : vector<16x32xf32>
    %cst_98 = arith.constant dense<0.000000e+00> : vector<16xf32>
    %179 = vector.multi_reduction <add>, %178, %cst_98 [1] : vector<16x32xf32> to vector<16xf32>
    %180 = vector.shape_cast %179 : vector<16xf32> to vector<16x1xf32>
    %cst_99 = arith.constant 3.200000e+01 : f32
    %181 = vector.broadcast %cst_99 : f32 to vector<16x1xf32>
    %182 = arith.divf %180, %181 : vector<16x1xf32>
    %183 = vector.broadcast %175 : vector<16x1xf32> to vector<16x32xf32>
    %184 = arith.subf %171, %183 : vector<16x32xf32>
    %cst_100 = arith.constant 9.99999974E-6 : f32
    %185 = vector.broadcast %cst_100 : f32 to vector<16x1xf32>
    %186 = arith.addf %182, %185 : vector<16x1xf32>
    %187 = math.rsqrt %186 : vector<16x1xf32>
    %188 = vector.broadcast %187 : vector<16x1xf32> to vector<16x32xf32>
    %189 = arith.mulf %184, %188 : vector<16x32xf32>
    %c0_101 = arith.constant 0 : index
    %c0_102 = arith.constant 0 : index
    %c0_103 = arith.constant 0 : index
    %190 = vector.load %arg13[%c0_101, %c0_102, %c0_103] : memref<1x1x32xf32, #tpu.memory_space<vmem>>, vector<1x1x32xf32>
    %191 = vector.shape_cast %190 : vector<1x1x32xf32> to vector<1x32xf32>
    %192 = vector.broadcast %191 : vector<1x32xf32> to vector<16x32xf32>
    %193 = arith.mulf %189, %192 : vector<16x32xf32>
    %c0_104 = arith.constant 0 : index
    %c0_105 = arith.constant 0 : index
    %c0_106 = arith.constant 0 : index
    %194 = vector.load %arg14[%c0_104, %c0_105, %c0_106] : memref<1x1x32xf32, #tpu.memory_space<vmem>>, vector<1x1x32xf32>
    %195 = vector.shape_cast %194 : vector<1x1x32xf32> to vector<1x32xf32>
    %196 = vector.broadcast %195 : vector<1x32xf32> to vector<16x32xf32>
    %197 = arith.addf %193, %196 : vector<16x32xf32>
    %c0_107 = arith.constant 0 : index
    %c0_108 = arith.constant 0 : index
    %198 = vector.load %arg16[%c0_107, %c0_108] : memref<16x32xf32, #tpu.memory_space<vmem>>, vector<16x32xf32>
    tpu.vector_store %arg16[%c0_107, %c0_108], %197 {strides = array<i32>} : memref<16x32xf32, #tpu.memory_space<vmem>>, vector<16x32xf32>,
    %c0_109 = arith.constant 0 : index
    %c0_110 = arith.constant 0 : index
    %199 = vector.load %arg15[%c0_109, %c0_110] : memref<16x32xf32, #tpu.memory_space<vmem>>, vector<16x32xf32>
    tpu.vector_store %arg15[%c0_109, %c0_110], %197 {strides = array<i32>} : memref<16x32xf32, #tpu.memory_space<vmem>>, vector<16x32xf32>,
    return
  }
  func.func @transform_0(%arg0: i32) -> (i32, i32) {
    %c0_i32 = arith.constant 0 : i32
    %c0_i32_0 = arith.constant 0 : i32
    %c0_i32_1 = arith.constant 0 : i32
    return %c0_i32, %c0_i32_0 : i32, i32
  }
  func.func @transform_1(%arg0: i32) -> (i32, i32) {
    %c0_i32 = arith.constant 0 : i32
    %c0_i32_0 = arith.constant 0 : i32
    %c0_i32_1 = arith.constant 0 : i32
    return %c0_i32, %c0_i32_0 : i32, i32
  }
  func.func @transform_2(%arg0: i32) -> (i32, i32, i32) {
    %c0_i32 = arith.constant 0 : i32
    %c0_i32_0 = arith.constant 0 : i32
    %c0_i32_1 = arith.constant 0 : i32
    return %arg0, %c0_i32, %c0_i32_0 : i32, i32, i32
  }
  func.func @transform_3(%arg0: i32) -> (i32, i32, i32) {
    %c0_i32 = arith.constant 0 : i32
    %c0_i32_0 = arith.constant 0 : i32
    %c0_i32_1 = arith.constant 0 : i32
    return %arg0, %c0_i32, %c0_i32_0 : i32, i32, i32
  }
  func.func @transform_4(%arg0: i32) -> (i32, i32, i32) {
    %c0_i32 = arith.constant 0 : i32
    %c0_i32_0 = arith.constant 0 : i32
    %c0_i32_1 = arith.constant 0 : i32
    return %arg0, %c0_i32, %c0_i32_0 : i32, i32, i32
  }
  func.func @transform_5(%arg0: i32) -> (i32, i32, i32) {
    %c0_i32 = arith.constant 0 : i32
    %c0_i32_0 = arith.constant 0 : i32
    %c0_i32_1 = arith.constant 0 : i32
    return %arg0, %c0_i32, %c0_i32_0 : i32, i32, i32
  }
  func.func @transform_6(%arg0: i32) -> (i32, i32, i32) {
    %c0_i32 = arith.constant 0 : i32
    %c0_i32_0 = arith.constant 0 : i32
    %c0_i32_1 = arith.constant 0 : i32
    return %arg0, %c0_i32, %c0_i32_0 : i32, i32, i32
  }
  func.func @transform_7(%arg0: i32) -> (i32, i32, i32) {
    %c0_i32 = arith.constant 0 : i32
    %c0_i32_0 = arith.constant 0 : i32
    %c0_i32_1 = arith.constant 0 : i32
    return %arg0, %c0_i32, %c0_i32_0 : i32, i32, i32
  }
  func.func @transform_8(%arg0: i32) -> (i32, i32, i32) {
    %c0_i32 = arith.constant 0 : i32
    %c0_i32_0 = arith.constant 0 : i32
    %c0_i32_1 = arith.constant 0 : i32
    return %arg0, %c0_i32, %c0_i32_0 : i32, i32, i32
  }
  func.func @transform_9(%arg0: i32) -> (i32, i32, i32) {
    %c0_i32 = arith.constant 0 : i32
    %c0_i32_0 = arith.constant 0 : i32
    %c0_i32_1 = arith.constant 0 : i32
    return %arg0, %c0_i32, %c0_i32_0 : i32, i32, i32
  }
  func.func @transform_10(%arg0: i32) -> (i32, i32, i32) {
    %c0_i32 = arith.constant 0 : i32
    %c0_i32_0 = arith.constant 0 : i32
    %c0_i32_1 = arith.constant 0 : i32
    return %arg0, %c0_i32, %c0_i32_0 : i32, i32, i32
  }
  func.func @transform_11(%arg0: i32) -> (i32, i32, i32) {
    %c0_i32 = arith.constant 0 : i32
    %c0_i32_0 = arith.constant 0 : i32
    %c0_i32_1 = arith.constant 0 : i32
    return %arg0, %c0_i32, %c0_i32_0 : i32, i32, i32
  }
  func.func @transform_12(%arg0: i32) -> (i32, i32, i32) {
    %c0_i32 = arith.constant 0 : i32
    %c0_i32_0 = arith.constant 0 : i32
    %c0_i32_1 = arith.constant 0 : i32
    return %arg0, %c0_i32, %c0_i32_0 : i32, i32, i32
  }
  func.func @transform_13(%arg0: i32) -> (i32, i32, i32) {
    %c0_i32 = arith.constant 0 : i32
    %c0_i32_0 = arith.constant 0 : i32
    %c0_i32_1 = arith.constant 0 : i32
    return %arg0, %c0_i32, %c0_i32_0 : i32, i32, i32
  }
  func.func @transform_14(%arg0: i32) -> (i32, i32) {
    %c0_i32 = arith.constant 0 : i32
    %c0_i32_0 = arith.constant 0 : i32
    %c0_i32_1 = arith.constant 0 : i32
    return %c0_i32, %c0_i32_0 : i32, i32
  }
}

module attributes {stable_mosaic.version = 11 : i64} {
  func.func @_linear_kernel(%arg0: i32, %arg1: memref<16x32xf32, #tpu.memory_space<vmem>>, %arg2: memref<32x1536xbf16, #tpu.memory_space<vmem>>, %arg3: memref<1x1536xf32, #tpu.memory_space<vmem>>, %arg4: memref<16x1536xf32, #tpu.memory_space<vmem>>) attributes {dimension_semantics = [#tpu.dimension_semantics<parallel>], iteration_bounds = array<i64: 1>, scalar_prefetch = 0 : i64, scratch_operands = 0 : i64, tpu.core_type = #tpu.core_type<tc>, window_params = [{transform_indices = @transform_0, window_bounds = array<i64: 16, 32>}, {pipeline_mode = #tpu.pipeline_mode<synchronous>, transform_indices = @transform_1, window_bounds = array<i64: 32, 1536>}, {pipeline_mode = #tpu.pipeline_mode<synchronous>, transform_indices = @transform_2, window_bounds = array<i64: 1, 1536>}, {transform_indices = @transform_3, window_bounds = array<i64: 16, 1536>}]} {
    %c0 = arith.constant 0 : index
    %c0_0 = arith.constant 0 : index
    %0 = vector.load %arg1[%c0, %c0_0] : memref<16x32xf32, #tpu.memory_space<vmem>>, vector<16x32xf32>
    %1 = arith.truncf %0 : vector<16x32xf32> to vector<16x32xbf16>
    %c0_1 = arith.constant 0 : index
    %c0_2 = arith.constant 0 : index
    %2 = vector.load %arg2[%c0_1, %c0_2] : memref<32x1536xbf16, #tpu.memory_space<vmem>>, vector<32x1536xbf16>
    %cst = arith.constant dense<0.000000e+00> : vector<16x1536xf32>
    %3 = tpu.matmul %1, %2, %cst {dimension_numbers = #tpu.dot_dimension_numbers<[1], [0], [0], [1], [0, 0, 1, 1], [], []>} : vector<16x32xbf16>, vector<32x1536xbf16>, vector<16x1536xf32> -> vector<16x1536xf32>
    %c0_3 = arith.constant 0 : index
    %c0_4 = arith.constant 0 : index
    %4 = vector.load %arg3[%c0_3, %c0_4] : memref<1x1536xf32, #tpu.memory_space<vmem>>, vector<1x1536xf32>
    %5 = vector.broadcast %4 : vector<1x1536xf32> to vector<16x1536xf32>
    %6 = arith.addf %3, %5 : vector<16x1536xf32>
    %c0_5 = arith.constant 0 : index
    %c0_6 = arith.constant 0 : index
    %7 = vector.load %arg4[%c0_5, %c0_6] : memref<16x1536xf32, #tpu.memory_space<vmem>>, vector<16x1536xf32>
    tpu.vector_store %arg4[%c0_5, %c0_6], %6 {strides = array<i32>} : memref<16x1536xf32, #tpu.memory_space<vmem>>, vector<16x1536xf32>,
    return
  }
  func.func @transform_0(%arg0: i32) -> (i32, i32) {
    %c0_i32 = arith.constant 0 : i32
    %c0_i32_0 = arith.constant 0 : i32
    return %arg0, %c0_i32 : i32, i32
  }
  func.func @transform_1(%arg0: i32) -> (i32, i32) {
    %c0_i32 = arith.constant 0 : i32
    %c0_i32_0 = arith.constant 0 : i32
    %c0_i32_1 = arith.constant 0 : i32
    return %c0_i32, %c0_i32_0 : i32, i32
  }
  func.func @transform_2(%arg0: i32) -> (i32, i32) {
    %c0_i32 = arith.constant 0 : i32
    %c0_i32_0 = arith.constant 0 : i32
    %c0_i32_1 = arith.constant 0 : i32
    return %c0_i32, %c0_i32_0 : i32, i32
  }
  func.func @transform_3(%arg0: i32) -> (i32, i32) {
    %c0_i32 = arith.constant 0 : i32
    %c0_i32_0 = arith.constant 0 : i32
    return %arg0, %c0_i32 : i32, i32
  }
}

module attributes {stable_mosaic.version = 11 : i64} {
  func.func @_linear_kernel(%arg0: i32, %arg1: memref<16x512xf32, #tpu.memory_space<vmem>>, %arg2: memref<512x1536xbf16, #tpu.memory_space<vmem>>, %arg3: memref<1x1536xf32, #tpu.memory_space<vmem>>, %arg4: memref<16x1536xf32, #tpu.memory_space<vmem>>) attributes {dimension_semantics = [#tpu.dimension_semantics<parallel>], iteration_bounds = array<i64: 1>, scalar_prefetch = 0 : i64, scratch_operands = 0 : i64, tpu.core_type = #tpu.core_type<tc>, window_params = [{transform_indices = @transform_0, window_bounds = array<i64: 16, 512>}, {pipeline_mode = #tpu.pipeline_mode<synchronous>, transform_indices = @transform_1, window_bounds = array<i64: 512, 1536>}, {pipeline_mode = #tpu.pipeline_mode<synchronous>, transform_indices = @transform_2, window_bounds = array<i64: 1, 1536>}, {transform_indices = @transform_3, window_bounds = array<i64: 16, 1536>}]} {
    %c0 = arith.constant 0 : index
    %c0_0 = arith.constant 0 : index
    %0 = vector.load %arg1[%c0, %c0_0] : memref<16x512xf32, #tpu.memory_space<vmem>>, vector<16x512xf32>
    %1 = arith.truncf %0 : vector<16x512xf32> to vector<16x512xbf16>
    %c0_1 = arith.constant 0 : index
    %c0_2 = arith.constant 0 : index
    %2 = vector.load %arg2[%c0_1, %c0_2] : memref<512x1536xbf16, #tpu.memory_space<vmem>>, vector<512x1536xbf16>
    %cst = arith.constant dense<0.000000e+00> : vector<16x1536xf32>
    %3 = tpu.matmul %1, %2, %cst {dimension_numbers = #tpu.dot_dimension_numbers<[1], [0], [0], [1], [0, 0, 1, 1], [], []>} : vector<16x512xbf16>, vector<512x1536xbf16>, vector<16x1536xf32> -> vector<16x1536xf32>
    %c0_3 = arith.constant 0 : index
    %c0_4 = arith.constant 0 : index
    %4 = vector.load %arg3[%c0_3, %c0_4] : memref<1x1536xf32, #tpu.memory_space<vmem>>, vector<1x1536xf32>
    %5 = vector.broadcast %4 : vector<1x1536xf32> to vector<16x1536xf32>
    %6 = arith.addf %3, %5 : vector<16x1536xf32>
    %c0_5 = arith.constant 0 : index
    %c0_6 = arith.constant 0 : index
    %7 = vector.load %arg4[%c0_5, %c0_6] : memref<16x1536xf32, #tpu.memory_space<vmem>>, vector<16x1536xf32>
    tpu.vector_store %arg4[%c0_5, %c0_6], %6 {strides = array<i32>} : memref<16x1536xf32, #tpu.memory_space<vmem>>, vector<16x1536xf32>,
    return
  }
  func.func @transform_0(%arg0: i32) -> (i32, i32) {
    %c0_i32 = arith.constant 0 : i32
    %c0_i32_0 = arith.constant 0 : i32
    return %arg0, %c0_i32 : i32, i32
  }
  func.func @transform_1(%arg0: i32) -> (i32, i32) {
    %c0_i32 = arith.constant 0 : i32
    %c0_i32_0 = arith.constant 0 : i32
    %c0_i32_1 = arith.constant 0 : i32
    return %c0_i32, %c0_i32_0 : i32, i32
  }
  func.func @transform_2(%arg0: i32) -> (i32, i32) {
    %c0_i32 = arith.constant 0 : i32
    %c0_i32_0 = arith.constant 0 : i32
    %c0_i32_1 = arith.constant 0 : i32
    return %c0_i32, %c0_i32_0 : i32, i32
  }
  func.func @transform_3(%arg0: i32) -> (i32, i32) {
    %c0_i32 = arith.constant 0 : i32
    %c0_i32_0 = arith.constant 0 : i32
    return %arg0, %c0_i32 : i32, i32
  }
}

module attributes {stable_mosaic.version = 11 : i64} {
  func.func @_linear_kernel(%arg0: i32, %arg1: memref<16x512xf32, #tpu.memory_space<vmem>>, %arg2: memref<512x32xbf16, #tpu.memory_space<vmem>>, %arg3: memref<1x32xf32, #tpu.memory_space<vmem>>, %arg4: memref<16x32xf32, #tpu.memory_space<vmem>>) attributes {dimension_semantics = [#tpu.dimension_semantics<parallel>], iteration_bounds = array<i64: 1>, scalar_prefetch = 0 : i64, scratch_operands = 0 : i64, tpu.core_type = #tpu.core_type<tc>, window_params = [{transform_indices = @transform_0, window_bounds = array<i64: 16, 512>}, {pipeline_mode = #tpu.pipeline_mode<synchronous>, transform_indices = @transform_1, window_bounds = array<i64: 512, 32>}, {pipeline_mode = #tpu.pipeline_mode<synchronous>, transform_indices = @transform_2, window_bounds = array<i64: 1, 32>}, {transform_indices = @transform_3, window_bounds = array<i64: 16, 32>}]} {
    %c0 = arith.constant 0 : index
    %c0_0 = arith.constant 0 : index
    %0 = vector.load %arg1[%c0, %c0_0] : memref<16x512xf32, #tpu.memory_space<vmem>>, vector<16x512xf32>
    %1 = arith.truncf %0 : vector<16x512xf32> to vector<16x512xbf16>
    %c0_1 = arith.constant 0 : index
    %c0_2 = arith.constant 0 : index
    %2 = vector.load %arg2[%c0_1, %c0_2] : memref<512x32xbf16, #tpu.memory_space<vmem>>, vector<512x32xbf16>
    %cst = arith.constant dense<0.000000e+00> : vector<16x32xf32>
    %3 = tpu.matmul %1, %2, %cst {dimension_numbers = #tpu.dot_dimension_numbers<[1], [0], [0], [1], [0, 0, 1, 1], [], []>} : vector<16x512xbf16>, vector<512x32xbf16>, vector<16x32xf32> -> vector<16x32xf32>
    %c0_3 = arith.constant 0 : index
    %c0_4 = arith.constant 0 : index
    %4 = vector.load %arg3[%c0_3, %c0_4] : memref<1x32xf32, #tpu.memory_space<vmem>>, vector<1x32xf32>
    %5 = vector.broadcast %4 : vector<1x32xf32> to vector<16x32xf32>
    %6 = arith.addf %3, %5 : vector<16x32xf32>
    %c0_5 = arith.constant 0 : index
    %c0_6 = arith.constant 0 : index
    %7 = vector.load %arg4[%c0_5, %c0_6] : memref<16x32xf32, #tpu.memory_space<vmem>>, vector<16x32xf32>
    tpu.vector_store %arg4[%c0_5, %c0_6], %6 {strides = array<i32>} : memref<16x32xf32, #tpu.memory_space<vmem>>, vector<16x32xf32>,
    return
  }
  func.func @transform_0(%arg0: i32) -> (i32, i32) {
    %c0_i32 = arith.constant 0 : i32
    %c0_i32_0 = arith.constant 0 : i32
    return %arg0, %c0_i32 : i32, i32
  }
  func.func @transform_1(%arg0: i32) -> (i32, i32) {
    %c0_i32 = arith.constant 0 : i32
    %c0_i32_0 = arith.constant 0 : i32
    %c0_i32_1 = arith.constant 0 : i32
    return %c0_i32, %c0_i32_0 : i32, i32
  }
  func.func @transform_2(%arg0: i32) -> (i32, i32) {
    %c0_i32 = arith.constant 0 : i32
    %c0_i32_0 = arith.constant 0 : i32
    %c0_i32_1 = arith.constant 0 : i32
    return %c0_i32, %c0_i32_0 : i32, i32
  }
  func.func @transform_3(%arg0: i32) -> (i32, i32) {
    %c0_i32 = arith.constant 0 : i32
    %c0_i32_0 = arith.constant 0 : i32
    return %arg0, %c0_i32 : i32, i32
  }
}

module attributes {stable_mosaic.version = 11 : i64} {
  func.func @_proj_ln_kernel(%arg0: i32, %arg1: memref<2x32xf32, #tpu.memory_space<vmem>>, %arg2: memref<32x16xbf16, #tpu.memory_space<vmem>>, %arg3: memref<1x16xf32, #tpu.memory_space<vmem>>, %arg4: memref<2x16xf32, #tpu.memory_space<vmem>>) attributes {dimension_semantics = [#tpu.dimension_semantics<arbitrary>], iteration_bounds = array<i64: 1>, scalar_prefetch = 0 : i64, scratch_operands = 0 : i64, tpu.core_type = #tpu.core_type<tc>, window_params = [{pipeline_mode = #tpu.pipeline_mode<synchronous>, transform_indices = @transform_0, window_bounds = array<i64: 2, 32>}, {pipeline_mode = #tpu.pipeline_mode<synchronous>, transform_indices = @transform_1, window_bounds = array<i64: 32, 16>}, {pipeline_mode = #tpu.pipeline_mode<synchronous>, transform_indices = @transform_2, window_bounds = array<i64: 1, 16>}, {pipeline_mode = #tpu.pipeline_mode<synchronous>, transform_indices = @transform_3, window_bounds = array<i64: 2, 16>}]} {
    %c0 = arith.constant 0 : index
    %c0_0 = arith.constant 0 : index
    %0 = vector.load %arg1[%c0, %c0_0] : memref<2x32xf32, #tpu.memory_space<vmem>>, vector<2x32xf32>
    %1 = arith.truncf %0 : vector<2x32xf32> to vector<2x32xbf16>
    %c0_1 = arith.constant 0 : index
    %c0_2 = arith.constant 0 : index
    %2 = vector.load %arg2[%c0_1, %c0_2] : memref<32x16xbf16, #tpu.memory_space<vmem>>, vector<32x16xbf16>
    %cst = arith.constant dense<0.000000e+00> : vector<2x16xf32>
    %3 = tpu.matmul %1, %2, %cst {dimension_numbers = #tpu.dot_dimension_numbers<[1], [0], [0], [1], [0, 0, 1, 1], [], []>} : vector<2x32xbf16>, vector<32x16xbf16>, vector<2x16xf32> -> vector<2x16xf32>
    %c0_3 = arith.constant 0 : index
    %c0_4 = arith.constant 0 : index
    %4 = vector.load %arg3[%c0_3, %c0_4] : memref<1x16xf32, #tpu.memory_space<vmem>>, vector<1x16xf32>
    %5 = vector.broadcast %4 : vector<1x16xf32> to vector<2x16xf32>
    %6 = arith.addf %3, %5 : vector<2x16xf32>
    %cst_5 = arith.constant dense<0.000000e+00> : vector<2xf32>
    %7 = vector.multi_reduction <add>, %6, %cst_5 [1] : vector<2x16xf32> to vector<2xf32>
    %8 = vector.shape_cast %7 : vector<2xf32> to vector<2x1xf32>
    %cst_6 = arith.constant 1.600000e+01 : f32
    %9 = vector.broadcast %cst_6 : f32 to vector<2x1xf32>
    %10 = arith.divf %8, %9 : vector<2x1xf32>
    %11 = vector.broadcast %10 : vector<2x1xf32> to vector<2x16xf32>
    %12 = arith.subf %6, %11 : vector<2x16xf32>
    %13 = arith.mulf %12, %12 : vector<2x16xf32>
    %cst_7 = arith.constant dense<0.000000e+00> : vector<2xf32>
    %14 = vector.multi_reduction <add>, %13, %cst_7 [1] : vector<2x16xf32> to vector<2xf32>
    %15 = vector.shape_cast %14 : vector<2xf32> to vector<2x1xf32>
    %cst_8 = arith.constant 1.600000e+01 : f32
    %16 = vector.broadcast %cst_8 : f32 to vector<2x1xf32>
    %17 = arith.divf %15, %16 : vector<2x1xf32>
    %18 = vector.broadcast %10 : vector<2x1xf32> to vector<2x16xf32>
    %19 = arith.subf %6, %18 : vector<2x16xf32>
    %cst_9 = arith.constant 9.99999996E-13 : f32
    %20 = vector.broadcast %cst_9 : f32 to vector<2x1xf32>
    %21 = arith.addf %17, %20 : vector<2x1xf32>
    %22 = math.rsqrt %21 : vector<2x1xf32>
    %23 = vector.broadcast %22 : vector<2x1xf32> to vector<2x16xf32>
    %24 = arith.mulf %19, %23 : vector<2x16xf32>
    %c0_10 = arith.constant 0 : index
    %c0_11 = arith.constant 0 : index
    %25 = vector.load %arg4[%c0_10, %c0_11] : memref<2x16xf32, #tpu.memory_space<vmem>>, vector<2x16xf32>
    tpu.vector_store %arg4[%c0_10, %c0_11], %24 {strides = array<i32>} : memref<2x16xf32, #tpu.memory_space<vmem>>, vector<2x16xf32>,
    return
  }
  func.func @transform_0(%arg0: i32) -> (i32, i32) {
    %c0_i32 = arith.constant 0 : i32
    %c0_i32_0 = arith.constant 0 : i32
    %c0_i32_1 = arith.constant 0 : i32
    return %c0_i32, %c0_i32_0 : i32, i32
  }
  func.func @transform_1(%arg0: i32) -> (i32, i32) {
    %c0_i32 = arith.constant 0 : i32
    %c0_i32_0 = arith.constant 0 : i32
    %c0_i32_1 = arith.constant 0 : i32
    return %c0_i32, %c0_i32_0 : i32, i32
  }
  func.func @transform_2(%arg0: i32) -> (i32, i32) {
    %c0_i32 = arith.constant 0 : i32
    %c0_i32_0 = arith.constant 0 : i32
    %c0_i32_1 = arith.constant 0 : i32
    return %c0_i32, %c0_i32_0 : i32, i32
  }
  func.func @transform_3(%arg0: i32) -> (i32, i32) {
    %c0_i32 = arith.constant 0 : i32
    %c0_i32_0 = arith.constant 0 : i32
    %c0_i32_1 = arith.constant 0 : i32
    return %c0_i32, %c0_i32_0 : i32, i32
  }
}

module attributes {stable_mosaic.version = 11 : i64} {
  func.func @_matching_kernel(%arg0: i32, %arg1: memref<2x16xf32, #tpu.memory_space<vmem>>, %arg2: memref<2x16xf32, #tpu.memory_space<vmem>>, %arg3: memref<2x2xf32, #tpu.memory_space<vmem>>, %arg4: memref<1x1xf32, #tpu.memory_space<vmem>>, %arg5: memref<1x1xf32, #tpu.memory_space<vmem>>) attributes {dimension_semantics = [#tpu.dimension_semantics<arbitrary>], iteration_bounds = array<i64: 1>, scalar_prefetch = 0 : i64, scratch_operands = 0 : i64, tpu.core_type = #tpu.core_type<tc>, window_params = [{pipeline_mode = #tpu.pipeline_mode<synchronous>, transform_indices = @transform_0, window_bounds = array<i64: 2, 16>}, {pipeline_mode = #tpu.pipeline_mode<synchronous>, transform_indices = @transform_1, window_bounds = array<i64: 2, 16>}, {pipeline_mode = #tpu.pipeline_mode<synchronous>, transform_indices = @transform_2, window_bounds = array<i64: 2, 2>}, {pipeline_mode = #tpu.pipeline_mode<synchronous>, transform_indices = @transform_3, window_bounds = array<i64: 1, 1>}, {pipeline_mode = #tpu.pipeline_mode<synchronous>, transform_indices = @transform_4, window_bounds = array<i64: 1, 1>}]} {
    %c0 = arith.constant 0 : index
    %c0_0 = arith.constant 0 : index
    %0 = vector.load %arg1[%c0, %c0_0] : memref<2x16xf32, #tpu.memory_space<vmem>>, vector<2x16xf32>
    %c0_1 = arith.constant 0 : index
    %c0_2 = arith.constant 0 : index
    %1 = vector.load %arg2[%c0_1, %c0_2] : memref<2x16xf32, #tpu.memory_space<vmem>>, vector<2x16xf32>
    %cst = arith.constant dense<0.000000e+00> : vector<2x2xf32>
    %2 = tpu.matmul %0, %1, %cst {dimension_numbers = #tpu.dot_dimension_numbers<[1], [1], [0], [0], [0, 0, 1, 0], [], []>} : vector<2x16xf32>, vector<2x16xf32>, vector<2x2xf32> -> vector<2x2xf32>
    %c0_3 = arith.constant 0 : index
    %c0_4 = arith.constant 0 : index
    %3 = vector.load %arg3[%c0_3, %c0_4] : memref<2x2xf32, #tpu.memory_space<vmem>>, vector<2x2xf32>
    tpu.vector_store %arg3[%c0_3, %c0_4], %2 {strides = array<i32>} : memref<2x2xf32, #tpu.memory_space<vmem>>, vector<2x2xf32>,
    %cst_5 = arith.constant dense<0xFF800000> : vector<2xf32>
    %4 = vector.multi_reduction <maximumf>, %2, %cst_5 [1] : vector<2x2xf32> to vector<2xf32>
    %5 = vector.shape_cast %4 : vector<2xf32> to vector<2x1xf32>
    %6 = vector.broadcast %5 : vector<2x1xf32> to vector<2x2xf32>
    %7 = arith.subf %2, %6 : vector<2x2xf32>
    %8 = math.exp %7 : vector<2x2xf32>
    %cst_6 = arith.constant dense<0.000000e+00> : vector<2xf32>
    %9 = vector.multi_reduction <add>, %8, %cst_6 [1] : vector<2x2xf32> to vector<2xf32>
    %10 = vector.shape_cast %9 : vector<2xf32> to vector<2x1xf32>
    %11 = math.log %10 : vector<2x1xf32>
    %12 = vector.broadcast %11 : vector<2x1xf32> to vector<2x2xf32>
    %13 = arith.subf %7, %12 : vector<2x2xf32>
    %14 = tpu.iota {dimensions = array<i32: 0>} : vector<2x2xi32>
    %15 = tpu.iota {dimensions = array<i32: 1>} : vector<2x2xi32>
    %16 = arith.cmpi eq, %14, %15 : vector<2x2xi32>
    %cst_7 = arith.constant 0.000000e+00 : f32
    %17 = vector.broadcast %cst_7 : f32 to vector<2x2xf32>
    %18 = arith.select %16, %13, %17 : vector<2x2xi1>, vector<2x2xf32>
    %cst_8 = arith.constant dense<0.000000e+00> : vector<2xf32>
    %19 = vector.multi_reduction <add>, %18, %cst_8 [1] : vector<2x2xf32> to vector<2xf32>
    %20 = vector.shape_cast %19 : vector<2xf32> to vector<2x1xf32>
    %cst_9 = arith.constant 0.000000e+00 : f32
    %21 = vector.broadcast %cst_9 : f32 to vector<2x1xf32>
    %22 = arith.subf %21, %20 : vector<2x1xf32>
    %cst_10 = arith.constant dense<0.000000e+00> : vector<2xf32>
    %23 = vector.multi_reduction <add>, %13, %cst_10 [1] : vector<2x2xf32> to vector<2xf32>
    %24 = vector.shape_cast %23 : vector<2xf32> to vector<2x1xf32>
    %cst_11 = arith.constant 0.000000e+00 : f32
    %25 = vector.broadcast %cst_11 : f32 to vector<2x1xf32>
    %26 = arith.subf %25, %24 : vector<2x1xf32>
    %cst_12 = arith.constant 0.899999976 : f32
    %27 = vector.broadcast %cst_12 : f32 to vector<2x1xf32>
    %28 = arith.mulf %27, %22 : vector<2x1xf32>
    %cst_13 = arith.constant 5.000000e-02 : f32
    %29 = vector.broadcast %cst_13 : f32 to vector<2x1xf32>
    %30 = arith.mulf %29, %26 : vector<2x1xf32>
    %31 = arith.addf %28, %30 : vector<2x1xf32>
    %cst_14 = arith.constant dense<0.000000e+00> : vector<1xf32>
    %32 = vector.multi_reduction <add>, %31, %cst_14 [0] : vector<2x1xf32> to vector<1xf32>
    %33 = vector.shape_cast %32 : vector<1xf32> to vector<1x1xf32>
    %cst_15 = arith.constant 2.000000e+00 : f32
    %34 = vector.broadcast %cst_15 : f32 to vector<1x1xf32>
    %35 = arith.divf %33, %34 : vector<1x1xf32>
    %c0_16 = arith.constant 0 : index
    %c0_17 = arith.constant 0 : index
    %36 = vector.load %arg4[%c0_16, %c0_17] : memref<1x1xf32, #tpu.memory_space<vmem>>, vector<1x1xf32>
    tpu.vector_store %arg4[%c0_16, %c0_17], %35 {strides = array<i32>} : memref<1x1xf32, #tpu.memory_space<vmem>>, vector<1x1xf32>,
    %cst_18 = arith.constant -1.000000e+30 : f32
    %37 = vector.broadcast %cst_18 : f32 to vector<2x2xf32>
    %38 = arith.select %16, %2, %37 : vector<2x2xi1>, vector<2x2xf32>
    %cst_19 = arith.constant dense<0xFF800000> : vector<2xf32>
    %39 = vector.multi_reduction <maximumf>, %38, %cst_19 [1] : vector<2x2xf32> to vector<2xf32>
    %40 = vector.shape_cast %39 : vector<2xf32> to vector<2x1xf32>
    %41 = arith.cmpf oge, %40, %5 : vector<2x1xf32>
    %42 = arith.extui %41 : vector<2x1xi1> to vector<2x1xi32>
    %43 = arith.sitofp %42 : vector<2x1xi32> to vector<2x1xf32>
    %cst_20 = arith.constant dense<0.000000e+00> : vector<1xf32>
    %44 = vector.multi_reduction <add>, %43, %cst_20 [0] : vector<2x1xf32> to vector<1xf32>
    %45 = vector.shape_cast %44 : vector<1xf32> to vector<1x1xf32>
    %cst_21 = arith.constant 2.000000e+00 : f32
    %46 = vector.broadcast %cst_21 : f32 to vector<1x1xf32>
    %47 = arith.divf %45, %46 : vector<1x1xf32>
    %c0_22 = arith.constant 0 : index
    %c0_23 = arith.constant 0 : index
    %48 = vector.load %arg5[%c0_22, %c0_23] : memref<1x1xf32, #tpu.memory_space<vmem>>, vector<1x1xf32>
    tpu.vector_store %arg5[%c0_22, %c0_23], %47 {strides = array<i32>} : memref<1x1xf32, #tpu.memory_space<vmem>>, vector<1x1xf32>,
    return
  }
  func.func @transform_0(%arg0: i32) -> (i32, i32) {
    %c0_i32 = arith.constant 0 : i32
    %c0_i32_0 = arith.constant 0 : i32
    %c0_i32_1 = arith.constant 0 : i32
    return %c0_i32, %c0_i32_0 : i32, i32
  }
  func.func @transform_1(%arg0: i32) -> (i32, i32) {
    %c0_i32 = arith.constant 0 : i32
    %c0_i32_0 = arith.constant 0 : i32
    %c0_i32_1 = arith.constant 0 : i32
    return %c0_i32, %c0_i32_0 : i32, i32
  }
  func.func @transform_2(%arg0: i32) -> (i32, i32) {
    %c0_i32 = arith.constant 0 : i32
    %c0_i32_0 = arith.constant 0 : i32
    %c0_i32_1 = arith.constant 0 : i32
    return %c0_i32, %c0_i32_0 : i32, i32
  }
  func.func @transform_3(%arg0: i32) -> (i32, i32) {
    %c0_i32 = arith.constant 0 : i32
    %c0_i32_0 = arith.constant 0 : i32
    %c0_i32_1 = arith.constant 0 : i32
    return %c0_i32, %c0_i32_0 : i32, i32
  }
  func.func @transform_4(%arg0: i32) -> (i32, i32) {
    %c0_i32 = arith.constant 0 : i32
    %c0_i32_0 = arith.constant 0 : i32
    %c0_i32_1 = arith.constant 0 : i32
    return %c0_i32, %c0_i32_0 : i32, i32
  }
}

</mosaic_0001>

<bundles_post_ra>
// kernel: matching_model_forward.12
= control target key start
LH: loop header
LB: loop body
LE: loop exit
PB: predicated region body
PF: predicated region fallthrough
CT: control target
= control target key end

     0   :  { %8 = vsyncpa [#allocation3], 0  ;;  %s161_s12 = smov [#allocation2]   ;;  %s202_s0 = inlined_call_operand.vmem [shape: f32[2,32], index: 0, kind: input, shape index: {}]   ;;  %s203_s1 = inlined_call_operand.vmem [shape: bf16[32,16], index: 1, kind: input, shape index: {}]   ;;  %s204_s2 = inlined_call_operand.hbm [shape: f32[1,16], index: 2, kind: input, shape index: {}]   ;;  %s205_s3 = inlined_call_operand.vmem [shape: f32[2,16], index: 3, kind: output, shape index: {}]  }
   0x1   :  { %s19_s13 = sshll.u32 %s161_s12, 4  ;;  %s20_s13 = int_to_ptr.vmem [resolvable:$true] %s19_s13 }
   0x2   :  { %s147_s14 = scalar_lea.vmem %s20_s13, 16  ;;  %s151_s15 = scalar_lea.vmem %s20_s13, 32 }
   0x3   :  { %p148_p0 = scmp.ne.s32.totalorder %s20_s13, %s147_s14  ;;  %p152_p1 = scmp.lt.s32.totalorder %s20_s13, %s20_s13 }
   0x4   :  { %p153_p2 = scmp.lt.s32.totalorder %s151_s15, %s147_s14 }
   0x6   :  { %p154_p3 = por %p153_p2, %p152_p1 }
   0x8   :  { %p155_p4 = pnand %p154_p3, %p148_p0 }
   0xa   :  { %158 = shalt.err (!%p155_p4)
}
   0xb   :  { %22 = dma.hbm_to_vmem [thread:$0]  %s204_s2, 16, %s20_s13, [#allocation3]  }
   0xc   :  { %159 = dma.done.wait [#allocation3], 16  }
   0xd   :  { %160 = vsyncadd [#allocation3], 4294967280  ;;  %v162_v0 = vmov 0.0   ;;  %vm163_vm0 = vmmov 0   ;;  %v135_v1 = vld [vmem:[%s203_s1 + $0x8] sm:$0xff]   ;;  %v136_v2 = vld [vmem:[%s203_s1] sm:$0xff]  }
   0xe   :  { %124 = vmatprep.subr.bf16.mxu0 %v162_v0  ;;  %128 = vmatprep.mubr.msk.bf16.mxu0 %vm163_vm0, %v162_v0  ;;  %v27_v3 = vld [vmem:[%s202_s0] sm:$0x3]  ;;  %vm52_vm1 = vcmask 261120   ;;  %vm96_vm2 = vcmask 123904  }
   0xf   :  { %125 = vmatpush3.bf16.msra.mxu0 %v135_v1  ;;  %v28_v4 = vpack.c.bf16 %v27_v3, %v27_v3  ;;  %v117_v5 = vld [vmem:[#allocation2] ss:$0 sm:$0xff] }
  0x10   :  { %126 = vmatprep.subr.bf16.mxu0 %v162_v0 }
  0x13   :  { %127 = vmatpush3.bf16.msra.mxu0 %v136_v2 }
  0x16   :  { %129 = vmatmul.mubr.msk.bf16.vlgmr.msra.gmra.mxu0 %vm52_vm1, %v28_v4 }
  0xd6   :  { %v90_v6 = vpop.f32.mrf.mxu0 }
  0xd7   :  { %v91_v7 = vadd.f32 %v117_v5, %v90_v6 }
  0xd8   :  { %v130_v8 = vpop.f32.mrf.mxu0 }
  0xd9   :  { %v97_v9 = vsel %vm96_vm2, %v91_v7, 0.0 }
  0xda   :  { %98 = vadd.xlane.f32.xlu0 %v97_v9  ;;  %v93_v10 = vpop.f32.mrf.mxu0 }
  0xdc   :  { %v131_v11 = vpop.f32.mrf.mxu0 }
 0x163   :  { %v99_v12 = vpop.xlane.xlu0 %98 }
 0x164   :  { %v101_v13 = vmul.f32 0.0625, %v99_v12 }
 0x166   :  { %v102_v14 = vsub.f32 %v91_v7, %v101_v13 }
 0x168   :  { %v103_v15 = vmul.f32 %v102_v14, %v102_v14 }
 0x16a   :  { %v104_v16 = vsel %vm96_vm2, %v103_v15, 0.0 }
 0x16b   :  { %105 = vadd.xlane.f32.xlu0 %v104_v16 }
 0x1f4   :  { %v106_v17 = vpop.xlane.xlu0 %105 }
 0x1f5   :  { %v107_v18 = vmul.f32 0.0625, %v106_v17 }
 0x1f7   :  { %v108_v19 = vadd.f32 1e-12, %v107_v18 }
 0x1f9   :  { %137 = vrsqrt.f32 %v108_v19 }
 0x206   :  { %v138_v20 = vpop.eup %137 }
 0x207   :  { %v110_v21 = vmul.f32 %v138_v20, %v102_v14 }
 0x209   :  { %111 = vst.msk [vmem:[%s205_s3] sm:$0x3] %vm96_vm2, %v110_v21 }
 0x20a   :  { %116 = vsyncpa [#allocation3], 1 }

// kernel: custom-call
= control target key start
LH: loop header
LB: loop body
LE: loop exit
PB: predicated region body
PF: predicated region fallthrough
CT: control target
= control target key end

     0   :  { %s6_s0 = inlined_call_operand.vmem [shape: f32[2,512], index: 0, kind: output, shape index: {}]  }

// kernel: matching_model_forward.7
= control target key start
LH: loop header
LB: loop body
LE: loop exit
PB: predicated region body
PF: predicated region fallthrough
CT: control target
= control target key end

     0   :  { %v583_v1 = vmov 0   ;;  %vm226_vm0 = vcmask 261120   ;;  %v46_v28 = vlaneseq  ;;  %s784_s1 = inlined_call_operand.vmem [shape: bf16[32,1536], index: 1, kind: input, shape index: {}]   ;;  %s785_s0 = inlined_call_operand.vmem [shape: f32[16,32], index: 0, kind: input, shape index: {}]   ;;  %s786_s2 = inlined_call_operand.vmem [shape: f32[1,1536], index: 2, kind: input, shape index: {}]   ;;  %s787_s3 = inlined_call_operand.vmem [shape: f32[16,1536], index: 3, kind: output, shape index: {}]  }
   0x1   :  { %v547_v0 = vld [vmem:[%s784_s1 + $0x64] ss:$48 sps:$4 sm:$0xff]   ;;  %262 = vmatprep.mubr.bf16.mxu0 %v583_v1  ;;  %305 = vmatprep.mubr.bf16.mxu1 %v583_v1  ;;  %v549_v2 = vld [vmem:[%s784_s1 + $0x6c] ss:$48 sps:$4 sm:$0xff]   ;;  %v551_v3 = vld [vmem:[%s784_s1 + $0x60] ss:$48 sps:$4 sm:$0xff]  }
   0x2   :  { %242 = vmatprep.subr.bf16.mxu0 %v547_v0  ;;  %v552_v4 = vld [vmem:[%s784_s1 + $0x68] ss:$48 sps:$4 sm:$0xff]   ;;  %285 = vmatprep.subr.bf16.mxu1 %v549_v2  ;;  %v553_v5 = vld [vmem:[%s784_s1 + $0x4] ss:$48 sps:$4 sm:$0xff]   ;;  %v555_v6 = vld [vmem:[%s784_s1 + $0xc] ss:$48 sps:$4 sm:$0xff]  }
   0x3   :  { %243 = vmatpush1.bf16.msra.mxu0 %v551_v3  ;;  %286 = vmatpush1.bf16.msra.mxu1 %v552_v4  ;;  %v557_v7 = vld [vmem:[%s784_s1] ss:$48 sps:$4 sm:$0xff]   ;;  %v558_v8 = vld [vmem:[%s784_s1 + $0x8] ss:$48 sps:$4 sm:$0xff]   ;;  %v561_v13 = vld [vmem:[%s784_s1 + $0x74] ss:$48 sps:$4 sm:$0xff]  }
   0x4   :  { %244 = vmatprep.subr.bf16.mxu0 %v553_v5  ;;  %v15_v9 = vld [vmem:[%s785_s0] sm:$0xff]  ;;  %v16_v10 = vld [vmem:[%s785_s0 + $0x8] sm:$0xff]  ;;  %287 = vmatprep.subr.bf16.mxu1 %v555_v6  ;;  %v688_v29 = vshrl.u32 %v46_v28, 7 }
   0x5   :  { %v559_v11 = vld [vmem:[%s784_s1 + $0x70] ss:$48 sps:$4 sm:$0xff]   ;;  %v17_v12 = vpack.c.bf16 %v16_v10, %v15_v9  ;;  %v562_v14 = vld [vmem:[%s784_s1 + $0x78] ss:$48 sps:$4 sm:$0xff]   ;;  %v564_v15 = vld [vmem:[%s784_s1 + $0x7c] ss:$48 sps:$4 sm:$0xff]  }
   0x6   :  { %v567_v16 = vld [vmem:[%s784_s1 + $0x14] ss:$48 sps:$4 sm:$0xff]   ;;  %v570_v17 = vld [vmem:[%s784_s1 + $0x1c] ss:$48 sps:$4 sm:$0xff]   ;;  %v565_v18 = vld [vmem:[%s784_s1 + $0x10] ss:$48 sps:$4 sm:$0xff]  }
   0x7   :  { %245 = vmatpush1.bf16.msra.mxu0 %v557_v7  ;;  %288 = vmatpush1.bf16.msra.mxu1 %v558_v8  ;;  %v568_v19 = vld [vmem:[%s784_s1 + $0x18] ss:$48 sps:$4 sm:$0xff]   ;;  %v573_v20 = vld [vmem:[%s784_s1 + $0x84] ss:$48 sps:$4 sm:$0xff]   ;;  %v576_v21 = vld [vmem:[%s784_s1 + $0x8c] ss:$48 sps:$4 sm:$0xff]  }
   0x8   :  { %328 = vmatprep.subr.bf16.mxu0 %v561_v13  ;;  %371 = vmatprep.subr.bf16.mxu1 %v564_v15  ;;  %v571_v22 = vld [vmem:[%s784_s1 + $0x80] ss:$48 sps:$4 sm:$0xff]   ;;  %v574_v23 = vld [vmem:[%s784_s1 + $0x88] ss:$48 sps:$4 sm:$0xff]   ;;  %v579_v24 = vld [vmem:[%s784_s1 + $0x24] ss:$48 sps:$4 sm:$0xff]  }
   0x9   :  { %v582_v25 = vld [vmem:[%s784_s1 + $0x2c] ss:$48 sps:$4 sm:$0xff]   ;;  %v577_v26 = vld [vmem:[%s784_s1 + $0x20] ss:$48 sps:$4 sm:$0xff]   ;;  %v580_v27 = vld [vmem:[%s784_s1 + $0x28] ss:$48 sps:$4 sm:$0xff]  }
   0xa   :  { %540 = vmatmul.mubr.msk.bf16.vlgmr.msra.gmra.mxu0 %vm226_vm0, %v17_v12  ;;  %541 = vmatmul.mubr.msk.bf16.vlgmr.msra.gmra.mxu1 %vm226_vm0, %v17_v12  ;;  %v48_v30 = vsub.s32 0, %v688_v29  ;;  %v56_v31 = vsub.s32 2, %v688_v29  ;;  %v42_v32 = vld [vmem:[%s786_s2] sm:$0xff]  ;;  %v52_v33 = vsub.s32 1, %v688_v29  ;;  %v60_v34 = vsub.s32 3, %v688_v29 }
   0xb   :  { %329 = vmatpush1.bf16.msra.mxu0 %v559_v11  ;;  %372 = vmatpush1.bf16.msra.mxu1 %v562_v14  ;;  %v64_v43 = vsub.s32 4, %v688_v29  ;;  %v72_v44 = vsub.s32 6, %v688_v29  ;;  %v68_v49 = vsub.s32 5, %v688_v29  ;;  %v76_v50 = vsub.s32 7, %v688_v29  ;;  %v43_v5 = vld [vmem:[%s786_s2 + $0x8] sm:$0xf] }
   0xc   :  { %330 = vmatprep.subr.bf16.mxu0 %v567_v16  ;;  %373 = vmatprep.subr.bf16.mxu1 %v570_v17  ;;  %v49_v35 = vrot.slane %v42_v32, %v48_v30  ;;  %v57_v36 = vrot.slane %v42_v32, %v56_v31  ;;  %v53_v37 = vrot.slane %v42_v32, %v52_v33 }
   0xd   :  { %348 = vmatprep.mubr.bf16.mxu0 %v583_v1  ;;  %391 = vmatprep.mubr.bf16.mxu1 %v583_v1  ;;  %v61_v38 = vrot.slane %v42_v32, %v60_v34  ;;  %v65_v55 = vrot.slane %v42_v32, %v64_v43  ;;  %v73_v56 = vrot.slane %v42_v32, %v72_v44 }
   0xe   :  { %v69_v61 = vrot.slane %v42_v32, %v68_v49  ;;  %v77_v62 = vrot.slane %v42_v32, %v76_v50  ;;  %v89_v13 = vrot.slane %v43_v5, %v56_v31 }
   0xf   :  { %331 = vmatpush1.bf16.msra.mxu0 %v565_v18  ;;  %374 = vmatpush1.bf16.msra.mxu1 %v568_v19  ;;  %v85_v18 = vrot.slane %v43_v5, %v52_v33  ;;  %v93_v19 = vrot.slane %v43_v5, %v60_v34 }
  0x10   :  { %414 = vmatprep.subr.bf16.mxu0 %v573_v20  ;;  %457 = vmatprep.subr.bf16.mxu1 %v576_v21 }
  0x12   :  { %542 = vmatmul.mubr.msk.bf16.vlgmr.msra.gmra.mxu0 %vm226_vm0, %v17_v12  ;;  %543 = vmatmul.mubr.msk.bf16.vlgmr.msra.gmra.mxu1 %vm226_vm0, %v17_v12 }
  0x13   :  { %415 = vmatpush1.bf16.msra.mxu0 %v571_v22  ;;  %458 = vmatpush1.bf16.msra.mxu1 %v574_v23 }
  0x14   :  { %416 = vmatprep.subr.bf16.mxu0 %v579_v24  ;;  %459 = vmatprep.subr.bf16.mxu1 %v582_v25 }
  0x15   :  { %434 = vmatprep.mubr.bf16.mxu0 %v583_v1  ;;  %477 = vmatprep.mubr.bf16.mxu1 %v583_v1 }
  0x17   :  { %417 = vmatpush1.bf16.msra.mxu0 %v577_v26  ;;  %460 = vmatpush1.bf16.msra.mxu1 %v580_v27 }
  0x1a   :  { %544 = vmatmul.mubr.msk.bf16.vlgmr.msra.gmra.mxu0 %vm226_vm0, %v17_v12  ;;  %545 = vmatmul.mubr.msk.bf16.vlgmr.msra.gmra.mxu1 %vm226_vm0, %v17_v12  ;;  %v81_v12 = vrot.slane %v43_v5, %v48_v30 }
  0xca   :  { %v264_v39 = vpop.f32.mrf.mxu0  ;;  %v307_v40 = vpop.f32.mrf.mxu1 }
  0xcb   :  { %v265_v41 = vadd.f32 %v264_v39, %v49_v35  ;;  %v308_v42 = vadd.f32 %v307_v40, %v57_v36 }
  0xcc   :  { %v266_v45 = vpop.f32.mrf.mxu0  ;;  %v309_v46 = vpop.f32.mrf.mxu1 }
  0xcd   :  { %488 = vst [vmem:[%s787_s3] sm:$0xff] %v265_v41  ;;  %490 = vst [vmem:[%s787_s3 + $0x10] sm:$0xff] %v308_v42  ;;  %v267_v47 = vadd.f32 %v266_v45, %v53_v37  ;;  %v310_v48 = vadd.f32 %v309_v46, %v61_v38 }
  0xce   :  { %v268_v51 = vpop.f32.mrf.mxu0  ;;  %v311_v52 = vpop.f32.mrf.mxu1 }
  0xcf   :  { %489 = vst [vmem:[%s787_s3 + $0x8] sm:$0xff] %v267_v47  ;;  %491 = vst [vmem:[%s787_s3 + $0x18] sm:$0xff] %v310_v48  ;;  %v269_v53 = vadd.f32 %v268_v51, %v49_v35  ;;  %v312_v54 = vadd.f32 %v311_v52, %v57_v36 }
  0xd0   :  { %v270_v57 = vpop.f32.mrf.mxu0  ;;  %v313_v58 = vpop.f32.mrf.mxu1 }
  0xd1   :  { %500 = vst [vmem:[%s787_s3 + $0x60] sm:$0xff] %v269_v53  ;;  %502 = vst [vmem:[%s787_s3 + $0x70] sm:$0xff] %v312_v54  ;;  %v271_v59 = vadd.f32 %v270_v57, %v53_v37  ;;  %v314_v60 = vadd.f32 %v313_v58, %v61_v38 }
  0xd2   :  { %v350_v63 = vpop.f32.mrf.mxu0  ;;  %v393_v0 = vpop.f32.mrf.mxu1 }
  0xd3   :  { %501 = vst [vmem:[%s787_s3 + $0x68] sm:$0xff] %v271_v59  ;;  %503 = vst [vmem:[%s787_s3 + $0x78] sm:$0xff] %v314_v60  ;;  %v351_v1 = vadd.f32 %v350_v63, %v65_v55  ;;  %v394_v2 = vadd.f32 %v393_v0, %v73_v56 }
  0xd4   :  { %v352_v3 = vpop.f32.mrf.mxu0  ;;  %v395_v4 = vpop.f32.mrf.mxu1 }
  0xd5   :  { %492 = vst [vmem:[%s787_s3 + $0x20] sm:$0xff] %v351_v1  ;;  %494 = vst [vmem:[%s787_s3 + $0x30] sm:$0xff] %v394_v2  ;;  %v353_v6 = vadd.f32 %v352_v3, %v69_v61  ;;  %v396_v7 = vadd.f32 %v395_v4, %v77_v62 }
  0xd6   :  { %v354_v8 = vpop.f32.mrf.mxu0  ;;  %v397_v9 = vpop.f32.mrf.mxu1 }
  0xd7   :  { %493 = vst [vmem:[%s787_s3 + $0x28] sm:$0xff] %v353_v6  ;;  %495 = vst [vmem:[%s787_s3 + $0x38] sm:$0xff] %v396_v7  ;;  %v355_v10 = vadd.f32 %v354_v8, %v65_v55  ;;  %v398_v11 = vadd.f32 %v397_v9, %v73_v56 }
  0xd8   :  { %v356_v14 = vpop.f32.mrf.mxu0  ;;  %v399_v15 = vpop.f32.mrf.mxu1 }
  0xd9   :  { %504 = vst [vmem:[%s787_s3 + $0x80] sm:$0xff] %v355_v10  ;;  %506 = vst [vmem:[%s787_s3 + $0x90] sm:$0xff] %v398_v11  ;;  %v357_v16 = vadd.f32 %v356_v14, %v69_v61  ;;  %v400_v17 = vadd.f32 %v399_v15, %v77_v62 }
  0xda   :  { %v436_v20 = vpop.f32.mrf.mxu0  ;;  %v479_v21 = vpop.f32.mrf.mxu1 }
  0xdb   :  { %505 = vst [vmem:[%s787_s3 + $0x88] sm:$0xff] %v357_v16  ;;  %507 = vst [vmem:[%s787_s3 + $0x98] sm:$0xff] %v400_v17  ;;  %v437_v22 = vadd.f32 %v436_v20, %v81_v12  ;;  %v480_v23 = vadd.f32 %v479_v21, %v89_v13 }
  0xdc   :  { %v438_v24 = vpop.f32.mrf.mxu0  ;;  %v481_v25 = vpop.f32.mrf.mxu1 }
  0xdd   :  { %496 = vst [vmem:[%s787_s3 + $0x40] sm:$0xff] %v437_v22  ;;  %498 = vst [vmem:[%s787_s3 + $0x50] sm:$0xff] %v480_v23  ;;  %v439_v26 = vadd.f32 %v438_v24, %v85_v18  ;;  %v482_v27 = vadd.f32 %v481_v25, %v93_v19 }
  0xde   :  { %v440_v28 = vpop.f32.mrf.mxu0  ;;  %v483_v29 = vpop.f32.mrf.mxu1 }
  0xdf   :  { %497 = vst [vmem:[%s787_s3 + $0x48] sm:$0xff] %v439_v26  ;;  %499 = vst [vmem:[%s787_s3 + $0x58] sm:$0xff] %v482_v27  ;;  %v441_v30 = vadd.f32 %v440_v28, %v81_v12  ;;  %v484_v31 = vadd.f32 %v483_v29, %v89_v13 }
  0xe0   :  { %v442_v32 = vpop.f32.mrf.mxu0  ;;  %v485_v33 = vpop.f32.mrf.mxu1 }
  0xe1   :  { %508 = vst [vmem:[%s787_s3 + $0xa0] sm:$0xff] %v441_v30  ;;  %510 = vst [vmem:[%s787_s3 + $0xb0] sm:$0xff] %v484_v31  ;;  %v443_v34 = vadd.f32 %v442_v32, %v85_v18  ;;  %v486_v35 = vadd.f32 %v485_v33, %v93_v19 }
  0xe3   :  { %509 = vst [vmem:[%s787_s3 + $0xa8] sm:$0xff] %v443_v34  ;;  %511 = vst [vmem:[%s787_s3 + $0xb8] sm:$0xff] %v486_v35 }

// kernel: matching_model_forward.11
= control target key start
LH: loop header
LB: loop body
LE: loop exit
PB: predicated region body
PF: predicated region fallthrough
CT: control target
= control target key end

     0   :  { %s3316_s0 = inlined_call_operand.vmem [shape: f32[16,32], index: 0, kind: input, shape index: {}]   ;;  %s3317_s1 = inlined_call_operand.vmem [shape: f32[2,8], index: 1, kind: input, shape index: {}]   ;;  %s3318_s2 = inlined_call_operand.hbm [shape: bf16[2,32,96], index: 2, kind: input, shape index: {}]   ;;  %s3319_s3 = inlined_call_operand.hbm [shape: f32[2,1,96], index: 3, kind: input, shape index: {}]   ;;  %s3320_s4 = inlined_call_operand.hbm [shape: bf16[2,32,32], index: 4, kind: input, shape index: {}]   ;;  %s3321_s5 = inlined_call_operand.hbm [shape: f32[2,1,32], index: 5, kind: input, shape index: {}]   ;;  %s3322_s6 = inlined_call_operand.hbm [shape: f32[2,1,32], index: 6, kind: input, shape index: {}]   ;;  %s3323_s7 = inlined_call_operand.hbm [shape: f32[2,1,32], index: 7, kind: input, shape index: {}]   ;;  %s3324_s8 = inlined_call_operand.hbm [shape: bf16[2,32,64], index: 8, kind: input, shape index: {}]   ;;  %s3325_s9 = inlined_call_operand.hbm [shape: f32[2,1,64], index: 9, kind: input, shape index: {}]   ;;  %s3326_s10 = inlined_call_operand.vmem [shape: bf16[2,64,32], index: 10, kind: input, shape index: {}]   ;;  %s3327_s11 = inlined_call_operand.hbm [shape: f32[2,1,32], index: 11, kind: input, shape index: {}]   ;;  %s3328_s12 = inlined_call_operand.hbm [shape: f32[2,1,32], index: 12, kind: input, shape index: {}]   ;;  %s3329_s13 = inlined_call_operand.hbm [shape: f32[2,1,32], index: 13, kind: input, shape index: {}]   ;;  %s3330_s14 = inlined_call_operand.vmem [shape: f32[16,32], index: 14, kind: output, shape index: {}]  }
   0x1   :  { %3342 = sst [smem:[#allocation32_spill]] %s3316_s0 }
   0x2   :  { %3343 = sst [smem:[#allocation33_spill]] %s3317_s1 }
   0x3   :  { %3344 = sst [smem:[#allocation34_spill]] %s3318_s2 }
   0x4   :  { %3345 = sst [smem:[#allocation35_spill]] %s3319_s3 }
   0x5   :  { %3346 = sst [smem:[#allocation36_spill]] %s3320_s4 }
   0x6   :  { %3347 = sst [smem:[#allocation37_spill]] %s3321_s5 }
   0x7   :  { %3348 = sst [smem:[#allocation38_spill]] %s3323_s7 }
   0x8   :  { %3349 = sst [smem:[#allocation39_spill]] %s3325_s9 }
   0x9   :  { %3350 = sst [smem:[#allocation40_spill]] %s3326_s10 }
   0xa   :  { %3351 = sst [smem:[#allocation41_spill]] %s3330_s14 }
   0xb   :  { %19 = vsyncpa [#allocation6], 0 }
   0xc   :  { %21 = vsyncpa [#allocation6 + $0x1], 0 }
   0xd   :  { %22 = vsyncpa [#allocation8], 0 }
   0xe   :  { %24 = vsyncpa [#allocation8 + $0x1], 0 }
   0xf   :  { %25 = vsyncpa [#allocation11], 0 }
  0x10   :  { %27 = vsyncpa [#allocation11 + $0x1], 0 }
  0x11   :  { %28 = vsyncpa [#allocation14], 0 }
  0x12   :  { %30 = vsyncpa [#allocation14 + $0x1], 0 }
  0x13   :  { %31 = vsyncpa [#allocation17], 0 }
  0x14   :  { %33 = vsyncpa [#allocation17 + $0x1], 0 }
  0x15   :  { %34 = vsyncpa [#allocation20], 0 }
  0x16   :  { %36 = vsyncpa [#allocation20 + $0x1], 0  ;;  %s2746_s29 = smov 0   ;;  %s2748_s30 = smov 0  }
  0x17   :  { %s2750_s15 = smov 0   ;;  %s2752_s16 = smov 0  }
  0x18 LB: > { %3352 = sst [smem:[#allocation28_spill]] %s2644_s15  ;;  %s2765_s17 = sadd.s32 4294967295, %s2648_s16   ;;  %s2648_s16 = sphi %s2752_s16, %s3385_s16   ;;  %s2644_s15 = sphi %s2750_s15, %s3387_s15   ;;  %s2640_s30 = sphi %s2748_s30, %s3389_s30   ;;  %s2636_s29 = sphi %s2746_s29, %s3388_s29  }
  0x19   : > { %3353 = sst [smem:[#allocation29_spill]] %s2765_s17  ;;  %s2768_s18 = sadd.s32 1, %s2648_s16  }
  0x1a   : > { %3354 = sst [smem:[#allocation30_spill]] %s2768_s18  ;;  %s88_s19 = ssub.s32 %s2648_s16, %s2768_s18 }
  0x1b   : > { %s91_s20 = sadd.s32 1, %s2644_s15  ;;  %p89_p0 = scmp.eq.s32.totalorder %s88_s19, 0 }
  0x1c   : > { %p98_p1 = scmp.ne.s32.totalorder %s2644_s15, %s2640_s30  ;;  %p99_p2 = scmp.eq.s32.totalorder %s2648_s16, 0 }
  0x1d   : > { %p104_p3 = scmp.ne.s32.totalorder %s2640_s30, %s2636_s29  ;;  %p105_p5 = scmp.eq.s32.totalorder %s2765_s17, 0 }
  0x1e   : > { %s2778_s21 = scalar_select %p89_p0, %s2644_s15, %s91_s20  }
  0x1f   : > { %p100_p4 = por %p99_p2, %p98_p1  ;;  %p2205_p6 = scmp.lt.s32.totalorder %s2648_s16, 2 }
  0x20   : > { %3355 = sst [smem:[#allocation31_spill]] %s2778_s21  ;;  %p2782_p7 = por %p105_p5, %p104_p3 }
  0x21   : > { %s2787_s23 = sand.u32 1, %s2644_s15   ;;  %p2789_p8 = pnand %p2205_p6, %p100_p4 }
  0x22   : > { %s3356_s22 = scalar_select %p2782_p7, 1, 0 }
  0x23   : > { %s2794_s25 = sand.u32 1, %s2648_s16   ;;  %s2797_s26 = sshll.u32 %s2648_s16, 4 }
  0x24   : > { %s3358_s3 = sld [smem:[#allocation35_spill]]  ;;  %s465_s19 = scalar_lea.vmem [#allocation7], %s2787_s23 }
  0x25   : > { %s472_s20 = sshll.u32 %s465_s19, 4  ;;  %p2812_p11 = pneg %p2789_p8  ;;  %s473_s20 = int_to_ptr.vmem [resolvable:$true] %s472_s20 }
  0x2a   : > { %s2803_s29 = scalar_lea.hbm %s3358_s3, %s2797_s26  ;;  %s2291_s14 = scalar_lea.hbm %s3358_s3, 32 }
  0x2b   : > { %s2286_s15 = scalar_lea.hbm %s2803_s29, 16  ;;  %p2292_p0 = scmp.lt.s32.totalorder %s2803_s29, %s3358_s3 }
  0x2c   : > { %p2287_p10 = scmp.ne.s32.totalorder %s2803_s29, %s2286_s15  ;;  %p2293_p1 = scmp.lt.s32.totalorder %s2291_s14, %s2286_s15 }
  0x2e   : > { %p2289_p12 = pnand %p2812_p11, %p2287_p10  ;;  %p2294_p2 = por %p2293_p1, %p2292_p0 }
  0x30   : > { %p2290_p13 = pneg %p2289_p12 }
  0x32   : > { %p2295_p3 = pnand %p2294_p2, %p2290_p13 }
  0x34   : > { %2298 = shalt.err (!%p2295_p3)
}
  0x35   : > { %s2299_s21 = scalar_lea.vmem %s473_s20, 16  ;;  %s2650_s0 = smov [#allocation7]  }
  0x36   : > { %p2300_p4 = scmp.ne.s32.totalorder %s473_s20, %s2299_s21  ;;  %s2304_s10 = sshll.u32 %s2650_s0, 4  ;;  %s2305_s10 = int_to_ptr.vmem [resolvable:$false] %s2304_s10 }
  0x37   : > { %s2306_s17 = scalar_lea.vmem %s2305_s10, 32  ;;  %p2307_p10 = scmp.lt.s32.totalorder %s473_s20, %s2305_s10 }
  0x38   : > { %p2302_p5 = pnand %p2300_p4, %p2812_p11  ;;  %p2308_p12 = scmp.lt.s32.totalorder %s2306_s17, %s2299_s21 }
  0x3a   : > { %p2303_p6 = pneg %p2302_p5  ;;  %p2309_p9 = por %p2308_p12, %p2307_p10 }
  0x3c   : > { %p2310_p7 = pnand %p2309_p9, %p2303_p6 }
  0x3e   : > { %2313 = shalt.err (!%p2310_p7)
}
  0x3f   : > { %s3360_s1 = scalar_lea.sflag [#allocation8], %s2794_s25  ;;  %p646_p13 = scmp.lt.s32.totalorder %s2648_s16, 3 }
  0x40   : > { %2177 = dma.hbm_to_vmem [thread:$0]  (!%p2789_p8), %s2803_s29, 16, %s473_s20, %s3360_s1  }
  0x41   : > { %s3361_s5 = sld [smem:[#allocation37_spill]]  ;;  %p3362_p9 = scmp.ge.s32.totalorder %s2648_s16, 1 }
  0x42   : > { %s503_s17 = scalar_lea.vmem [#allocation10], %s2787_s23 }
  0x43   : > { %p2841_p7 = pnand %p3362_p9, %p646_p13  ;;  %s510_s21 = sshll.u32 %s503_s17, 4  ;;  %s511_s21 = int_to_ptr.vmem [resolvable:$true] %s510_s21 }
  0x45   : > { %s3363_s15 = scalar_select %p2841_p7, 1, 0 }
  0x47   : > { %s2837_s10 = scalar_lea.hbm %s3361_s5, %s2797_s26  ;;  %s2319_s19 = scalar_lea.hbm %s3361_s5, 32 }
  0x48   : > { %s2314_s28 = scalar_lea.hbm %s2837_s10, 16  ;;  %p2320_p3 = scmp.lt.s32.totalorder %s2837_s10, %s3361_s5 }
  0x49   : > { %p2315_p0 = scmp.ne.s32.totalorder %s2837_s10, %s2314_s28  ;;  %p2321_p4 = scmp.lt.s32.totalorder %s2319_s19, %s2314_s28 }
  0x4b   : > { %p2317_p1 = pnand %p2315_p0, %p2812_p11  ;;  %p2322_p5 = por %p2321_p4, %p2320_p3 }
  0x4d   : > { %p2318_p2 = pneg %p2317_p1 }
  0x4f   : > { %p2323_p6 = pnand %p2322_p5, %p2318_p2 }
  0x51   : > { %2326 = shalt.err (!%p2323_p6)
}
  0x52   : > { %s2327_s14 = scalar_lea.vmem %s511_s21, 16  ;;  %s2651_s17 = smov [#allocation10]  }
  0x53   : > { %p2328_p10 = scmp.ne.s32.totalorder %s511_s21, %s2327_s14  ;;  %s2332_s27 = sshll.u32 %s2651_s17, 4  ;;  %s2333_s27 = int_to_ptr.vmem [resolvable:$false] %s2332_s27 }
  0x54   : > { %s2334_s3 = scalar_lea.vmem %s2333_s27, 32  ;;  %p2335_p9 = scmp.lt.s32.totalorder %s511_s21, %s2333_s27 }
  0x55   : > { %p2330_p12 = pnand %p2328_p10, %p2812_p11  ;;  %p2336_p0 = scmp.lt.s32.totalorder %s2334_s3, %s2327_s14 }
  0x57   : > { %p2331_p13 = pneg %p2330_p12  ;;  %p2337_p1 = por %p2336_p0, %p2335_p9 }
  0x59   : > { %p2338_p7 = pnand %p2337_p1, %p2331_p13 }
  0x5b   : > { %2341 = shalt.err (!%p2338_p7)
}
  0x5c   : > { %s3364_s28 = scalar_lea.sflag [#allocation11], %s2794_s25  ;;  %s3365_s7 = sld [smem:[#allocation38_spill]] }
  0x5d   : > { %2183 = dma.hbm_to_vmem [thread:$0]  (!%p2789_p8), %s2837_s10, 16, %s511_s21, %s3364_s28  }
  0x5e   : > { %s537_s3 = scalar_lea.vmem [#allocation13], %s2787_s23 }
  0x5f   : > { %s544_s27 = sshll.u32 %s537_s3, 4  ;;  %s545_s27 = int_to_ptr.vmem [resolvable:$true] %s544_s27 }
  0x62   : > { %s2869_s19 = scalar_lea.hbm %s3365_s7, %s2797_s26  ;;  %s2347_s10 = scalar_lea.hbm %s3365_s7, 32 }
  0x63   : > { %s2342_s0 = scalar_lea.hbm %s2869_s19, 16  ;;  %p2348_p4 = scmp.lt.s32.totalorder %s2869_s19, %s3365_s7 }
  0x64   : > { %p2343_p7 = scmp.ne.s32.totalorder %s2869_s19, %s2342_s0  ;;  %p2349_p5 = scmp.lt.s32.totalorder %s2347_s10, %s2342_s0 }
  0x66   : > { %p2345_p2 = pnand %p2343_p7, %p2812_p11  ;;  %p2350_p6 = por %p2349_p5, %p2348_p4 }
  0x68   : > { %p2346_p3 = pneg %p2345_p2 }
  0x6a   : > { %p2351_p10 = pnand %p2350_p6, %p2346_p3 }
  0x6c   : > { %2354 = shalt.err (!%p2351_p10)
}
  0x6d   : > { %s2355_s29 = scalar_lea.vmem %s545_s27, 16  ;;  %s2652_s20 = smov [#allocation13]  }
  0x6e   : > { %p2356_p12 = scmp.ne.s32.totalorder %s545_s27, %s2355_s29  ;;  %s2360_s3 = sshll.u32 %s2652_s20, 4  ;;  %s2361_s3 = int_to_ptr.vmem [resolvable:$false] %s2360_s3 }
  0x6f   : > { %s2362_s1 = scalar_lea.vmem %s2361_s3, 32  ;;  %p2363_p0 = scmp.lt.s32.totalorder %s545_s27, %s2361_s3 }
  0x70   : > { %p2358_p13 = pnand %p2356_p12, %p2812_p11  ;;  %p2364_p1 = scmp.lt.s32.totalorder %s2362_s1, %s2355_s29 }
  0x72   : > { %p2359_p9 = pneg %p2358_p13  ;;  %p2365_p7 = por %p2364_p1, %p2363_p0 }
  0x74   : > { %p2366_p2 = pnand %p2365_p7, %p2359_p9 }
  0x76   : > { %2369 = shalt.err (!%p2366_p2)
}
  0x77   : > { %s3366_s0 = scalar_lea.sflag [#allocation14], %s2794_s25  ;;  %s3367_s9 = sld [smem:[#allocation39_spill]] }
  0x78   : > { %2189 = dma.hbm_to_vmem [thread:$0]  (!%p2789_p8), %s2869_s19, 16, %s545_s27, %s3366_s0  }
  0x79   : > { %s575_s1 = scalar_lea.vmem [#allocation16], %s2787_s23 }
  0x7a   : > { %s582_s21 = sshll.u32 %s575_s1, 4  ;;  %s583_s21 = int_to_ptr.vmem [resolvable:$true] %s582_s21 }
  0x7d   : > { %s2895_s10 = scalar_lea.hbm %s3367_s9, %s2797_s26  ;;  %s2375_s19 = scalar_lea.hbm %s3367_s9, 32 }
  0x7e   : > { %s2370_s29 = scalar_lea.hbm %s2895_s10, 16  ;;  %p2376_p6 = scmp.lt.s32.totalorder %s2895_s10, %s3367_s9 }
  0x7f   : > { %p2371_p3 = scmp.ne.s32.totalorder %s2895_s10, %s2370_s29  ;;  %p2377_p10 = scmp.lt.s32.totalorder %s2375_s19, %s2370_s29 }
  0x81   : > { %p2373_p4 = pnand %p2371_p3, %p2812_p11  ;;  %p2378_p12 = por %p2377_p10, %p2376_p6 }
  0x83   : > { %p2374_p5 = pneg %p2373_p4 }
  0x85   : > { %p2379_p13 = pnand %p2378_p12, %p2374_p5 }
  0x87   : > { %2382 = shalt.err (!%p2379_p13)
}
  0x88   : > { %s2383_s14 = scalar_lea.vmem %s583_s21, 16  ;;  %s2653_s17 = smov [#allocation16]  }
  0x89   : > { %p2384_p9 = scmp.ne.s32.totalorder %s583_s21, %s2383_s14  ;;  %s2388_s1 = sshll.u32 %s2653_s17, 4  ;;  %s2389_s1 = int_to_ptr.vmem [resolvable:$false] %s2388_s1 }
  0x8a   : > { %s2390_s28 = scalar_lea.vmem %s2389_s1, 32  ;;  %p2391_p7 = scmp.lt.s32.totalorder %s583_s21, %s2389_s1 }
  0x8b   : > { %p2386_p0 = pnand %p2384_p9, %p2812_p11  ;;  %p2392_p2 = scmp.lt.s32.totalorder %s2390_s28, %s2383_s14 }
  0x8d   : > { %p2387_p1 = pneg %p2386_p0  ;;  %p2393_p3 = por %p2392_p2, %p2391_p7 }
  0x8f   : > { %p2394_p4 = pnand %p2393_p3, %p2387_p1 }
  0x91   : > { %2397 = shalt.err (!%p2394_p4)
}
  0x92   : > { %s3368_s29 = scalar_lea.sflag [#allocation17], %s2794_s25  ;;  %s2921_s19 = scalar_lea.hbm %s3328_s12, %s2797_s26 }
  0x93   : > { %2195 = dma.hbm_to_vmem [thread:$0]  (!%p2789_p8), %s2895_s10, 16, %s583_s21, %s3368_s29  }
  0x94   : > { %s617_s28 = scalar_lea.vmem [#allocation19], %s2787_s23  ;;  %s2925_s0 = sshll.u32 %s2787_s23, 4 }
  0x95   : > { %s624_s27 = sshll.u32 %s617_s28, 4  ;;  %s2398_s17 = scalar_lea.hbm %s2921_s19, 16  ;;  %s625_s27 = int_to_ptr.vmem [resolvable:$true] %s624_s27 }
  0x96   : > { %p2399_p5 = scmp.ne.s32.totalorder %s2921_s19, %s2398_s17  ;;  %s2403_s1 = scalar_lea.hbm %s3328_s12, 32 }
  0x97   : > { %p2404_p12 = scmp.lt.s32.totalorder %s2921_s19, %s3328_s12  ;;  %p2405_p13 = scmp.lt.s32.totalorder %s2403_s1, %s2398_s17 }
  0x98   : > { %p2401_p6 = pnand %p2399_p5, %p2812_p11 }
  0x99   : > { %p2406_p9 = por %p2405_p13, %p2404_p12 }
  0x9a   : > { %p2402_p10 = pneg %p2401_p6 }
  0x9c   : > { %p2407_p0 = pnand %p2406_p9, %p2402_p10 }
  0x9e   : > { %2410 = shalt.err (!%p2407_p0)
}
  0x9f   : > { %s2411_s3 = scalar_lea.vmem %s625_s27, 16  ;;  %s2654_s28 = smov [#allocation19]  }
  0xa0   : > { %p2412_p1 = scmp.ne.s32.totalorder %s625_s27, %s2411_s3  ;;  %s2416_s14 = sshll.u32 %s2654_s28, 4  ;;  %s2417_s14 = int_to_ptr.vmem [resolvable:$false] %s2416_s14 }
  0xa1   : > { %s2418_s5 = scalar_lea.vmem %s2417_s14, 32  ;;  %p2419_p3 = scmp.lt.s32.totalorder %s625_s27, %s2417_s14 }
  0xa2   : > { %p2414_p7 = pnand %p2412_p1, %p2812_p11  ;;  %p2420_p4 = scmp.lt.s32.totalorder %s2418_s5, %s2411_s3 }
  0xa4   : > { %p2415_p2 = pneg %p2414_p7  ;;  %p2421_p5 = por %p2420_p4, %p2419_p3 }
  0xa6   : > { %p2422_p6 = pnand %p2421_p5, %p2415_p2 }
  0xa8   : > { %2425 = shalt.err (!%p2422_p6)
}
  0xa9   : > { %s3369_s17 = scalar_lea.sflag [#allocation20], %s2794_s25  ;;  %s2947_s10 = sshll.u32 %s2648_s16, 8 }
  0xaa   : > { %2201 = dma.hbm_to_vmem [thread:$0]  (!%p2789_p8), %s2921_s19, 16, %s625_s27, %s3369_s17  }
  0xab   : > { %s3370_s2 = sld [smem:[#allocation34_spill]]  ;;  %s445_s14 = scalar_lea.vmem [#allocation5], %s2925_s0 }
  0xac   : > { %s452_s29 = sshll.u32 %s445_s14, 4  ;;  %s442_s20 = scalar_lea.sflag [#allocation6], %s2787_s23  ;;  %s2956_s29 = int_to_ptr.vmem [resolvable:$true] %s452_s29 }
  0xb1   : > { %s2953_s5 = scalar_lea.hbm %s3370_s2, %s2947_s10  ;;  %s2431_s27 = scalar_lea.hbm %s3370_s2, 512 }
  0xb2   : > { %s2426_s3 = scalar_lea.hbm %s2953_s5, 256  ;;  %p2432_p9 = scmp.lt.s32.totalorder %s2953_s5, %s3370_s2 }
  0xb3   : > { %p2427_p10 = scmp.ne.s32.totalorder %s2953_s5, %s2426_s3  ;;  %p2433_p0 = scmp.lt.s32.totalorder %s2431_s27, %s2426_s3 }
  0xb5   : > { %p2429_p12 = pnand %p2427_p10, %p2812_p11  ;;  %p2434_p1 = por %p2433_p0, %p2432_p9 }
  0xb7   : > { %p2430_p13 = pneg %p2429_p12 }
  0xb9   : > { %p2435_p7 = pnand %p2434_p1, %p2430_p13 }
  0xbb   : > { %2438 = shalt.err (!%p2435_p7)
}
  0xbc   : > { %s2439_s21 = scalar_lea.vmem %s2956_s29, 256  ;;  %s2655_s1 = smov [#allocation5]  }
  0xbd   : > { %p2440_p2 = scmp.ne.s32.totalorder %s2956_s29, %s2439_s21  ;;  %s2444_s14 = sshll.u32 %s2655_s1, 4  ;;  %s2445_s14 = int_to_ptr.vmem [resolvable:$false] %s2444_s14 }
  0xbe   : > { %s2446_s16 = scalar_lea.vmem %s2445_s14, 512  ;;  %p2447_p5 = scmp.lt.s32.totalorder %s2956_s29, %s2445_s14 }
  0xbf   : > { %p2442_p3 = pnand %p2440_p2, %p2812_p11  ;;  %p2448_p6 = scmp.lt.s32.totalorder %s2446_s16, %s2439_s21 }
  0xc1   : > { %p2443_p4 = pneg %p2442_p3  ;;  %p2449_p10 = por %p2448_p6, %p2447_p5 }
  0xc3   : > { %p2450_p12 = pnand %p2449_p10, %p2443_p4 }
  0xc5   : > { %2453 = shalt.err (!%p2450_p12)
}
  0xc6   : > { %s3340_s3 = smov 64   ;;  %s2657_s19 = smov 4  }
  0xc7   : > { %2174 = dma.hbm_to_vmem [thread:$0]  (!%p2789_p8), %s2953_s5, 256, %s2956_s29, %s442_s20, %s3340_s3, %s3340_s3, %s2657_s19  }
  0xc8   : > { %s3371_s4 = sld [smem:[#allocation36_spill]]  ;;  %s483_s21 = scalar_lea.vmem [#allocation9], %s2925_s0 }
  0xc9   : > { %s490_s1 = sshll.u32 %s483_s21, 4  ;;  %s491_s1 = int_to_ptr.vmem [resolvable:$true] %s490_s1 }
  0xce   : > { %s2988_s17 = scalar_lea.hbm %s3371_s4, %s2947_s10  ;;  %s2459_s5 = scalar_lea.hbm %s3371_s4, 512 }
  0xcf   : > { %s2454_s14 = scalar_lea.hbm %s2988_s17, 256  ;;  %p2460_p1 = scmp.lt.s32.totalorder %s2988_s17, %s3371_s4 }
  0xd0   : > { %p2455_p13 = scmp.ne.s32.totalorder %s2988_s17, %s2454_s14  ;;  %p2461_p7 = scmp.lt.s32.totalorder %s2459_s5, %s2454_s14 }
  0xd2   : > { %p2457_p9 = pnand %p2455_p13, %p2812_p11  ;;  %p2462_p2 = por %p2461_p7, %p2460_p1 }
  0xd4   : > { %p2458_p0 = pneg %p2457_p9 }
  0xd6   : > { %p2463_p3 = pnand %p2462_p2, %p2458_p0 }
  0xd8   : > { %2466 = shalt.err (!%p2463_p3)
}
  0xd9   : > { %s2467_s27 = scalar_lea.vmem %s491_s1, 256  ;;  %s2658_s28 = smov [#allocation9]  }
  0xda   : > { %p2468_p4 = scmp.ne.s32.totalorder %s491_s1, %s2467_s27  ;;  %s2472_s21 = sshll.u32 %s2658_s28, 4  ;;  %s2473_s21 = int_to_ptr.vmem [resolvable:$false] %s2472_s21 }
  0xdb   : > { %s2474_s3 = scalar_lea.vmem %s2473_s21, 512  ;;  %p2475_p10 = scmp.lt.s32.totalorder %s491_s1, %s2473_s21 }
  0xdc   : > { %p2470_p5 = pnand %p2468_p4, %p2812_p11  ;;  %p2476_p12 = scmp.lt.s32.totalorder %s2474_s3, %s2467_s27 }
  0xde   : > { %p2471_p6 = pneg %p2470_p5  ;;  %p2477_p13 = por %p2476_p12, %p2475_p10 }
  0xe0   : > { %p2478_p9 = pnand %p2477_p13, %p2471_p6 }
  0xe2   : > { %2481 = shalt.err (!%p2478_p9)
}
  0xe3   : > { %s3372_s2 = smov 64   ;;  %s3373_s14 = scalar_lea.sflag [#allocation8], %s2794_s25 }
  0xe4   : > { %2180 = dma.hbm_to_vmem [thread:$0]  (!%p2789_p8), %s2988_s17, 256, %s491_s1, %s3373_s14, %s3372_s2, %s3372_s2, %s2657_s19  }
  0xe5   : > { %s525_s29 = scalar_lea.hbm %s3322_s6, %s2797_s26  ;;  %s520_s3 = scalar_lea.vmem [#allocation12], %s2787_s23 }
  0xe6   : > { %s527_s20 = sshll.u32 %s520_s3, 4  ;;  %s2482_s27 = scalar_lea.hbm %s525_s29, 16  ;;  %s528_s20 = int_to_ptr.vmem [resolvable:$true] %s527_s20 }
  0xe7   : > { %p2483_p0 = scmp.ne.s32.totalorder %s525_s29, %s2482_s27  ;;  %s2487_s4 = scalar_lea.hbm %s3322_s6, 32 }
  0xe8   : > { %p2488_p2 = scmp.lt.s32.totalorder %s525_s29, %s3322_s6  ;;  %p2489_p3 = scmp.lt.s32.totalorder %s2487_s4, %s2482_s27 }
  0xe9   : > { %p2485_p1 = pnand %p2483_p0, %p2812_p11 }
  0xea   : > { %p2490_p4 = por %p2489_p3, %p2488_p2 }
  0xeb   : > { %p2486_p7 = pneg %p2485_p1 }
  0xed   : > { %p2491_p5 = pnand %p2490_p4, %p2486_p7 }
  0xef   : > { %2494 = shalt.err (!%p2491_p5)
}
  0xf0   : > { %s2495_s17 = scalar_lea.vmem %s528_s20, 16  ;;  %s2659_s1 = smov [#allocation12]  }
  0xf1   : > { %p2496_p6 = scmp.ne.s32.totalorder %s528_s20, %s2495_s17  ;;  %s2500_s14 = sshll.u32 %s2659_s1, 4  ;;  %s2501_s14 = int_to_ptr.vmem [resolvable:$false] %s2500_s14 }
  0xf2   : > { %s2502_s16 = scalar_lea.vmem %s2501_s14, 32  ;;  %p2503_p13 = scmp.lt.s32.totalorder %s528_s20, %s2501_s14 }
  0xf3   : > { %p2498_p10 = pnand %p2496_p6, %p2812_p11  ;;  %p2504_p9 = scmp.lt.s32.totalorder %s2502_s16, %s2495_s17 }
  0xf5   : > { %p2499_p12 = pneg %p2498_p10  ;;  %p2505_p0 = por %p2504_p9, %p2503_p13 }
  0xf7   : > { %p2506_p1 = pnand %p2505_p0, %p2499_p12 }
  0xf9   : > { %2509 = shalt.err (!%p2506_p1)
}
  0xfa   : > { %s3374_s4 = scalar_lea.sflag [#allocation11], %s2794_s25  ;;  %s3035_s5 = scalar_lea.hbm %s3324_s8, %s2947_s10 }
  0xfb   : > { %2186 = dma.hbm_to_vmem [thread:$0]  (!%p2789_p8), %s525_s29, 16, %s528_s20, %s3374_s4  }
  0xfc   : > { %s555_s3 = scalar_lea.vmem [#allocation15], %s2925_s0  ;;  %s2510_s28 = scalar_lea.hbm %s3035_s5, 256 }
  0xfd   : > { %s562_s27 = sshll.u32 %s555_s3, 4  ;;  %p2511_p7 = scmp.ne.s32.totalorder %s3035_s5, %s2510_s28  ;;  %s563_s27 = int_to_ptr.vmem [resolvable:$true] %s562_s27 }
  0xfe   : > { %s2515_s29 = scalar_lea.hbm %s3324_s8, 512  ;;  %p2516_p4 = scmp.lt.s32.totalorder %s3035_s5, %s3324_s8 }
  0xff   : > { %p2513_p2 = pnand %p2511_p7, %p2812_p11  ;;  %p2517_p5 = scmp.lt.s32.totalorder %s2515_s29, %s2510_s28 }
 0x101   : > { %p2514_p3 = pneg %p2513_p2  ;;  %p2518_p6 = por %p2517_p5, %p2516_p4 }
 0x103   : > { %p2519_p10 = pnand %p2518_p6, %p2514_p3 }
 0x105   : > { %2522 = shalt.err (!%p2519_p10)
}
 0x106   : > { %s2523_s0 = scalar_lea.vmem %s563_s27, 256  ;;  %s2660_s10 = smov [#allocation15]  }
 0x107   : > { %p2524_p12 = scmp.ne.s32.totalorder %s563_s27, %s2523_s0  ;;  %s2528_s14 = sshll.u32 %s2660_s10, 4  ;;  %s2529_s14 = int_to_ptr.vmem [resolvable:$false] %s2528_s14 }
 0x108   : > { %s2530_s16 = scalar_lea.vmem %s2529_s14, 512  ;;  %p2531_p0 = scmp.lt.s32.totalorder %s563_s27, %s2529_s14 }
 0x109   : > { %p2526_p13 = pnand %p2524_p12, %p2812_p11  ;;  %p2532_p1 = scmp.lt.s32.totalorder %s2530_s16, %s2523_s0 }
 0x10b   : > { %p2527_p9 = pneg %p2526_p13  ;;  %p2533_p7 = por %p2532_p1, %p2531_p0 }
 0x10d   : > { %p2534_p2 = pnand %p2533_p7, %p2527_p9 }
 0x10f   : > { %2537 = shalt.err (!%p2534_p2)
}
 0x110   : > { %s3375_s4 = scalar_lea.sflag [#allocation14], %s2794_s25  ;;  %s605_s3 = scalar_lea.hbm %s3327_s11, %s2797_s26 }
 0x111   : > { %2192 = dma.hbm_to_vmem [thread:$0]  (!%p2789_p8), %s3035_s5, 256, %s563_s27, %s3375_s4, %s3372_s2, %s3372_s2, %s2657_s19  }
 0x112   : > { %s600_s28 = scalar_lea.vmem [#allocation18], %s2787_s23  ;;  %s2538_s17 = scalar_lea.hbm %s605_s3, 16 }
 0x113   : > { %s607_s21 = sshll.u32 %s600_s28, 4  ;;  %p2539_p3 = scmp.ne.s32.totalorder %s605_s3, %s2538_s17  ;;  %s608_s21 = int_to_ptr.vmem [resolvable:$true] %s607_s21 }
 0x114   : > { %s2543_s1 = scalar_lea.hbm %s3327_s11, 32  ;;  %p2544_p6 = scmp.lt.s32.totalorder %s605_s3, %s3327_s11 }
 0x115   : > { %p2541_p4 = pnand %p2539_p3, %p2812_p11  ;;  %p2545_p10 = scmp.lt.s32.totalorder %s2543_s1, %s2538_s17 }
 0x117   : > { %p2542_p5 = pneg %p2541_p4  ;;  %p2546_p12 = por %p2545_p10, %p2544_p6 }
 0x119   : > { %p2547_p13 = pnand %p2546_p12, %p2542_p5 }
 0x11b   : > { %2550 = shalt.err (!%p2547_p13)
}
 0x11c   : > { %s2551_s19 = scalar_lea.vmem %s608_s21, 16  ;;  %s2661_s2 = smov [#allocation18]  }
 0x11d   : > { %p2552_p9 = scmp.ne.s32.totalorder %s608_s21, %s2551_s19  ;;  %s2556_s5 = sshll.u32 %s2661_s2, 4  ;;  %s2557_s5 = int_to_ptr.vmem [resolvable:$false] %s2556_s5 }
 0x11e   : > { %s2558_s27 = scalar_lea.vmem %s2557_s5, 32  ;;  %p2559_p7 = scmp.lt.s32.totalorder %s608_s21, %s2557_s5 }
 0x11f   : > { %p2554_p0 = pnand %p2552_p9, %p2812_p11  ;;  %p2560_p2 = scmp.lt.s32.totalorder %s2558_s27, %s2551_s19 }
 0x121   : > { %p2555_p1 = pneg %p2554_p0  ;;  %p2561_p3 = por %p2560_p2, %p2559_p7 }
 0x123   : > { %p2562_p4 = pnand %p2561_p3, %p2555_p1 }
 0x125   : > { %2565 = shalt.err (!%p2562_p4)
}
 0x126   : > { %s3376_s14 = scalar_lea.sflag [#allocation17], %s2794_s25  ;;  %s639_s7 = scalar_lea.hbm %s3329_s13, %s2797_s26 }
 0x127   : > { %2198 = dma.hbm_to_vmem [thread:$0]  (!%p2789_p8), %s605_s3, 16, %s608_s21, %s3376_s14  }
 0x128   : > { %s634_s9 = scalar_lea.vmem [#allocation21], %s2787_s23  ;;  %s2566_s17 = scalar_lea.hbm %s639_s7, 16 }
 0x129   : > { %s641_s28 = sshll.u32 %s634_s9, 4  ;;  %p2567_p5 = scmp.ne.s32.totalorder %s639_s7, %s2566_s17  ;;  %s642_s28 = int_to_ptr.vmem [resolvable:$true] %s641_s28 }
 0x12a   : > { %s2571_s1 = scalar_lea.hbm %s3329_s13, 32  ;;  %p2572_p12 = scmp.lt.s32.totalorder %s639_s7, %s3329_s13 }
 0x12b   : > { %p2569_p6 = pnand %p2567_p5, %p2812_p11  ;;  %p2573_p13 = scmp.lt.s32.totalorder %s2571_s1, %s2566_s17 }
 0x12d   : > { %p2570_p10 = pneg %p2569_p6  ;;  %p2574_p9 = por %p2573_p13, %p2572_p12 }
 0x12f   : > { %p2575_p0 = pnand %p2574_p9, %p2570_p10 }
 0x131   : > { %2578 = shalt.err (!%p2575_p0)
}
 0x132   : > { %s2579_s23 = scalar_lea.vmem %s642_s28, 16  ;;  %s2662_s26 = smov [#allocation21]  }
 0x133   : > { %p2580_p1 = scmp.ne.s32.totalorder %s642_s28, %s2579_s23  ;;  %s2584_s3 = sshll.u32 %s2662_s26, 4  ;;  %s2585_s3 = int_to_ptr.vmem [resolvable:$false] %s2584_s3 }
 0x134   : > { %s2586_s21 = scalar_lea.vmem %s2585_s3, 32  ;;  %p2587_p3 = scmp.lt.s32.totalorder %s642_s28, %s2585_s3 }
 0x135   : > { %p2582_p7 = pnand %p2580_p1, %p2812_p11  ;;  %p2588_p4 = scmp.lt.s32.totalorder %s2586_s21, %s2579_s23 }
 0x137   : > { %p2583_p2 = pneg %p2582_p7  ;;  %p2589_p5 = por %p2588_p4, %p2587_p3 }
 0x139   : > { %p2590_p6 = pnand %p2589_p5, %p2583_p2 }
 0x13b   : > { %2593 = shalt.err (!%p2590_p6)
}
 0x13c   : > { %s3377_s19 = scalar_lea.sflag [#allocation20], %s2794_s25  ;;  %p3378_p10 = scmp.ne.s32.totalorder %s3363_s15, 0 }
 0x13d   : > { %2204 = dma.hbm_to_vmem [thread:$0]  (!%p2789_p8), %s639_s7, 16, %s642_s28, %s3377_s19  }
 0x13e   : > { %650 = sbr.rel (%p3378_p10) target bundleno = 2823 (0xb07), region = 76  ;;  %s3100_s18 = sand.u32 (!%p3378_p10), 1, %s2640_s30  }
 0x13f   : > { %s3103_s2 = sshll.u32 (!%p3378_p10), %s3100_s18, 4  ;;  %s653_s5 = scalar_lea.sflag (!%p3378_p10), [#allocation6], %s3100_s18 }
 0x140   : > { %s656_s27 = scalar_lea.vmem (!%p3378_p10), [#allocation5], %s3103_s2  ;;  %p3379_p11 = scmp.ne.s32.totalorder (!%p3378_p10), %s3356_s22, 0 }
 0x143   : > { %2611 = dma.done.wait (%p3379_p11), %s653_s5, 256  }
 0x144   : > { %2613 = vsyncadd (%p3379_p11), %s653_s5, 4294967040  ;;  %s3380_s24 = sld [smem:[#allocation29_spill]]  ;;  %s664_s14 = scalar_lea.vmem [#allocation7], %s3100_s18 }
 0x14a   : > { %s661_s25 = sand.u32 1, %s3380_s24  }
 0x14b   : > { %s662_s15 = scalar_lea.sflag [#allocation8], %s661_s25 }
 0x14c   : > { %2615 = dma.done.wait (%p3379_p11), %s662_s15, 272  }
 0x14d   : > { %2617 = vsyncadd (%p3379_p11), %s662_s15, 4294967024  ;;  %s673_s16 = scalar_lea.vmem [#allocation9], %s3103_s2  ;;  %s679_s4 = scalar_lea.sflag [#allocation11], %s661_s25 }
 0x14e   : > { %s681_s7 = scalar_lea.vmem [#allocation10], %s3100_s18 }
 0x14f   : > { %2619 = dma.done.wait (%p3379_p11), %s679_s4, 32  }
 0x150   : > { %2621 = vsyncadd (%p3379_p11), %s679_s4, 4294967264  ;;  %s689_s9 = scalar_lea.vmem [#allocation12], %s3100_s18  ;;  %s695_s28 = scalar_lea.sflag [#allocation14], %s661_s25 }
 0x151   : > { %s697_s17 = scalar_lea.vmem [#allocation13], %s3100_s18 }
 0x152   : > { %2623 = dma.done.wait (%p3379_p11), %s695_s28, 272  }
 0x153   : > { %2625 = vsyncadd (%p3379_p11), %s695_s28, 4294967024  ;;  %s706_s29 = scalar_lea.vmem [#allocation15], %s3103_s2  ;;  %s712_s20 = scalar_lea.sflag [#allocation17], %s661_s25 }
 0x154   : > { %s714_s1 = scalar_lea.vmem [#allocation16], %s3100_s18 }
 0x155   : > { %2627 = dma.done.wait (%p3379_p11), %s712_s20, 32  }
 0x156   : > { %2629 = vsyncadd (%p3379_p11), %s712_s20, 4294967264  ;;  %s722_s0 = scalar_lea.vmem [#allocation18], %s3100_s18  ;;  %s728_s10 = scalar_lea.sflag [#allocation20], %s661_s25 }
 0x157   : > { %s730_s23 = scalar_lea.vmem [#allocation19], %s3100_s18 }
 0x158   : > { %2631 = dma.done.wait (%p3379_p11), %s728_s10, 32  }
 0x159   : > { %2633 = vsyncadd (%p3379_p11), %s728_s10, 4294967264  ;;  %p825_p8 = scmp.lt.s32.totalorder %s3380_s24, 1  ;;  %s3381_s5 = sld [smem:[#allocation40_spill]] }
 0x15a   : > { %s738_s4 = scalar_lea.vmem [#allocation21], %s3100_s18  ;;  %p1996_p12 = scmp.ne.s32.totalorder %s3380_s24, 0 }
 0x15b   : > { %s826_s26 = scalar_select %p825_p8, %s3380_s24, 1 }
 0x15c   : > { %834 = sbr.rel (%p1996_p12) target bundleno = 356 (0x164), region = 124  ;;  %s3382_s20 = sld [smem:[#allocation32_spill]] (!%p1996_p12) }
 0x15d   : > { %s2034_s3 = sshll.u32 %s826_s26, 5 }
 0x15f   : > { %s3146_s15 = scalar_lea.vmem %s3381_s5, %s2034_s3 }
 0x161   : > { %vm837_vm0 = vcmask 261120  }
 0x162   : > { %v835_v0 = vld [vmem:[%s3382_s20] sm:$0xff]  ;;  %v836_v1 = vld [vmem:[%s3382_s20 + $0x8] sm:$0xff] }
 0x163   : > { %838 = vst.msk [vmem:[#allocation2] sm:$0xff] %vm837_vm0, %v835_v0  ;;  %839 = vst.msk [vmem:[#allocation2 + $0x8] sm:$0xff] %vm837_vm0, %v836_v1 }
 0x164 PF: > { %v2248_v2 = vld [vmem:[%s656_s27 + $0x8] sm:$0xff]   ;;  %v2663_v3 = vmov 0.0   ;;  %v2249_v4 = vld [vmem:[%s656_s27] sm:$0xff]   ;;  %vm2664_vm1 = vmmov 0   ;;  %vm866_vm2 = vcmask 261120   ;;  %vm911_vm3 = vcmask 785408  }
 0x165   : > { %2065 = vmatprep.subr.bf16.mxu0 %v2663_v3  ;;  %2073 = vmatprep.subr.bf16.mxu1 %v2663_v3  ;;  %v1997_v8 = vld [vmem:[%s664_s14] ss:$0 sm:$0xff]  ;;  %s2665_s27 = smov 96   ;;  %s2666_s24 = smov 112   ;;  %vm926_vm4 = vcmask 130048   ;;  %vm973_vm5 = vcmask 64512  }
 0x166   : > { %2066 = vmatpush3.bf16.msra.mxu0 %v2248_v2  ;;  %2069 = vmatprep.mubr.msk.bf16.mxu0 %vm2664_vm1, %v2663_v3  ;;  %s2667_s14 = smov 80   ;;  %s3383_s21 = sld [smem:[#allocation33_spill]]  ;;  %vm991_vm6 = vcmask 1043456   ;;  %vm1156_vm7 = vcmask 261248   ;;  %vm1633_vm8 = vcmask 523264  }
 0x167   : > { %2067 = vmatprep.subr.bf16.mxu0 %v2663_v3  ;;  %2075 = vmatprep.mubr.msk.bf16.mxu1 %vm2664_vm1, %v2663_v3  ;;  %s2668_s25 = smov 64   ;;  %s2669_s28 = smov 48  }
 0x168   : > { %s2670_s22 = smov 16  }
 0x16a   : > { %v3164_v5 = vld [vmem:[#allocation2] sm:$0xff]  ;;  %v3166_v6 = vld [vmem:[#allocation2 + $0x8] sm:$0xff]  ;;  %2068 = vmatpush3.bf16.msra.mxu0 %v2249_v4 }
 0x16b   : > { %v842_v7 = vpack.c.bf16 %v3166_v6, %v3164_v5  ;;  %2079 = vmatprep.subr.bf16.mxu0 %v2663_v3 }
 0x16c   : > { %v2001_v33 = vld [vmem:[%s3383_s21] ss:$0 sm:$0xff]  ;;  %v2006_v46 = vld [vmem:[%s3383_s21 + $0x1] ss:$0 sm:$0xff] }
 0x16d   : > { %2070 = vmatmul.mubr.msk.bf16.vlgmr.msra.gmra.mxu0 %vm866_vm2, %v842_v7 }
 0x16e   : > { %2081 = vmatprep.mubr.msk.bf16.mxu0 %vm2664_vm1, %v2663_v3 }
 0x22d   : > { %v904_v9 = vpop.f32.mrf.mxu0 }
 0x22e   : > { %v905_v10 = vadd.f32 %v1997_v8, %v904_v9 }
 0x22f   : > { %v2071_v11 = vpop.f32.mrf.mxu0 }
 0x230   : > { %912 = vst.msk [vmem:[#allocation3] sm:$0xff] %vm911_vm3, %v905_v10 }
 0x231   : > { %v907_v12 = vpop.f32.mrf.mxu0 }
 0x232   : > { %v908_v13 = vadd.f32 %v1997_v8, %v907_v12 }
 0x233   : > { %v2072_v14 = vpop.f32.mrf.mxu0 }
 0x234   : > { %913 = vst.msk [vmem:[#allocation3 + $0x8] sm:$0xff] %vm911_vm3, %v908_v13 }
 0x237   : > { %v915_v15 = vld [vmem:[#allocation3] sm:$0xff] }
 0x238   : > { %v3179_v16 = vpack.c.bf16 %v915_v15, %v915_v15  ;;  %v916_v17 = vmul.f32 0.25, %v915_v15 }
 0x23a   : > { %924 = vrot.lane.b32.xlu0 %v3179_v16, %s2665_s27  ;;  %v917_v18 = vpack.c.bf16 %v916_v17, %v916_v17 }
 0x23b   : > { %v1159_v19 = vld [vmem:[#allocation3 + $0x8] sm:$0xff] }
 0x23c   : > { %1041 = vrot.lane.b32.xlu1 %v917_v18, %s2666_s24  ;;  %v3183_v20 = vpack.c.bf16 %v1159_v19, %v1159_v19  ;;  %v1160_v21 = vmul.f32 0.25, %v1159_v19 }
 0x23e   : > { %1044 = vrot.lane.b32.xlu0 %v3179_v16, %s2667_s14  ;;  %v1161_v22 = vpack.c.bf16 %v1160_v21, %v1160_v21 }
 0x240   : > { %1168 = vrot.lane.b32.xlu1 %v3183_v20, %s2665_s27 }
 0x242   : > { %1285 = vrot.lane.b32.xlu0 %v3183_v20, %s2667_s14 }
 0x244   : > { %1282 = vrot.lane.b32.xlu1 %v1161_v22, %s2666_s24 }
 0x2ac   : > { %v925_v23 = vpop.permute.xlu0 %924 }
 0x2ad   : > { %v931_v24 = vsel %vm926_vm4, %v925_v23, 0 }
 0x2ae   : > { %2074 = vmatpush3.bf16.xpose.msra.mxu1 %v931_v24  ;;  %v1042_v26 = vpop.permute.xlu1 %1041 }
 0x2af   : > { %2085 = vmatprep.subr.bf16.mxu1 %v2663_v3 }
 0x2b0   : > { %v1045_v25 = vpop.permute.xlu0 %1044 }
 0x2b1   : > { %v1050_v27 = vsel %vm926_vm4, %v1045_v25, 0 }
 0x2b2   : > { %v1169_v28 = vpop.permute.xlu1 %1168 }
 0x2b3   : > { %v1174_v29 = vsel %vm926_vm4, %v1169_v28, 0 }
 0x2b4   : > { %v1286_v30 = vpop.permute.xlu0 %1285 }
 0x2b5   : > { %2076 = vmatmul.mubr.msk.bf16.vlgmr.msra.gmra.mxu1 %vm926_vm4, %v917_v18  ;;  %v1291_v31 = vsel %vm926_vm4, %v1286_v30, 0 }
 0x2b6   : > { %2086 = vmatpush3.bf16.xpose.msra.mxu1 %v1050_v27  ;;  %2087 = vmatprep.mubr.msk.bf16.mxu1 %vm2664_vm1, %v2663_v3  ;;  %v1283_v32 = vpop.permute.xlu1 %1282 }
 0x2b7   : > { %2097 = vmatprep.subr.bf16.mxu1 %v2663_v3 }
 0x2bd   : > { %2088 = vmatmul.mubr.msk.bf16.vlgmr.msra.gmra.mxu1 %vm926_vm4, %v1042_v26 }
 0x2be   : > { %2098 = vmatpush3.bf16.xpose.msra.mxu1 %v1174_v29  ;;  %2099 = vmatprep.mubr.msk.bf16.mxu1 %vm2664_vm1, %v2663_v3 }
 0x2bf   : > { %2109 = vmatprep.subr.bf16.mxu1 %v2663_v3 }
 0x2c5   : > { %2100 = vmatmul.mubr.msk.bf16.vlgmr.msra.gmra.mxu1 %vm926_vm4, %v1161_v22 }
 0x2c6   : > { %2110 = vmatpush3.bf16.xpose.msra.mxu1 %v1291_v31  ;;  %2111 = vmatprep.mubr.msk.bf16.mxu1 %vm2664_vm1, %v2663_v3 }
 0x2c7   : > { %2121 = vmatprep.subr.bf16.mxu1 %v2663_v3 }
 0x2cd   : > { %2112 = vmatmul.mubr.msk.bf16.vlgmr.msra.gmra.mxu1 %vm926_vm4, %v1283_v32 }
 0x2ce   : > { %2125 = vmatprep.mubr.msk.bf16.mxu1 %vm2664_vm1, %v2663_v3 }
 0x375   : > { %v967_v34 = vpop.f32.mrf.mxu1 }
 0x376   : > { %v968_v35 = vadd.f32 %v2001_v33, %v967_v34 }
 0x377   : > { %v2077_v36 = vpop.f32.mrf.mxu1 }
 0x378   : > { %v974_v37 = vsel %vm973_vm5, %v968_v35, -inf }
 0x379   : > { %v970_v38 = vpop.f32.mrf.mxu1  ;;  %975 = vmax.xlane.f32.xlu0 %v974_v37 }
 0x37b   : > { %v2078_v39 = vpop.f32.mrf.mxu1 }
 0x37d   : > { %v1086_v40 = vpop.f32.mrf.mxu1 }
 0x37e   : > { %v1087_v41 = vadd.f32 %v2001_v33, %v1086_v40 }
 0x37f   : > { %v2089_v42 = vpop.f32.mrf.mxu1 }
 0x380   : > { %v1092_v43 = vsel %vm973_vm5, %v1087_v41, -inf }
 0x381   : > { %v1089_v44 = vpop.f32.mrf.mxu1  ;;  %1093 = vmax.xlane.f32.xlu1 %v1092_v43 }
 0x383   : > { %v2090_v45 = vpop.f32.mrf.mxu1 }
 0x385   : > { %v1210_v47 = vpop.f32.mrf.mxu1 }
 0x386   : > { %v1211_v48 = vadd.f32 %v2006_v46, %v1210_v47 }
 0x387   : > { %v2101_v49 = vpop.f32.mrf.mxu1 }
 0x388   : > { %v1216_v50 = vsel %vm973_vm5, %v1211_v48, -inf }
 0x389   : > { %1217 = vmax.xlane.f32.xlu0 %v1216_v50  ;;  %v1213_v51 = vpop.f32.mrf.mxu1  ;;  %v2250_v50 = vld [vmem:[%s673_s16 + $0x8] sm:$0xff]  }
 0x38a   : > { %2122 = vmatpush3.bf16.msra.mxu1 %v2250_v50  ;;  %v2251_v51 = vld [vmem:[%s673_s16] sm:$0xff]  }
 0x38b   : > { %v2102_v52 = vpop.f32.mrf.mxu1  ;;  %2123 = vmatprep.subr.bf16.mxu1 %v2663_v3 }
 0x38d   : > { %v1327_v53 = vpop.f32.mrf.mxu1 }
 0x38e   : > { %v1328_v54 = vadd.f32 %v2006_v46, %v1327_v53  ;;  %2124 = vmatpush3.bf16.msra.mxu1 %v2251_v51 }
 0x38f   : > { %v2113_v55 = vpop.f32.mrf.mxu1  ;;  %2137 = vmatprep.subr.bf16.mxu1 %v2663_v3 }
 0x390   : > { %v1333_v56 = vsel %vm973_vm5, %v1328_v54, -inf }
 0x391   : > { %1334 = vmax.xlane.f32.xlu0 %v1333_v56  ;;  %v1330_v57 = vpop.f32.mrf.mxu1 }
 0x393   : > { %v2114_v58 = vpop.f32.mrf.mxu1 }
 0x402   : > { %v976_v59 = vpop.xlane.xlu0 %975 }
 0x403   : > { %v977_v60 = vsub.f32 %v968_v35, %v976_v59 }
 0x405   : > { %v978_v61 = vmul.f32 1.442695, %v977_v60 }
 0x407   : > { %2258 = vpow2.f32 %v978_v61 }
 0x40a   : > { %v1094_v62 = vpop.xlane.xlu1 %1093 }
 0x40b   : > { %v1095_v63 = vsub.f32 %v1087_v41, %v1094_v62 }
 0x40d   : > { %v1096_v0 = vmul.f32 1.442695, %v1095_v63 }
 0x40f   : > { %2260 = vpow2.f32 %v1096_v0 }
 0x412   : > { %v1218_v4 = vpop.xlane.xlu0 %1217 }
 0x413   : > { %v1219_v14 = vsub.f32 %v1211_v48, %v1218_v4 }
 0x414   : > { %v2259_v1 = vpop.eup %2258 }
 0x415   : > { %v980_v2 = vsel %vm973_vm5, %v2259_v1, 0.0  ;;  %v1220_v15 = vmul.f32 1.442695, %v1219_v14 }
 0x416   : > { %981 = vadd.xlane.f32.xlu1 %v980_v2 }
 0x41a   : > { %v1335_v7 = vpop.xlane.xlu0 %1334 }
 0x41b   : > { %v1336_v8 = vsub.f32 %v1328_v54, %v1335_v7 }
 0x41c   : > { %v2261_v9 = vpop.eup %2260 }
 0x41d   : > { %v1337_v10 = vmul.f32 1.442695, %v1336_v8  ;;  %v1098_v11 = vsel %vm973_vm5, %v2261_v9, 0.0 }
 0x41e   : > { %1099 = vadd.xlane.f32.xlu0 %v1098_v11 }
 0x41f   : > { %2262 = vpow2.f32 %v1337_v10 }
 0x420   : > { %2264 = vpow2.f32 %v1220_v15 }
 0x427   : > { %986 = vrot.lane.b32.xlu1 %v3179_v16, %s2668_s25 }
 0x42c   : > { %v2263_v12 = vpop.eup %2262 }
 0x42d   : > { %v1339_v13 = vsel %vm973_vm5, %v2263_v12, 0.0  ;;  %v2265_v17 = vpop.eup %2264 }
 0x42e   : > { %1340 = vadd.xlane.f32.xlu0 %v1339_v13  ;;  %v1222_v18 = vsel %vm973_vm5, %v2265_v17, 0.0 }
 0x444   : > { %1104 = vrot.lane.b32.xlu0 %v3179_v16, %s2669_s28 }
 0x44b   : > { %1223 = vadd.xlane.f32.xlu1 %v1222_v18 }
 0x45c   : > { %1228 = vrot.lane.b32.xlu1 %v3183_v20, %s2668_s25 }
 0x460   : > { %1345 = vrot.lane.b32.xlu1 %v3183_v20, %s2669_s28 }
 0x49f   : > { %v982_v19 = vpop.xlane.xlu1 %981 }
 0x4a0   : > { %2266 = vrcp.f32 %v982_v19 }
 0x4a3   : > { %v987_v21 = vpop.permute.xlu1 %986 }
 0x4a4   : > { %v993_v22 = vsel %vm991_vm6, %v987_v21, 0 }
 0x4a5   : > { %2080 = vmatpush3.bf16.msra.mxu0 %v993_v22 }
 0x4a6   : > { %2091 = vmatprep.subr.bf16.mxu0 %v2663_v3 }
 0x4a7   : > { %v1100_v23 = vpop.xlane.xlu0 %1099 }
 0x4a8   : > { %2268 = vrcp.f32 %v1100_v23 }
 0x4ad   : > { %v2267_v16 = vpop.eup %2266 }
 0x4ae   : > { %v984_v24 = vmul.f32 %v2267_v16, %v2259_v1  ;;  %v2011_v1 = vld [vmem:[%s681_s7] ss:$0 sm:$0xff]  ;;  %s3384_s7 = sld [smem:[#allocation41_spill]] }
 0x4b0   : > { %v985_v25 = vpack.c.bf16 %v984_v24, %v984_v24 }
 0x4b2   : > { %2082 = vmatmul.mubr.msk.bf16.vlgmr.msra.gmra.mxu0 %vm973_vm5, %v985_v25  ;;  %v2253_v25 = vld [vmem:[%s706_s29] sm:$0xff]  }
 0x4b3   : > { %2093 = vmatprep.mubr.msk.bf16.mxu0 %vm2664_vm1, %v2663_v3 }
 0x4b5   : > { %v2269_v20 = vpop.eup %2268 }
 0x4b6   : > { %v1102_v27 = vmul.f32 %v2269_v20, %v2261_v9 }
 0x4b7   : > { %v1341_v26 = vpop.xlane.xlu0 %1340 }
 0x4b8   : > { %v1103_v30 = vpack.c.bf16 %v1102_v27, %v1102_v27 }
 0x4bb   : > { %v1105_v28 = vpop.permute.xlu0 %1104 }
 0x4bc   : > { %v1110_v29 = vsel %vm991_vm6, %v1105_v28, 0 }
 0x4bd   : > { %2092 = vmatpush3.bf16.msra.mxu0 %v1110_v29 }
 0x4be   : > { %2103 = vmatprep.subr.bf16.mxu0 %v2663_v3 }
 0x4c0   : > { %2094 = vmatmul.mubr.msk.bf16.vlgmr.msra.gmra.mxu0 %vm973_vm5, %v1103_v30 }
 0x4c1   : > { %2105 = vmatprep.mubr.msk.bf16.mxu0 %vm2664_vm1, %v2663_v3 }
 0x4d4   : > { %v1224_v31 = vpop.xlane.xlu1 %1223 }
 0x4d5   : > { %2270 = vrcp.f32 %v1224_v31 }
 0x4d6   : > { %2272 = vrcp.f32 %v1341_v26 }
 0x4d8   : > { %v1229_v32 = vpop.permute.xlu1 %1228 }
 0x4d9   : > { %v1234_v33 = vsel %vm991_vm6, %v1229_v32, 0 }
 0x4da   : > { %2104 = vmatpush3.bf16.msra.mxu0 %v1234_v33  ;;  %v2015_v33 = vld [vmem:[%s689_s9] ss:$0 sm:$0xff] }
 0x4db   : > { %2115 = vmatprep.subr.bf16.mxu0 %v2663_v3 }
 0x4dc   : > { %v1346_v36 = vpop.permute.xlu1 %1345 }
 0x4dd   : > { %v1351_v39 = vsel %vm991_vm6, %v1346_v36, 0 }
 0x4e2   : > { %v2271_v34 = vpop.eup %2270 }
 0x4e3   : > { %v1226_v35 = vmul.f32 %v2271_v34, %v2265_v17  ;;  %v2273_v38 = vpop.eup %2272 }
 0x4e4   : > { %v1343_v40 = vmul.f32 %v2273_v38, %v2263_v12 }
 0x4e5   : > { %v1227_v37 = vpack.c.bf16 %v1226_v35, %v1226_v35 }
 0x4e6   : > { %v1344_v41 = vpack.c.bf16 %v1343_v40, %v1343_v40 }
 0x4e7   : > { %2106 = vmatmul.mubr.msk.bf16.vlgmr.msra.gmra.mxu0 %vm973_vm5, %v1227_v37  ;;  %v2016_v37 = vld [vmem:[%s697_s17] ss:$0 sm:$0xff] }
 0x4e8   : > { %2116 = vmatpush3.bf16.msra.mxu0 %v1351_v39  ;;  %2117 = vmatprep.mubr.msk.bf16.mxu0 %vm2664_vm1, %v2663_v3 }
 0x4e9   : > { %2129 = vmatprep.subr.bf16.mxu0 %v2663_v3 }
 0x4ef   : > { %2118 = vmatmul.mubr.msk.bf16.vlgmr.msra.gmra.mxu0 %vm973_vm5, %v1344_v41 }
 0x4f0   : > { %2133 = vmatprep.mubr.msk.bf16.mxu0 %vm2664_vm1, %v2663_v3 }
 0x572   : > { %v1029_v42 = vpop.f32.mrf.mxu0 }
 0x573   : > { %1035 = vst.msk [vmem:[#allocation4] sm:$0xff] %vm926_vm4, %v1029_v42  ;;  %v2254_v42 = vld [vmem:[%s3146_s15 + $0x18] sm:$0xff]  }
 0x574   : > { %v2083_v43 = vpop.f32.mrf.mxu0 }
 0x575   : > { %v2255_v43 = vld [vmem:[%s3146_s15 + $0x10] sm:$0xff]  }
 0x576   : > { %v1032_v44 = vpop.f32.mrf.mxu0 }
 0x577   : > { %v2256_v44 = vld [vmem:[%s3146_s15 + $0x8] sm:$0xff]  }
 0x578   : > { %v2084_v45 = vpop.f32.mrf.mxu0 }
 0x579   : > { %v2257_v45 = vld [vmem:[%s3146_s15] sm:$0xff]  }
 0x580   : > { %v1146_v46 = vpop.f32.mrf.mxu0 }
 0x581   : > { %1153 = vrot.lane.b32.xlu0 %v1146_v46, %s2670_s22  ;;  %v2017_v46 = vld [vmem:[%s714_s1] ss:$0 sm:$0xff] }
 0x582   : > { %v2095_v47 = vpop.f32.mrf.mxu0 }
 0x584   : > { %v1149_v48 = vpop.f32.mrf.mxu0 }
 0x586   : > { %v2096_v49 = vpop.f32.mrf.mxu0 }
 0x5a7   : > { %v1270_v52 = vpop.f32.mrf.mxu0 }
 0x5a8   : > { %1276 = vst.msk [vmem:[#allocation4 + $0x8] sm:$0xff] %vm926_vm4, %v1270_v52 }
 0x5a9   : > { %v2107_v53 = vpop.f32.mrf.mxu0 }
 0x5ab   : > { %v1273_v54 = vpop.f32.mrf.mxu0 }
 0x5ad   : > { %v2108_v55 = vpop.f32.mrf.mxu0 }
 0x5af   : > { %v1387_v56 = vpop.f32.mrf.mxu0 }
 0x5b0   : > { %1394 = vrot.lane.b32.xlu1 %v1387_v56, %s2670_s22 }
 0x5b1   : > { %v2119_v57 = vpop.f32.mrf.mxu0 }
 0x5b3   : > { %v1390_v58 = vpop.f32.mrf.mxu0 }
 0x5b5   : > { %v2120_v59 = vpop.f32.mrf.mxu0 }
 0x5f3   : > { %v1154_v60 = vpop.permute.xlu0 %1153 }
 0x5f4   : > { %1157 = vst.msk [vmem:[#allocation4] sm:$0xff] %vm1156_vm7, %v1154_v60 }
 0x5fb   : > { %v1398_v62 = vld [vmem:[#allocation4] sm:$0xff] }
 0x622   : > { %v1395_v61 = vpop.permute.xlu1 %1394 }
 0x623   : > { %1397 = vst.msk [vmem:[#allocation4 + $0x8] sm:$0xff] %vm1156_vm7, %v1395_v61 }
 0x62a   : > { %v1399_v63 = vld [vmem:[#allocation4 + $0x8] sm:$0xff] }
 0x62b   : > { %v1400_v0 = vpack.c.bf16 %v1399_v63, %v1398_v62  ;;  %v2021_v63 = vld [vmem:[%s722_s0] ss:$0 sm:$0xff] }
 0x62d   : > { %2126 = vmatmul.mubr.msk.bf16.vlgmr.msra.gmra.mxu1 %vm866_vm2, %v1400_v0 }
 0x62e   : > { %2145 = vmatprep.mubr.msk.bf16.mxu1 %vm2664_vm1, %v2663_v3  ;;  %2138 = vmatpush3.bf16.msra.mxu1 %v2254_v42 }
 0x62f   : > { %2139 = vmatprep.subr.bf16.mxu1 %v2663_v3 }
 0x632   : > { %2140 = vmatpush3.bf16.msra.mxu1 %v2255_v43 }
 0x633   : > { %2141 = vmatprep.subr.bf16.mxu1 %v2663_v3 }
 0x636   : > { %2142 = vmatpush3.bf16.msra.mxu1 %v2256_v44 }
 0x637   : > { %2143 = vmatprep.subr.bf16.mxu1 %v2663_v3 }
 0x63a   : > { %2144 = vmatpush3.bf16.msra.mxu1 %v2257_v45 }
 0x6ed   : > { %v1461_v2 = vpop.f32.mrf.mxu1 }
 0x6ee   : > { %v1462_v4 = vadd.f32 %v2011_v1, %v1461_v2 }
 0x6ef   : > { %v2127_v7 = vpop.f32.mrf.mxu1 }
 0x6f0   : > { %v1468_v8 = vadd.f32 %v1462_v4, %v3164_v5 }
 0x6f1   : > { %v1464_v9 = vpop.f32.mrf.mxu1 }
 0x6f2   : > { %v1465_v10 = vadd.f32 %v2011_v1, %v1464_v9  ;;  %v1470_v11 = vsel %vm866_vm2, %v1468_v8, 0.0 }
 0x6f3   : > { %1471 = vadd.xlane.f32.xlu0 %v1470_v11  ;;  %v2128_v12 = vpop.f32.mrf.mxu1 }
 0x6f4   : > { %v1469_v13 = vadd.f32 %v1465_v10, %v3166_v6  ;;  %v2252_v6 = vld [vmem:[%s706_s29 + $0x8] sm:$0xff]  }
 0x6f5   : > { %2130 = vmatpush3.bf16.msra.mxu0 %v2252_v6 }
 0x6f6   : > { %v1473_v14 = vsel %vm866_vm2, %v1469_v13, 0.0  ;;  %2131 = vmatprep.subr.bf16.mxu0 %v2663_v3 }
 0x6f7   : > { %1474 = vadd.xlane.f32.xlu1 %v1473_v14 }
 0x6f9   : > { %2132 = vmatpush3.bf16.msra.mxu0 %v2253_v25 }
 0x77c   : > { %v1472_v15 = vpop.xlane.xlu0 %1471 }
 0x77d   : > { %v1477_v17 = vmul.f32 0.03125, %v1472_v15 }
 0x77f   : > { %v1479_v18 = vsub.f32 %v1468_v8, %v1477_v17 }
 0x780   : > { %v1475_v19 = vpop.xlane.xlu1 %1474 }
 0x781   : > { %v1478_v21 = vmul.f32 0.03125, %v1475_v19  ;;  %v1481_v22 = vmul.f32 %v1479_v18, %v1479_v18 }
 0x783   : > { %v1480_v5 = vsub.f32 %v1469_v13, %v1478_v21  ;;  %v1483_v23 = vsel %vm866_vm2, %v1481_v22, 0.0 }
 0x784   : > { %1484 = vadd.xlane.f32.xlu0 %v1483_v23 }
 0x785   : > { %v1482_v16 = vmul.f32 %v1480_v5, %v1480_v5 }
 0x787   : > { %v1486_v24 = vsel %vm866_vm2, %v1482_v16, 0.0 }
 0x788   : > { %1487 = vadd.xlane.f32.xlu0 %v1486_v24 }
 0x80d   : > { %v1485_v20 = vpop.xlane.xlu0 %1484 }
 0x80e   : > { %v1489_v26 = vmul.f32 0.03125, %v1485_v20 }
 0x810   : > { %v1491_v27 = vadd.f32 1e-05, %v1489_v26 }
 0x811   : > { %v1488_v28 = vpop.xlane.xlu0 %1487 }
 0x812   : > { %2274 = vrsqrt.f32 %v1491_v27  ;;  %v1490_v29 = vmul.f32 0.03125, %v1488_v28  ;;  %v2027_v28 = vld [vmem:[%s730_s23] ss:$0 sm:$0xff] }
 0x814   : > { %v1492_v30 = vadd.f32 1e-05, %v1490_v29 }
 0x816   : > { %2276 = vrsqrt.f32 %v1492_v30  ;;  %v2028_v30 = vld [vmem:[%s738_s4] ss:$0 sm:$0xff] }
 0x81f   : > { %v2275_v31 = vpop.eup %2274 }
 0x820   : > { %v1495_v32 = vmul.f32 %v2275_v31, %v1479_v18 }
 0x822   : > { %v1504_v36 = vmul.f32 %v2015_v33, %v1495_v32 }
 0x823   : > { %v2277_v34 = vpop.eup %2276 }
 0x824   : > { %v1496_v35 = vmul.f32 %v2277_v34, %v1480_v5  ;;  %v1513_v39 = vadd.f32 %v2016_v37, %v1504_v36 }
 0x826   : > { %v1505_v38 = vmul.f32 %v2015_v33, %v1496_v35 }
 0x828   : > { %v1514_v40 = vadd.f32 %v2016_v37, %v1505_v38 }
 0x82a   : > { %v1515_v41 = vpack.c.bf16 %v1514_v40, %v1513_v39 }
 0x82c   : > { %2134 = vmatmul.mubr.msk.bf16.vlgmr.msra.gmra.mxu0 %vm866_vm2, %v1515_v41 }
 0x8ec   : > { %v1576_v47 = vpop.f32.mrf.mxu0 }
 0x8ed   : > { %v1577_v48 = vadd.f32 %v2017_v46, %v1576_v47 }
 0x8ee   : > { %v2135_v49 = vpop.f32.mrf.mxu0 }
 0x8ef   : > { %v1585_v50 = vmul.f32 0.70710677, %v1577_v48  ;;  %v1583_v58 = vmul.f32 0.5, %v1577_v48 }
 0x8f0   : > { %v1579_v51 = vpop.f32.mrf.mxu0 }
 0x8f1   : > { %2278 = verf.f32 %v1585_v50  ;;  %v1580_v52 = vadd.f32 %v2017_v46, %v1579_v51 }
 0x8f2   : > { %v2136_v53 = vpop.f32.mrf.mxu0 }
 0x8f3   : > { %v1586_v54 = vmul.f32 0.70710677, %v1580_v52  ;;  %v1584_v3 = vmul.f32 0.5, %v1580_v52 }
 0x8f5   : > { %2280 = verf.f32 %v1586_v54 }
 0x8fe   : > { %v2279_v55 = vpop.eup %2278 }
 0x8ff   : > { %v1589_v56 = vadd.f32 1.0, %v2279_v55 }
 0x901   : > { %v1591_v60 = vmul.f32 %v1589_v56, %v1583_v58 }
 0x902   : > { %v2281_v57 = vpop.eup %2280 }
 0x903   : > { %v1590_v59 = vadd.f32 1.0, %v2281_v57 }
 0x905   : > { %v1592_v61 = vmul.f32 %v1590_v59, %v1584_v3 }
 0x907   : > { %v1593_v62 = vpack.c.bf16 %v1592_v61, %v1591_v60 }
 0x909   : > { %2146 = vmatmul.mubr.msk.bf16.vlgmr.msra.gmra.mxu1 %vm1633_vm8, %v1593_v62 }
 0x9c9   : > { %v1671_v0 = vpop.f32.mrf.mxu1 }
 0x9ca   : > { %v1672_v1 = vadd.f32 %v2021_v63, %v1671_v0 }
 0x9cb   : > { %v2147_v2 = vpop.f32.mrf.mxu1 }
 0x9cc   : > { %v1678_v4 = vadd.f32 %v1672_v1, %v1513_v39 }
 0x9cd   : > { %v1674_v7 = vpop.f32.mrf.mxu1 }
 0x9ce   : > { %v1675_v8 = vadd.f32 %v2021_v63, %v1674_v7  ;;  %v1680_v9 = vsel %vm866_vm2, %v1678_v4, 0.0 }
 0x9cf   : > { %1681 = vadd.xlane.f32.xlu1 %v1680_v9  ;;  %v2148_v10 = vpop.f32.mrf.mxu1 }
 0x9d0   : > { %v1679_v11 = vadd.f32 %v1675_v8, %v1514_v40 }
 0x9d2   : > { %v1683_v12 = vsel %vm866_vm2, %v1679_v11, 0.0 }
 0x9d3   : > { %1684 = vadd.xlane.f32.xlu0 %v1683_v12 }
 0xa58   : > { %v1682_v13 = vpop.xlane.xlu1 %1681 }
 0xa59   : > { %v1686_v14 = vmul.f32 0.03125, %v1682_v13 }
 0xa5b   : > { %v1688_v15 = vsub.f32 %v1678_v4, %v1686_v14 }
 0xa5c   : > { %v1685_v17 = vpop.xlane.xlu0 %1684 }
 0xa5d   : > { %v1687_v18 = vmul.f32 0.03125, %v1685_v17  ;;  %v1690_v19 = vmul.f32 %v1688_v15, %v1688_v15 }
 0xa5f   : > { %v1689_v21 = vsub.f32 %v1679_v11, %v1687_v18  ;;  %v1692_v22 = vsel %vm866_vm2, %v1690_v19, 0.0 }
 0xa60   : > { %1693 = vadd.xlane.f32.xlu1 %v1692_v22 }
 0xa61   : > { %v1691_v5 = vmul.f32 %v1689_v21, %v1689_v21 }
 0xa63   : > { %v1695_v23 = vsel %vm866_vm2, %v1691_v5, 0.0 }
 0xa64   : > { %1696 = vadd.xlane.f32.xlu0 %v1695_v23 }
 0xae9   : > { %v1694_v16 = vpop.xlane.xlu1 %1693 }
 0xaea   : > { %v1698_v24 = vmul.f32 0.03125, %v1694_v16 }
 0xaec   : > { %v1700_v6 = vadd.f32 1e-05, %v1698_v24 }
 0xaed   : > { %v1697_v25 = vpop.xlane.xlu0 %1696 }
 0xaee   : > { %2282 = vrsqrt.f32 %v1700_v6  ;;  %v1699_v20 = vmul.f32 0.03125, %v1697_v25 }
 0xaf0   : > { %v1701_v26 = vadd.f32 1e-05, %v1699_v20 }
 0xaf2   : > { %2284 = vrsqrt.f32 %v1701_v26 }
 0xafb   : > { %v2283_v27 = vpop.eup %2282 }
 0xafc   : > { %v1704_v29 = vmul.f32 %v2283_v27, %v1688_v15 }
 0xafe   : > { %v1713_v31 = vmul.f32 %v2027_v28, %v1704_v29 }
 0xaff   : > { %v2285_v32 = vpop.eup %2284 }
 0xb00   : > { %v1722_v33 = vadd.f32 %v2028_v30, %v1713_v31  ;;  %v1705_v34 = vmul.f32 %v2285_v32, %v1689_v21 }
 0xb02   : > { %1724 = vst.msk [vmem:[#allocation2] sm:$0xff] %vm866_vm2, %v1722_v33  ;;  %1726 = vst.msk [vmem:[%s3384_s7] sm:$0xff] %vm866_vm2, %v1722_v33  ;;  %v1714_v35 = vmul.f32 %v2027_v28, %v1705_v34 }
 0xb04   : > { %v1723_v36 = vadd.f32 %v2028_v30, %v1714_v35 }
 0xb06   : > { %1725 = vst.msk [vmem:[#allocation2 + $0x8] sm:$0xff] %vm866_vm2, %v1723_v36  ;;  %1727 = vst.msk [vmem:[%s3384_s7 + $0x8] sm:$0xff] %vm866_vm2, %v1723_v36 }
 0xb07 PF: > { %s3385_s16 = sld [smem:[#allocation30_spill]]  ;;  %s3388_s29 = smov %s2640_s30 }
 0xb08   : > { %s3386_s18 = sld [smem:[#allocation28_spill]] }
 0xb09   : > { %s3387_s15 = sld [smem:[#allocation31_spill]] }
 0xb0d   : > { %p39_p13 = scmp.ge.s32.totalorder %s3385_s16, 4  }
 0xb0e   : > { %s3389_s30 = smov %s3386_s18 }
 0xb0f   :  { %41 = sbr.rel (!%p39_p13) target bundleno = 24 (0x18), region = 239 }
 0xb14   :  { %1739 = vsyncpa [#allocation6], 1 }
 0xb15   :  { %1741 = vsyncpa [#allocation6 + $0x1], 1 }
 0xb16   :  { %1742 = vsyncpa [#allocation8], 1 }
 0xb17   :  { %1744 = vsyncpa [#allocation8 + $0x1], 1 }
 0xb18   :  { %1745 = vsyncpa [#allocation11], 1 }
 0xb19   :  { %1747 = vsyncpa [#allocation11 + $0x1], 1 }
 0xb1a   :  { %1748 = vsyncpa [#allocation14], 1 }
 0xb1b   :  { %1750 = vsyncpa [#allocation14 + $0x1], 1 }
 0xb1c   :  { %1751 = vsyncpa [#allocation17], 1 }
 0xb1d   :  { %1753 = vsyncpa [#allocation17 + $0x1], 1 }
 0xb1e   :  { %1754 = vsyncpa [#allocation20], 1 }
 0xb1f   :  { %1756 = vsyncpa [#allocation20 + $0x1], 1 }

// kernel: matching_model_forward.9
= control target key start
LH: loop header
LB: loop body
LE: loop exit
PB: predicated region body
PF: predicated region fallthrough
CT: control target
= control target key end

     0   :  { %vm372_vm0 = vcmask 261120   ;;  %s637_s1 = inlined_call_operand.vmem [shape: bf16[512,32], index: 1, kind: input, shape index: {}]   ;;  %s638_s0 = inlined_call_operand.vmem [shape: f32[16,512], index: 0, kind: input, shape index: {}]   ;;  %s639_s2 = inlined_call_operand.vmem [shape: f32[1,32], index: 2, kind: input, shape index: {}]   ;;  %s640_s3 = inlined_call_operand.vmem [shape: f32[16,32], index: 3, kind: output, shape index: {}]  }
   0x1   :  { %v456_v0 = vld [vmem:[%s637_s1 + $0x78] sm:$0xff]   ;;  %v460_v4 = vld [vmem:[%s637_s1 + $0x70] sm:$0xff]   ;;  %v464_v8 = vld [vmem:[%s637_s1 + $0x68] sm:$0xff]  }
   0x2   :  { %v457_v1 = vld [vmem:[%s637_s1 + $0xf8] sm:$0xff]   ;;  %412 = vmatprep.subr.bf16.mxu0 %v456_v0  ;;  %v461_v5 = vld [vmem:[%s637_s1 + $0xf0] sm:$0xff]   ;;  %v465_v9 = vld [vmem:[%s637_s1 + $0xe8] sm:$0xff]  }
   0x3   :  { %v458_v2 = vld [vmem:[%s637_s1 + $0x38] sm:$0xff]   ;;  %434 = vmatprep.subr.bf16.mxu1 %v457_v1  ;;  %v462_v6 = vld [vmem:[%s637_s1 + $0x30] sm:$0xff]   ;;  %v466_v10 = vld [vmem:[%s637_s1 + $0x28] sm:$0xff]  }
   0x4   :  { %v459_v3 = vld [vmem:[%s637_s1 + $0xb8] sm:$0xff]   ;;  %413 = vmatpush3.bf16.msra.mxu0 %v458_v2  ;;  %v463_v7 = vld [vmem:[%s637_s1 + $0xb0] sm:$0xff]   ;;  %v467_v11 = vld [vmem:[%s637_s1 + $0xa8] sm:$0xff]  }
   0x5   :  { %435 = vmatpush3.bf16.msra.mxu1 %v459_v3  ;;  %414 = vmatprep.subr.bf16.mxu0 %v460_v4  ;;  %v468_v12 = vld [vmem:[%s637_s1 + $0x60] sm:$0xff]   ;;  %v472_v16 = vld [vmem:[%s637_s1 + $0x58] sm:$0xff]   ;;  %v476_v20 = vld [vmem:[%s637_s1 + $0x50] sm:$0xff]  }
   0x6   :  { %436 = vmatprep.subr.bf16.mxu1 %v461_v5  ;;  %v469_v13 = vld [vmem:[%s637_s1 + $0xe0] sm:$0xff]   ;;  %v473_v17 = vld [vmem:[%s637_s1 + $0xd8] sm:$0xff]   ;;  %v477_v21 = vld [vmem:[%s637_s1 + $0xd0] sm:$0xff]  }
   0x7   :  { %v470_v14 = vld [vmem:[%s637_s1 + $0x20] sm:$0xff]   ;;  %v474_v18 = vld [vmem:[%s637_s1 + $0x18] sm:$0xff]   ;;  %v478_v22 = vld [vmem:[%s637_s1 + $0x10] sm:$0xff]  }
   0x8   :  { %415 = vmatpush3.bf16.msra.mxu0 %v462_v6  ;;  %v471_v15 = vld [vmem:[%s637_s1 + $0xa0] sm:$0xff]   ;;  %v475_v19 = vld [vmem:[%s637_s1 + $0x98] sm:$0xff]   ;;  %v479_v23 = vld [vmem:[%s637_s1 + $0x90] sm:$0xff]  }
   0x9   :  { %437 = vmatpush3.bf16.msra.mxu1 %v463_v7  ;;  %416 = vmatprep.subr.bf16.mxu0 %v464_v8  ;;  %v480_v24 = vld [vmem:[%s637_s1 + $0x48] sm:$0xff]   ;;  %v484_v28 = vld [vmem:[%s637_s1 + $0x40] sm:$0xff]   ;;  %v18_v34 = vld [vmem:[%s638_s0 + $0x18] sm:$0xff] }
   0xa   :  { %438 = vmatprep.subr.bf16.mxu1 %v465_v9  ;;  %v481_v25 = vld [vmem:[%s637_s1 + $0xc8] sm:$0xff]   ;;  %v485_v29 = vld [vmem:[%s637_s1 + $0xc0] sm:$0xff]   ;;  %v22_v36 = vld [vmem:[%s638_s0 + $0x38] sm:$0xff] }
   0xb   :  { %v482_v26 = vld [vmem:[%s637_s1 + $0x8] sm:$0xff]   ;;  %v486_v30 = vld [vmem:[%s637_s1] sm:$0xff]   ;;  %v26_v39 = vpack.c.bf16 %v22_v36, %v18_v34  ;;  %v17_v41 = vld [vmem:[%s638_s0 + $0x10] sm:$0xff] }
   0xc   :  { %417 = vmatpush3.bf16.msra.mxu0 %v466_v10  ;;  %v483_v27 = vld [vmem:[%s637_s1 + $0x88] sm:$0xff]   ;;  %v487_v31 = vld [vmem:[%s637_s1 + $0x80] sm:$0xff]   ;;  %v21_v42 = vld [vmem:[%s638_s0 + $0x30] sm:$0xff] }
   0xd   :  { %439 = vmatpush3.bf16.msra.mxu1 %v467_v11  ;;  %418 = vmatprep.subr.bf16.mxu0 %v468_v12  ;;  %v16_v32 = vld [vmem:[%s638_s0 + $0x8] sm:$0xff]  ;;  %v15_v37 = vld [vmem:[%s638_s0] sm:$0xff]  ;;  %v25_v43 = vpack.c.bf16 %v21_v42, %v17_v41 }
   0xe   :  { %440 = vmatprep.subr.bf16.mxu1 %v469_v13  ;;  %v20_v33 = vld [vmem:[%s638_s0 + $0x28] sm:$0xff]  ;;  %v19_v38 = vld [vmem:[%s638_s0 + $0x20] sm:$0xff]  ;;  %363 = vmatprep.mubr.bf16.mxu1 %v26_v39 }
   0xf   :  { %v24_v35 = vpack.c.bf16 %v20_v33, %v16_v32  ;;  %v23_v40 = vpack.c.bf16 %v19_v38, %v15_v37  ;;  %v379_v46 = vld [vmem:[%s639_s2] ss:$0 sm:$0xff] }
  0x10   :  { %419 = vmatpush3.bf16.msra.mxu0 %v470_v14 }
  0x11   :  { %441 = vmatpush3.bf16.msra.mxu1 %v471_v15  ;;  %420 = vmatprep.subr.bf16.mxu0 %v472_v16 }
  0x12   :  { %442 = vmatprep.subr.bf16.mxu1 %v473_v17  ;;  %322 = vmatprep.mubr.bf16.mxu0 %v24_v35 }
  0x14   :  { %421 = vmatpush3.bf16.msra.mxu0 %v474_v18 }
  0x15   :  { %443 = vmatpush3.bf16.msra.mxu1 %v475_v19  ;;  %422 = vmatprep.subr.bf16.mxu0 %v476_v20 }
  0x16   :  { %444 = vmatprep.subr.bf16.mxu1 %v477_v21 }
  0x18   :  { %423 = vmatpush3.bf16.msra.mxu0 %v478_v22 }
  0x19   :  { %445 = vmatpush3.bf16.msra.mxu1 %v479_v23  ;;  %424 = vmatprep.subr.bf16.mxu0 %v480_v24 }
  0x1a   :  { %446 = vmatprep.subr.bf16.mxu1 %v481_v25 }
  0x1c   :  { %425 = vmatpush3.bf16.msra.mxu0 %v482_v26 }
  0x1d   :  { %447 = vmatpush3.bf16.msra.mxu1 %v483_v27  ;;  %426 = vmatprep.subr.bf16.mxu0 %v484_v28 }
  0x1e   :  { %448 = vmatprep.subr.bf16.mxu1 %v485_v29 }
  0x20   :  { %427 = vmatpush3.bf16.msra.mxu0 %v486_v30 }
  0x21   :  { %449 = vmatpush3.bf16.msra.mxu1 %v487_v31 }
  0x23   :  { %323 = vmatmul.mubr.bf16.vlgmr.msra.gmra.mxu0 %v23_v40 }
  0x24   :  { %364 = vmatmul.mubr.bf16.vlgmr.msra.gmra.mxu1 %v25_v43 }
  0xe3   :  { %v428_v44 = vpop.f32.mrf.mxu0 }
  0xe4   :  { %v450_v45 = vpop.f32.mrf.mxu1 }
  0xe5   :  { %v429_v47 = vpop.f32.mrf.mxu0 }
  0xe6   :  { %v430_v48 = vadd.f32 %v429_v47, %v428_v44  ;;  %v451_v49 = vpop.f32.mrf.mxu1 }
  0xe7   :  { %v431_v50 = vpop.f32.mrf.mxu0  ;;  %v452_v52 = vadd.f32 %v451_v49, %v450_v45 }
  0xe8   :  { %v325_v51 = vadd.f32 %v430_v48, %v379_v46  ;;  %v453_v53 = vpop.f32.mrf.mxu1 }
  0xe9   :  { %v432_v54 = vpop.f32.mrf.mxu0 }
  0xea   :  { %v366_v55 = vadd.f32 %v452_v52, %v325_v51  ;;  %v433_v56 = vadd.f32 %v432_v54, %v431_v50  ;;  %v454_v57 = vpop.f32.mrf.mxu1 }
  0xeb   :  { %v455_v59 = vadd.f32 %v454_v57, %v453_v53 }
  0xec   :  { %373 = vst.msk [vmem:[%s640_s3] sm:$0xff] %vm372_vm0, %v366_v55  ;;  %v328_v58 = vadd.f32 %v433_v56, %v379_v46 }
  0xee   :  { %v369_v60 = vadd.f32 %v455_v59, %v328_v58 }
  0xf0   :  { %374 = vst.msk [vmem:[%s640_s3 + $0x8] sm:$0xff] %vm372_vm0, %v369_v60 }

// kernel: matching_model_forward.10
= control target key start
LH: loop header
LB: loop body
LE: loop exit
PB: predicated region body
PF: predicated region fallthrough
CT: control target
= control target key end

     0   :  { %v125_v0 = vmov 0.0   ;;  %vm126_vm0 = vmmov 0   ;;  %vm40_vm1 = vcmask 261120   ;;  %vm84_vm2 = vcmask 123904   ;;  %s165_s1 = inlined_call_operand.vmem [shape: bf16[32,16], index: 1, kind: input, shape index: {}]   ;;  %s166_s0 = inlined_call_operand.vmem [shape: f32[2,32], index: 0, kind: input, shape index: {}]   ;;  %s167_s2 = inlined_call_operand.vmem [shape: f32[1,16], index: 2, kind: input, shape index: {}]   ;;  %s168_s3 = inlined_call_operand.vmem [shape: f32[2,16], index: 3, kind: output, shape index: {}]  }
   0x1   :  { %111 = vmatprep.subr.bf16.mxu0 %v125_v0  ;;  %v121_v1 = vld [vmem:[%s165_s1 + $0x8] sm:$0xff]   ;;  %115 = vmatprep.mubr.msk.bf16.mxu0 %vm126_vm0, %v125_v0  ;;  %v122_v2 = vld [vmem:[%s165_s1] sm:$0xff]  }
   0x2   :  { %112 = vmatpush3.bf16.msra.mxu0 %v121_v1  ;;  %v15_v3 = vld [vmem:[%s166_s0] sm:$0x3] }
   0x3   :  { %113 = vmatprep.subr.bf16.mxu0 %v125_v0  ;;  %v16_v4 = vpack.c.bf16 %v15_v3, %v15_v3  ;;  %v104_v5 = vld [vmem:[%s167_s2] ss:$0 sm:$0xff] }
   0x6   :  { %114 = vmatpush3.bf16.msra.mxu0 %v122_v2 }
   0x9   :  { %116 = vmatmul.mubr.msk.bf16.vlgmr.msra.gmra.mxu0 %vm40_vm1, %v16_v4 }
  0xc9   :  { %v78_v6 = vpop.f32.mrf.mxu0 }
  0xca   :  { %v79_v7 = vadd.f32 %v104_v5, %v78_v6 }
  0xcb   :  { %v117_v8 = vpop.f32.mrf.mxu0 }
  0xcc   :  { %v85_v9 = vsel %vm84_vm2, %v79_v7, 0.0 }
  0xcd   :  { %86 = vadd.xlane.f32.xlu0 %v85_v9  ;;  %v81_v10 = vpop.f32.mrf.mxu0 }
  0xcf   :  { %v118_v11 = vpop.f32.mrf.mxu0 }
 0x156   :  { %v87_v12 = vpop.xlane.xlu0 %86 }
 0x157   :  { %v89_v13 = vmul.f32 0.0625, %v87_v12 }
 0x159   :  { %v90_v14 = vsub.f32 %v79_v7, %v89_v13 }
 0x15b   :  { %v91_v15 = vmul.f32 %v90_v14, %v90_v14 }
 0x15d   :  { %v92_v16 = vsel %vm84_vm2, %v91_v15, 0.0 }
 0x15e   :  { %93 = vadd.xlane.f32.xlu0 %v92_v16 }
 0x1e7   :  { %v94_v17 = vpop.xlane.xlu0 %93 }
 0x1e8   :  { %v95_v18 = vmul.f32 0.0625, %v94_v17 }
 0x1ea   :  { %v96_v19 = vadd.f32 1e-12, %v95_v18 }
 0x1ec   :  { %123 = vrsqrt.f32 %v96_v19 }
 0x1f9   :  { %v124_v20 = vpop.eup %123 }
 0x1fa   :  { %v98_v21 = vmul.f32 %v124_v20, %v90_v14 }
 0x1fc   :  { %99 = vst.msk [vmem:[%s168_s3] sm:$0x3] %vm84_vm2, %v98_v21 }

// kernel: matching_model_forward.8
= control target key start
LH: loop header
LB: loop body
LE: loop exit
PB: predicated region body
PF: predicated region fallthrough
CT: control target
= control target key end

     0   :  { %s5240_s1 = inlined_call_operand.vmem [shape: bf16[512,1536], index: 1, kind: input, shape index: {}]   ;;  %s5241_s0 = inlined_call_operand.vmem [shape: f32[16,512], index: 0, kind: input, shape index: {}]   ;;  %s5242_s2 = inlined_call_operand.vmem [shape: f32[1,1536], index: 2, kind: input, shape index: {}]   ;;  %s5243_s3 = inlined_call_operand.vmem [shape: f32[16,1536], index: 3, kind: output, shape index: {}]  }
   0x1   :  { %v3322_v0 = vld [vmem:[%s5240_s1 + $0x2a4] ss:$48 sps:$4 sm:$0xff]   ;;  %v3326_v2 = vld [vmem:[%s5240_s1 + $0x2a0] ss:$48 sps:$4 sm:$0xff]   ;;  %v15_v46 = vld [vmem:[%s5241_s0 + $0x8] sm:$0xff] }
   0x2   :  { %v3324_v1 = vld [vmem:[%s5240_s1 + $0x8a4] ss:$48 sps:$4 sm:$0xff]   ;;  %2394 = vmatprep.subr.bf16.mxu0 %v3322_v0  ;;  %v3327_v3 = vld [vmem:[%s5240_s1 + $0x8a0] ss:$48 sps:$4 sm:$0xff]   ;;  %v19_v47 = vld [vmem:[%s5241_s0 + $0x28] sm:$0xff] }
   0x3   :  { %2437 = vmatprep.subr.bf16.mxu1 %v3324_v1  ;;  %v3328_v4 = vld [vmem:[%s5240_s1 + $0x244] ss:$48 sps:$4 sm:$0xff]   ;;  %2395 = vmatpush1.bf16.msra.mxu0 %v3326_v2  ;;  %v3332_v6 = vld [vmem:[%s5240_s1 + $0x240] ss:$48 sps:$4 sm:$0xff]   ;;  %v17_v48 = vld [vmem:[%s5241_s0 + $0x18] sm:$0xff]  ;;  %v4077_v53 = vpack.c.bf16 %v19_v47, %v15_v46 }
   0x4   :  { %2438 = vmatpush1.bf16.msra.mxu1 %v3327_v3  ;;  %v3330_v5 = vld [vmem:[%s5240_s1 + $0x844] ss:$48 sps:$4 sm:$0xff]   ;;  %2396 = vmatprep.subr.bf16.mxu0 %v3328_v4  ;;  %v3333_v7 = vld [vmem:[%s5240_s1 + $0x840] ss:$48 sps:$4 sm:$0xff]   ;;  %v21_v49 = vld [vmem:[%s5241_s0 + $0x38] sm:$0xff] }
   0x5   :  { %2439 = vmatprep.subr.bf16.mxu1 %v3330_v5  ;;  %v3334_v8 = vld [vmem:[%s5240_s1 + $0x1e4] ss:$48 sps:$4 sm:$0xff]   ;;  %v3338_v10 = vld [vmem:[%s5240_s1 + $0x1e0] ss:$48 sps:$4 sm:$0xff]   ;;  %v4079_v54 = vpack.c.bf16 %v21_v49, %v17_v48  ;;  %2426 = vmatprep.mubr.bf16.mxu0 %v4077_v53  ;;  %v3466_v46 = vld [vmem:[%s5240_s1 + $0x5a8] ss:$48 sps:$4 sm:$0xff]  }
   0x6   :  { %v3336_v9 = vld [vmem:[%s5240_s1 + $0x7e4] ss:$48 sps:$4 sm:$0xff]   ;;  %v3339_v11 = vld [vmem:[%s5240_s1 + $0x7e0] ss:$48 sps:$4 sm:$0xff]   ;;  %v3469_v47 = vld [vmem:[%s5240_s1 + $0xba8] ss:$48 sps:$4 sm:$0xff]  }
   0x7   :  { %2397 = vmatpush1.bf16.msra.mxu0 %v3332_v6  ;;  %v3340_v12 = vld [vmem:[%s5240_s1 + $0x184] ss:$48 sps:$4 sm:$0xff]   ;;  %v3344_v14 = vld [vmem:[%s5240_s1 + $0x180] ss:$48 sps:$4 sm:$0xff]   ;;  %2469 = vmatprep.mubr.bf16.mxu1 %v4079_v54  ;;  %v3474_v48 = vld [vmem:[%s5240_s1 + $0x54c] ss:$48 sps:$4 sm:$0xff]  }
   0x8   :  { %2440 = vmatpush1.bf16.msra.mxu1 %v3333_v7  ;;  %2398 = vmatprep.subr.bf16.mxu0 %v3334_v8  ;;  %v3342_v13 = vld [vmem:[%s5240_s1 + $0x784] ss:$48 sps:$4 sm:$0xff]   ;;  %v3345_v15 = vld [vmem:[%s5240_s1 + $0x780] ss:$48 sps:$4 sm:$0xff]   ;;  %v3477_v49 = vld [vmem:[%s5240_s1 + $0xb4c] ss:$48 sps:$4 sm:$0xff]  }
   0x9   :  { %2441 = vmatprep.subr.bf16.mxu1 %v3336_v9  ;;  %v3346_v16 = vld [vmem:[%s5240_s1 + $0x124] ss:$48 sps:$4 sm:$0xff]   ;;  %v3350_v18 = vld [vmem:[%s5240_s1 + $0x120] ss:$48 sps:$4 sm:$0xff]  }
   0xa   :  { %v3348_v17 = vld [vmem:[%s5240_s1 + $0x724] ss:$48 sps:$4 sm:$0xff]   ;;  %v3351_v19 = vld [vmem:[%s5240_s1 + $0x720] ss:$48 sps:$4 sm:$0xff]  }
   0xb   :  { %2399 = vmatpush1.bf16.msra.mxu0 %v3338_v10  ;;  %v3352_v20 = vld [vmem:[%s5240_s1 + $0xc4] ss:$48 sps:$4 sm:$0xff]   ;;  %v3356_v22 = vld [vmem:[%s5240_s1 + $0xc0] ss:$48 sps:$4 sm:$0xff]   ;;  %v3420_v10 = vld [vmem:[%s5240_s1 + $0x2ac] ss:$48 sps:$4 sm:$0xff]  }
   0xc   :  { %2442 = vmatpush1.bf16.msra.mxu1 %v3339_v11  ;;  %2400 = vmatprep.subr.bf16.mxu0 %v3340_v12  ;;  %v3354_v21 = vld [vmem:[%s5240_s1 + $0x6c4] ss:$48 sps:$4 sm:$0xff]   ;;  %v3357_v23 = vld [vmem:[%s5240_s1 + $0x6c0] ss:$48 sps:$4 sm:$0xff]   ;;  %v3423_v11 = vld [vmem:[%s5240_s1 + $0x8ac] ss:$48 sps:$4 sm:$0xff]  }
   0xd   :  { %2443 = vmatprep.subr.bf16.mxu1 %v3342_v13  ;;  %v3358_v24 = vld [vmem:[%s5240_s1 + $0x64] ss:$48 sps:$4 sm:$0xff]   ;;  %v3362_v26 = vld [vmem:[%s5240_s1 + $0x60] ss:$48 sps:$4 sm:$0xff]  }
   0xe   :  { %v3360_v25 = vld [vmem:[%s5240_s1 + $0x664] ss:$48 sps:$4 sm:$0xff]   ;;  %v3363_v27 = vld [vmem:[%s5240_s1 + $0x660] ss:$48 sps:$4 sm:$0xff]  }
   0xf   :  { %2401 = vmatpush1.bf16.msra.mxu0 %v3344_v14  ;;  %v3364_v28 = vld [vmem:[%s5240_s1 + $0x4] ss:$48 sps:$4 sm:$0xff]   ;;  %v3368_v30 = vld [vmem:[%s5240_s1] ss:$48 sps:$4 sm:$0xff]   ;;  %v3418_v14 = vld [vmem:[%s5240_s1 + $0x2a8] ss:$48 sps:$4 sm:$0xff]  }
  0x10   :  { %2444 = vmatpush1.bf16.msra.mxu1 %v3345_v15  ;;  %2402 = vmatprep.subr.bf16.mxu0 %v3346_v16  ;;  %v3366_v29 = vld [vmem:[%s5240_s1 + $0x604] ss:$48 sps:$4 sm:$0xff]   ;;  %v3369_v31 = vld [vmem:[%s5240_s1 + $0x600] ss:$48 sps:$4 sm:$0xff]   ;;  %v3421_v15 = vld [vmem:[%s5240_s1 + $0x8a8] ss:$48 sps:$4 sm:$0xff]  }
  0x11   :  { %2445 = vmatprep.subr.bf16.mxu1 %v3348_v17  ;;  %v3370_v32 = vld [vmem:[%s5240_s1 + $0x5a4] ss:$48 sps:$4 sm:$0xff]   ;;  %v3374_v34 = vld [vmem:[%s5240_s1 + $0x5a0] ss:$48 sps:$4 sm:$0xff]   ;;  %v3426_v16 = vld [vmem:[%s5240_s1 + $0x24c] ss:$48 sps:$4 sm:$0xff]  }
  0x12   :  { %v3372_v33 = vld [vmem:[%s5240_s1 + $0xba4] ss:$48 sps:$4 sm:$0xff]   ;;  %v3375_v35 = vld [vmem:[%s5240_s1 + $0xba0] ss:$48 sps:$4 sm:$0xff]   ;;  %v3429_v17 = vld [vmem:[%s5240_s1 + $0x84c] ss:$48 sps:$4 sm:$0xff]  }
  0x13   :  { %2403 = vmatpush1.bf16.msra.mxu0 %v3350_v18  ;;  %v3376_v36 = vld [vmem:[%s5240_s1 + $0x544] ss:$48 sps:$4 sm:$0xff]   ;;  %v3380_v38 = vld [vmem:[%s5240_s1 + $0x540] ss:$48 sps:$4 sm:$0xff]   ;;  %v3424_v18 = vld [vmem:[%s5240_s1 + $0x248] ss:$48 sps:$4 sm:$0xff]  }
  0x14   :  { %2446 = vmatpush1.bf16.msra.mxu1 %v3351_v19  ;;  %2404 = vmatprep.subr.bf16.mxu0 %v3352_v20  ;;  %v3378_v37 = vld [vmem:[%s5240_s1 + $0xb44] ss:$48 sps:$4 sm:$0xff]   ;;  %v3381_v39 = vld [vmem:[%s5240_s1 + $0xb40] ss:$48 sps:$4 sm:$0xff]   ;;  %v3427_v19 = vld [vmem:[%s5240_s1 + $0x848] ss:$48 sps:$4 sm:$0xff]  }
  0x15   :  { %2447 = vmatprep.subr.bf16.mxu1 %v3354_v21  ;;  %v3382_v40 = vld [vmem:[%s5240_s1 + $0x4e4] ss:$48 sps:$4 sm:$0xff]   ;;  %v3386_v42 = vld [vmem:[%s5240_s1 + $0x4e0] ss:$48 sps:$4 sm:$0xff]   ;;  %v3432_v20 = vld [vmem:[%s5240_s1 + $0x1ec] ss:$48 sps:$4 sm:$0xff]  }
  0x16   :  { %v3384_v41 = vld [vmem:[%s5240_s1 + $0xae4] ss:$48 sps:$4 sm:$0xff]   ;;  %v3387_v43 = vld [vmem:[%s5240_s1 + $0xae0] ss:$48 sps:$4 sm:$0xff]   ;;  %v3435_v21 = vld [vmem:[%s5240_s1 + $0x7ec] ss:$48 sps:$4 sm:$0xff]  }
  0x17   :  { %2405 = vmatpush1.bf16.msra.mxu0 %v3356_v22  ;;  %v3388_v44 = vld [vmem:[%s5240_s1 + $0x484] ss:$48 sps:$4 sm:$0xff]   ;;  %v3392_v50 = vld [vmem:[%s5240_s1 + $0x480] ss:$48 sps:$4 sm:$0xff]   ;;  %v3430_v22 = vld [vmem:[%s5240_s1 + $0x1e8] ss:$48 sps:$4 sm:$0xff]  }
  0x18   :  { %2448 = vmatpush1.bf16.msra.mxu1 %v3357_v23  ;;  %2406 = vmatprep.subr.bf16.mxu0 %v3358_v24  ;;  %v3390_v45 = vld [vmem:[%s5240_s1 + $0xa84] ss:$48 sps:$4 sm:$0xff]   ;;  %v3393_v51 = vld [vmem:[%s5240_s1 + $0xa80] ss:$48 sps:$4 sm:$0xff]   ;;  %v3433_v23 = vld [vmem:[%s5240_s1 + $0x7e8] ss:$48 sps:$4 sm:$0xff]  }
  0x19   :  { %2449 = vmatprep.subr.bf16.mxu1 %v3360_v25  ;;  %v3394_v52 = vld [vmem:[%s5240_s1 + $0x424] ss:$48 sps:$4 sm:$0xff]   ;;  %v3398_v56 = vld [vmem:[%s5240_s1 + $0x420] ss:$48 sps:$4 sm:$0xff]   ;;  %v3438_v24 = vld [vmem:[%s5240_s1 + $0x18c] ss:$48 sps:$4 sm:$0xff]  }
  0x1a   :  { %v3396_v55 = vld [vmem:[%s5240_s1 + $0xa24] ss:$48 sps:$4 sm:$0xff]   ;;  %v3399_v57 = vld [vmem:[%s5240_s1 + $0xa20] ss:$48 sps:$4 sm:$0xff]   ;;  %v3441_v25 = vld [vmem:[%s5240_s1 + $0x78c] ss:$48 sps:$4 sm:$0xff]  }
  0x1b   :  { %2407 = vmatpush1.bf16.msra.mxu0 %v3362_v26  ;;  %v3400_v58 = vld [vmem:[%s5240_s1 + $0x3c4] ss:$48 sps:$4 sm:$0xff]   ;;  %v3404_v60 = vld [vmem:[%s5240_s1 + $0x3c0] ss:$48 sps:$4 sm:$0xff]   ;;  %v3436_v26 = vld [vmem:[%s5240_s1 + $0x188] ss:$48 sps:$4 sm:$0xff]  }
  0x1c   :  { %2450 = vmatpush1.bf16.msra.mxu1 %v3363_v27  ;;  %2408 = vmatprep.subr.bf16.mxu0 %v3364_v28  ;;  %v3402_v59 = vld [vmem:[%s5240_s1 + $0x9c4] ss:$48 sps:$4 sm:$0xff]   ;;  %v3405_v61 = vld [vmem:[%s5240_s1 + $0x9c0] ss:$48 sps:$4 sm:$0xff]   ;;  %v3439_v27 = vld [vmem:[%s5240_s1 + $0x788] ss:$48 sps:$4 sm:$0xff]  }
  0x1d   :  { %2451 = vmatprep.subr.bf16.mxu1 %v3366_v29  ;;  %v3406_v62 = vld [vmem:[%s5240_s1 + $0x364] ss:$48 sps:$4 sm:$0xff]   ;;  %v3410_v0 = vld [vmem:[%s5240_s1 + $0x360] ss:$48 sps:$4 sm:$0xff]   ;;  %v3444_v28 = vld [vmem:[%s5240_s1 + $0x12c] ss:$48 sps:$4 sm:$0xff]  }
  0x1e   :  { %v3408_v63 = vld [vmem:[%s5240_s1 + $0x964] ss:$48 sps:$4 sm:$0xff]   ;;  %v3411_v1 = vld [vmem:[%s5240_s1 + $0x960] ss:$48 sps:$4 sm:$0xff]   ;;  %v3447_v29 = vld [vmem:[%s5240_s1 + $0x72c] ss:$48 sps:$4 sm:$0xff]  }
  0x1f   :  { %2409 = vmatpush1.bf16.msra.mxu0 %v3368_v30  ;;  %v3412_v2 = vld [vmem:[%s5240_s1 + $0x304] ss:$48 sps:$4 sm:$0xff]   ;;  %v3416_v4 = vld [vmem:[%s5240_s1 + $0x300] ss:$48 sps:$4 sm:$0xff]   ;;  %v3442_v30 = vld [vmem:[%s5240_s1 + $0x128] ss:$48 sps:$4 sm:$0xff]  }
  0x20   :  { %2452 = vmatpush1.bf16.msra.mxu1 %v3369_v31  ;;  %2410 = vmatprep.subr.bf16.mxu0 %v3370_v32  ;;  %v3414_v3 = vld [vmem:[%s5240_s1 + $0x904] ss:$48 sps:$4 sm:$0xff]   ;;  %v3417_v5 = vld [vmem:[%s5240_s1 + $0x900] ss:$48 sps:$4 sm:$0xff]   ;;  %v3445_v31 = vld [vmem:[%s5240_s1 + $0x728] ss:$48 sps:$4 sm:$0xff]  }
  0x21   :  { %2453 = vmatprep.subr.bf16.mxu1 %v3372_v33  ;;  %v14_v6 = vld [vmem:[%s5241_s0] sm:$0xff]  ;;  %v16_v8 = vld [vmem:[%s5241_s0 + $0x10] sm:$0xff]  ;;  %v3450_v32 = vld [vmem:[%s5240_s1 + $0xcc] ss:$48 sps:$4 sm:$0xff]  }
  0x22   :  { %v18_v7 = vld [vmem:[%s5241_s0 + $0x20] sm:$0xff]  ;;  %v20_v9 = vld [vmem:[%s5241_s0 + $0x30] sm:$0xff]  ;;  %v3453_v33 = vld [vmem:[%s5240_s1 + $0x6cc] ss:$48 sps:$4 sm:$0xff]  }
  0x23   :  { %2411 = vmatpush2.bf16.msra.mxu0 %v3374_v34  ;;  %v4146_v12 = vpack.c.bf16 %v18_v7, %v14_v6  ;;  %v4148_v13 = vpack.c.bf16 %v20_v9, %v16_v8  ;;  %v3448_v34 = vld [vmem:[%s5240_s1 + $0xc8] ss:$48 sps:$4 sm:$0xff]   ;;  %v3504_v6 = vld [vmem:[%s5240_s1 + $0x36c] ss:$48 sps:$4 sm:$0xff]  }
  0x24   :  { %2454 = vmatpush2.bf16.msra.mxu1 %v3375_v35  ;;  %2412 = vmatprep.subr.bf16.mxu0 %v3376_v36  ;;  %v3451_v35 = vld [vmem:[%s5240_s1 + $0x6c8] ss:$48 sps:$4 sm:$0xff]   ;;  %v3456_v36 = vld [vmem:[%s5240_s1 + $0x6c] ss:$48 sps:$4 sm:$0xff]  }
  0x25   :  { %2455 = vmatprep.subr.bf16.mxu1 %v3378_v37  ;;  %v3459_v37 = vld [vmem:[%s5240_s1 + $0x66c] ss:$48 sps:$4 sm:$0xff]   ;;  %v3502_v8 = vld [vmem:[%s5240_s1 + $0x368] ss:$48 sps:$4 sm:$0xff]  }
  0x26   :  { %v3507_v7 = vld [vmem:[%s5240_s1 + $0x96c] ss:$48 sps:$4 sm:$0xff]   ;;  %v3505_v9 = vld [vmem:[%s5240_s1 + $0x968] ss:$48 sps:$4 sm:$0xff]  }
  0x27   :  { %2413 = vmatpush2.bf16.msra.mxu0 %v3380_v38  ;;  %v3454_v38 = vld [vmem:[%s5240_s1 + $0x68] ss:$48 sps:$4 sm:$0xff]  }
  0x28   :  { %2456 = vmatpush2.bf16.msra.mxu1 %v3381_v39  ;;  %2414 = vmatprep.subr.bf16.mxu0 %v3382_v40  ;;  %v3457_v39 = vld [vmem:[%s5240_s1 + $0x668] ss:$48 sps:$4 sm:$0xff]   ;;  %v3462_v40 = vld [vmem:[%s5240_s1 + $0xc] ss:$48 sps:$4 sm:$0xff]  }
  0x29   :  { %2457 = vmatprep.subr.bf16.mxu1 %v3384_v41  ;;  %v3465_v41 = vld [vmem:[%s5240_s1 + $0x60c] ss:$48 sps:$4 sm:$0xff]  }
  0x2b   :  { %2415 = vmatpush2.bf16.msra.mxu0 %v3386_v42  ;;  %v3460_v42 = vld [vmem:[%s5240_s1 + $0x8] ss:$48 sps:$4 sm:$0xff]  }
  0x2c   :  { %2458 = vmatpush2.bf16.msra.mxu1 %v3387_v43  ;;  %2416 = vmatprep.subr.bf16.mxu0 %v3388_v44  ;;  %v3463_v43 = vld [vmem:[%s5240_s1 + $0x608] ss:$48 sps:$4 sm:$0xff]   ;;  %v3468_v44 = vld [vmem:[%s5240_s1 + $0x5ac] ss:$48 sps:$4 sm:$0xff]  }
  0x2d   :  { %2459 = vmatprep.subr.bf16.mxu1 %v3390_v45  ;;  %v3471_v45 = vld [vmem:[%s5240_s1 + $0xbac] ss:$48 sps:$4 sm:$0xff]  }
  0x2f   :  { %2417 = vmatpush2.bf16.msra.mxu0 %v3392_v50  ;;  %v3472_v50 = vld [vmem:[%s5240_s1 + $0x548] ss:$48 sps:$4 sm:$0xff]  }
  0x30   :  { %2460 = vmatpush2.bf16.msra.mxu1 %v3393_v51  ;;  %2418 = vmatprep.subr.bf16.mxu0 %v3394_v52  ;;  %v3475_v51 = vld [vmem:[%s5240_s1 + $0xb48] ss:$48 sps:$4 sm:$0xff]   ;;  %v3480_v52 = vld [vmem:[%s5240_s1 + $0x4ec] ss:$48 sps:$4 sm:$0xff]  }
  0x31   :  { %2461 = vmatprep.subr.bf16.mxu1 %v3396_v55  ;;  %v3483_v55 = vld [vmem:[%s5240_s1 + $0xaec] ss:$48 sps:$4 sm:$0xff]  }
  0x33   :  { %2419 = vmatpush2.bf16.msra.mxu0 %v3398_v56  ;;  %v3478_v56 = vld [vmem:[%s5240_s1 + $0x4e8] ss:$48 sps:$4 sm:$0xff]  }
  0x34   :  { %2462 = vmatpush2.bf16.msra.mxu1 %v3399_v57  ;;  %2420 = vmatprep.subr.bf16.mxu0 %v3400_v58  ;;  %v3481_v57 = vld [vmem:[%s5240_s1 + $0xae8] ss:$48 sps:$4 sm:$0xff]   ;;  %v3486_v58 = vld [vmem:[%s5240_s1 + $0x48c] ss:$48 sps:$4 sm:$0xff]  }
  0x35   :  { %2463 = vmatprep.subr.bf16.mxu1 %v3402_v59  ;;  %v3489_v59 = vld [vmem:[%s5240_s1 + $0xa8c] ss:$48 sps:$4 sm:$0xff]  }
  0x37   :  { %2421 = vmatpush2.bf16.msra.mxu0 %v3404_v60  ;;  %v3484_v60 = vld [vmem:[%s5240_s1 + $0x488] ss:$48 sps:$4 sm:$0xff]  }
  0x38   :  { %2464 = vmatpush2.bf16.msra.mxu1 %v3405_v61  ;;  %2422 = vmatprep.subr.bf16.mxu0 %v3406_v62  ;;  %v3487_v61 = vld [vmem:[%s5240_s1 + $0xa88] ss:$48 sps:$4 sm:$0xff]   ;;  %v3492_v62 = vld [vmem:[%s5240_s1 + $0x42c] ss:$48 sps:$4 sm:$0xff]  }
  0x39   :  { %2465 = vmatprep.subr.bf16.mxu1 %v3408_v63  ;;  %v3495_v63 = vld [vmem:[%s5240_s1 + $0xa2c] ss:$48 sps:$4 sm:$0xff]  }
  0x3b   :  { %2423 = vmatpush2.bf16.msra.mxu0 %v3410_v0  ;;  %v3490_v0 = vld [vmem:[%s5240_s1 + $0x428] ss:$48 sps:$4 sm:$0xff]  }
  0x3c   :  { %2466 = vmatpush2.bf16.msra.mxu1 %v3411_v1  ;;  %2424 = vmatprep.subr.bf16.mxu0 %v3412_v2  ;;  %v3493_v1 = vld [vmem:[%s5240_s1 + $0xa28] ss:$48 sps:$4 sm:$0xff]   ;;  %v3498_v2 = vld [vmem:[%s5240_s1 + $0x3cc] ss:$48 sps:$4 sm:$0xff]  }
  0x3d   :  { %2467 = vmatprep.subr.bf16.mxu1 %v3414_v3  ;;  %v3501_v3 = vld [vmem:[%s5240_s1 + $0x9cc] ss:$48 sps:$4 sm:$0xff]  }
  0x3f   :  { %2425 = vmatpush2.bf16.msra.mxu0 %v3416_v4  ;;  %v3496_v4 = vld [vmem:[%s5240_s1 + $0x3c8] ss:$48 sps:$4 sm:$0xff]  }
  0x40   :  { %2468 = vmatpush2.bf16.msra.mxu1 %v3417_v5  ;;  %2480 = vmatprep.subr.bf16.mxu0 %v3420_v10  ;;  %v3499_v5 = vld [vmem:[%s5240_s1 + $0x9c8] ss:$48 sps:$4 sm:$0xff]   ;;  %v3510_v10 = vld [vmem:[%s5240_s1 + $0x30c] ss:$48 sps:$4 sm:$0xff]  }
  0x41   :  { %2523 = vmatprep.subr.bf16.mxu1 %v3423_v11  ;;  %v3513_v11 = vld [vmem:[%s5240_s1 + $0x90c] ss:$48 sps:$4 sm:$0xff]  }
  0x42   :  { %2427 = vmatmul.mubr.bf16.vlgmr.msra.gmra.mxu0 %v4146_v12 }
  0x43   :  { %2470 = vmatmul.mubr.bf16.vlgmr.msra.gmra.mxu1 %v4148_v13  ;;  %2481 = vmatpush1.bf16.msra.mxu0 %v3418_v14  ;;  %v3508_v14 = vld [vmem:[%s5240_s1 + $0x308] ss:$48 sps:$4 sm:$0xff]  }
  0x44   :  { %2524 = vmatpush1.bf16.msra.mxu1 %v3421_v15  ;;  %2482 = vmatprep.subr.bf16.mxu0 %v3426_v16  ;;  %v3511_v15 = vld [vmem:[%s5240_s1 + $0x908] ss:$48 sps:$4 sm:$0xff]   ;;  %v3516_v16 = vld [vmem:[%s5240_s1 + $0x2b4] ss:$48 sps:$4 sm:$0xff]  }
  0x45   :  { %2525 = vmatprep.subr.bf16.mxu1 %v3429_v17  ;;  %2512 = vmatprep.mubr.bf16.mxu0 %v4077_v53  ;;  %v3519_v17 = vld [vmem:[%s5240_s1 + $0x8b4] ss:$48 sps:$4 sm:$0xff]  }
  0x46   :  { %2555 = vmatprep.mubr.bf16.mxu1 %v4079_v54 }
  0x47   :  { %2483 = vmatpush1.bf16.msra.mxu0 %v3424_v18  ;;  %v3514_v18 = vld [vmem:[%s5240_s1 + $0x2b0] ss:$48 sps:$4 sm:$0xff]  }
  0x48   :  { %2526 = vmatpush1.bf16.msra.mxu1 %v3427_v19  ;;  %2484 = vmatprep.subr.bf16.mxu0 %v3432_v20  ;;  %v3517_v19 = vld [vmem:[%s5240_s1 + $0x8b0] ss:$48 sps:$4 sm:$0xff]   ;;  %v3522_v20 = vld [vmem:[%s5240_s1 + $0x254] ss:$48 sps:$4 sm:$0xff]  }
  0x49   :  { %2527 = vmatprep.subr.bf16.mxu1 %v3435_v21  ;;  %v3525_v21 = vld [vmem:[%s5240_s1 + $0x854] ss:$48 sps:$4 sm:$0xff]  }
  0x4b   :  { %2485 = vmatpush1.bf16.msra.mxu0 %v3430_v22  ;;  %v3520_v22 = vld [vmem:[%s5240_s1 + $0x250] ss:$48 sps:$4 sm:$0xff]  }
  0x4c   :  { %2528 = vmatpush1.bf16.msra.mxu1 %v3433_v23  ;;  %2486 = vmatprep.subr.bf16.mxu0 %v3438_v24  ;;  %v3523_v23 = vld [vmem:[%s5240_s1 + $0x850] ss:$48 sps:$4 sm:$0xff]   ;;  %v3528_v24 = vld [vmem:[%s5240_s1 + $0x1f4] ss:$48 sps:$4 sm:$0xff]  }
  0x4d   :  { %2529 = vmatprep.subr.bf16.mxu1 %v3441_v25  ;;  %v3531_v25 = vld [vmem:[%s5240_s1 + $0x7f4] ss:$48 sps:$4 sm:$0xff]  }
  0x4f   :  { %2487 = vmatpush1.bf16.msra.mxu0 %v3436_v26  ;;  %v3526_v26 = vld [vmem:[%s5240_s1 + $0x1f0] ss:$48 sps:$4 sm:$0xff]  }
  0x50   :  { %2530 = vmatpush1.bf16.msra.mxu1 %v3439_v27  ;;  %2488 = vmatprep.subr.bf16.mxu0 %v3444_v28  ;;  %v3529_v27 = vld [vmem:[%s5240_s1 + $0x7f0] ss:$48 sps:$4 sm:$0xff]   ;;  %v3534_v28 = vld [vmem:[%s5240_s1 + $0x194] ss:$48 sps:$4 sm:$0xff]  }
  0x51   :  { %2531 = vmatprep.subr.bf16.mxu1 %v3447_v29  ;;  %v3537_v29 = vld [vmem:[%s5240_s1 + $0x794] ss:$48 sps:$4 sm:$0xff]  }
  0x53   :  { %2489 = vmatpush1.bf16.msra.mxu0 %v3442_v30  ;;  %v3532_v30 = vld [vmem:[%s5240_s1 + $0x190] ss:$48 sps:$4 sm:$0xff]  }
  0x54   :  { %2532 = vmatpush1.bf16.msra.mxu1 %v3445_v31  ;;  %2490 = vmatprep.subr.bf16.mxu0 %v3450_v32  ;;  %v3535_v31 = vld [vmem:[%s5240_s1 + $0x790] ss:$48 sps:$4 sm:$0xff]   ;;  %v3540_v32 = vld [vmem:[%s5240_s1 + $0x134] ss:$48 sps:$4 sm:$0xff]  }
  0x55   :  { %2533 = vmatprep.subr.bf16.mxu1 %v3453_v33  ;;  %v3543_v33 = vld [vmem:[%s5240_s1 + $0x734] ss:$48 sps:$4 sm:$0xff]  }
  0x57   :  { %2491 = vmatpush1.bf16.msra.mxu0 %v3448_v34  ;;  %v3538_v34 = vld [vmem:[%s5240_s1 + $0x130] ss:$48 sps:$4 sm:$0xff]  }
  0x58   :  { %2534 = vmatpush1.bf16.msra.mxu1 %v3451_v35  ;;  %2492 = vmatprep.subr.bf16.mxu0 %v3456_v36  ;;  %v3541_v35 = vld [vmem:[%s5240_s1 + $0x730] ss:$48 sps:$4 sm:$0xff]   ;;  %v3546_v36 = vld [vmem:[%s5240_s1 + $0xd4] ss:$48 sps:$4 sm:$0xff]  }
  0x59   :  { %2535 = vmatprep.subr.bf16.mxu1 %v3459_v37  ;;  %v3549_v37 = vld [vmem:[%s5240_s1 + $0x6d4] ss:$48 sps:$4 sm:$0xff]  }
  0x5b   :  { %2493 = vmatpush1.bf16.msra.mxu0 %v3454_v38  ;;  %v3544_v38 = vld [vmem:[%s5240_s1 + $0xd0] ss:$48 sps:$4 sm:$0xff]  }
  0x5c   :  { %2536 = vmatpush1.bf16.msra.mxu1 %v3457_v39  ;;  %2494 = vmatprep.subr.bf16.mxu0 %v3462_v40  ;;  %v3547_v39 = vld [vmem:[%s5240_s1 + $0x6d0] ss:$48 sps:$4 sm:$0xff]   ;;  %v3552_v40 = vld [vmem:[%s5240_s1 + $0x74] ss:$48 sps:$4 sm:$0xff]  }
  0x5d   :  { %2537 = vmatprep.subr.bf16.mxu1 %v3465_v41  ;;  %v3555_v41 = vld [vmem:[%s5240_s1 + $0x674] ss:$48 sps:$4 sm:$0xff]  }
  0x5f   :  { %2495 = vmatpush1.bf16.msra.mxu0 %v3460_v42  ;;  %v3550_v42 = vld [vmem:[%s5240_s1 + $0x70] ss:$48 sps:$4 sm:$0xff]  }
  0x60   :  { %2538 = vmatpush1.bf16.msra.mxu1 %v3463_v43  ;;  %2496 = vmatprep.subr.bf16.mxu0 %v3468_v44  ;;  %v3553_v43 = vld [vmem:[%s5240_s1 + $0x670] ss:$48 sps:$4 sm:$0xff]   ;;  %v3558_v44 = vld [vmem:[%s5240_s1 + $0x14] ss:$48 sps:$4 sm:$0xff]  }
  0x61   :  { %2539 = vmatprep.subr.bf16.mxu1 %v3471_v45  ;;  %v3561_v45 = vld [vmem:[%s5240_s1 + $0x614] ss:$48 sps:$4 sm:$0xff]  }
  0x63   :  { %2497 = vmatpush2.bf16.msra.mxu0 %v3466_v46  ;;  %v3556_v46 = vld [vmem:[%s5240_s1 + $0x10] ss:$48 sps:$4 sm:$0xff]  }
  0x64   :  { %2540 = vmatpush2.bf16.msra.mxu1 %v3469_v47  ;;  %2498 = vmatprep.subr.bf16.mxu0 %v3474_v48  ;;  %v3559_v47 = vld [vmem:[%s5240_s1 + $0x610] ss:$48 sps:$4 sm:$0xff]   ;;  %v3564_v48 = vld [vmem:[%s5240_s1 + $0x5b4] ss:$48 sps:$4 sm:$0xff]  }
  0x65   :  { %2541 = vmatprep.subr.bf16.mxu1 %v3477_v49  ;;  %v3567_v49 = vld [vmem:[%s5240_s1 + $0xbb4] ss:$48 sps:$4 sm:$0xff]  }
  0x67   :  { %2499 = vmatpush2.bf16.msra.mxu0 %v3472_v50  ;;  %v3562_v50 = vld [vmem:[%s5240_s1 + $0x5b0] ss:$48 sps:$4 sm:$0xff]  }
  0x68   :  { %2542 = vmatpush2.bf16.msra.mxu1 %v3475_v51  ;;  %2500 = vmatprep.subr.bf16.mxu0 %v3480_v52  ;;  %v3565_v51 = vld [vmem:[%s5240_s1 + $0xbb0] ss:$48 sps:$4 sm:$0xff]   ;;  %v3570_v52 = vld [vmem:[%s5240_s1 + $0x554] ss:$48 sps:$4 sm:$0xff]  }
  0x69   :  { %2543 = vmatprep.subr.bf16.mxu1 %v3483_v55  ;;  %v3573_v55 = vld [vmem:[%s5240_s1 + $0xb54] ss:$48 sps:$4 sm:$0xff]  }
  0x6b   :  { %2501 = vmatpush2.bf16.msra.mxu0 %v3478_v56  ;;  %v3568_v56 = vld [vmem:[%s5240_s1 + $0x550] ss:$48 sps:$4 sm:$0xff]  }
  0x6c   :  { %2544 = vmatpush2.bf16.msra.mxu1 %v3481_v57  ;;  %2502 = vmatprep.subr.bf16.mxu0 %v3486_v58  ;;  %v3571_v57 = vld [vmem:[%s5240_s1 + $0xb50] ss:$48 sps:$4 sm:$0xff]   ;;  %v3576_v58 = vld [vmem:[%s5240_s1 + $0x4f4] ss:$48 sps:$4 sm:$0xff]  }
  0x6d   :  { %2545 = vmatprep.subr.bf16.mxu1 %v3489_v59  ;;  %v3579_v59 = vld [vmem:[%s5240_s1 + $0xaf4] ss:$48 sps:$4 sm:$0xff]  }
  0x6f   :  { %2503 = vmatpush2.bf16.msra.mxu0 %v3484_v60  ;;  %v3574_v60 = vld [vmem:[%s5240_s1 + $0x4f0] ss:$48 sps:$4 sm:$0xff]  }
  0x70   :  { %2546 = vmatpush2.bf16.msra.mxu1 %v3487_v61  ;;  %2504 = vmatprep.subr.bf16.mxu0 %v3492_v62  ;;  %v3577_v61 = vld [vmem:[%s5240_s1 + $0xaf0] ss:$48 sps:$4 sm:$0xff]   ;;  %v3582_v62 = vld [vmem:[%s5240_s1 + $0x494] ss:$48 sps:$4 sm:$0xff]  }
  0x71   :  { %2547 = vmatprep.subr.bf16.mxu1 %v3495_v63  ;;  %v3585_v63 = vld [vmem:[%s5240_s1 + $0xa94] ss:$48 sps:$4 sm:$0xff]  }
  0x73   :  { %2505 = vmatpush2.bf16.msra.mxu0 %v3490_v0  ;;  %v3580_v0 = vld [vmem:[%s5240_s1 + $0x490] ss:$48 sps:$4 sm:$0xff]  }
  0x74   :  { %2548 = vmatpush2.bf16.msra.mxu1 %v3493_v1  ;;  %2506 = vmatprep.subr.bf16.mxu0 %v3498_v2  ;;  %v3583_v1 = vld [vmem:[%s5240_s1 + $0xa90] ss:$48 sps:$4 sm:$0xff]   ;;  %v3588_v2 = vld [vmem:[%s5240_s1 + $0x434] ss:$48 sps:$4 sm:$0xff]  }
  0x75   :  { %2549 = vmatprep.subr.bf16.mxu1 %v3501_v3  ;;  %v3591_v3 = vld [vmem:[%s5240_s1 + $0xa34] ss:$48 sps:$4 sm:$0xff]  }
  0x77   :  { %2507 = vmatpush2.bf16.msra.mxu0 %v3496_v4  ;;  %v3586_v4 = vld [vmem:[%s5240_s1 + $0x430] ss:$48 sps:$4 sm:$0xff]  }
  0x78   :  { %2550 = vmatpush2.bf16.msra.mxu1 %v3499_v5  ;;  %2508 = vmatprep.subr.bf16.mxu0 %v3504_v6  ;;  %v3589_v5 = vld [vmem:[%s5240_s1 + $0xa30] ss:$48 sps:$4 sm:$0xff]   ;;  %v3594_v6 = vld [vmem:[%s5240_s1 + $0x3d4] ss:$48 sps:$4 sm:$0xff]  }
  0x79   :  { %2551 = vmatprep.subr.bf16.mxu1 %v3507_v7  ;;  %v3597_v7 = vld [vmem:[%s5240_s1 + $0x9d4] ss:$48 sps:$4 sm:$0xff]  }
  0x7b   :  { %2509 = vmatpush2.bf16.msra.mxu0 %v3502_v8  ;;  %v3592_v8 = vld [vmem:[%s5240_s1 + $0x3d0] ss:$48 sps:$4 sm:$0xff]  }
  0x7c   :  { %2552 = vmatpush2.bf16.msra.mxu1 %v3505_v9  ;;  %2510 = vmatprep.subr.bf16.mxu0 %v3510_v10  ;;  %v3595_v9 = vld [vmem:[%s5240_s1 + $0x9d0] ss:$48 sps:$4 sm:$0xff]   ;;  %v3600_v10 = vld [vmem:[%s5240_s1 + $0x374] ss:$48 sps:$4 sm:$0xff]  }
  0x7d   :  { %2553 = vmatprep.subr.bf16.mxu1 %v3513_v11  ;;  %v3603_v11 = vld [vmem:[%s5240_s1 + $0x974] ss:$48 sps:$4 sm:$0xff]  }
  0x7f   :  { %2511 = vmatpush2.bf16.msra.mxu0 %v3508_v14  ;;  %v3598_v14 = vld [vmem:[%s5240_s1 + $0x370] ss:$48 sps:$4 sm:$0xff]  }
  0x80   :  { %2554 = vmatpush2.bf16.msra.mxu1 %v3511_v15  ;;  %2566 = vmatprep.subr.bf16.mxu0 %v3516_v16  ;;  %v3601_v15 = vld [vmem:[%s5240_s1 + $0x970] ss:$48 sps:$4 sm:$0xff]   ;;  %v3606_v16 = vld [vmem:[%s5240_s1 + $0x314] ss:$48 sps:$4 sm:$0xff]  }
  0x81   :  { %2609 = vmatprep.subr.bf16.mxu1 %v3519_v17  ;;  %v3609_v17 = vld [vmem:[%s5240_s1 + $0x914] ss:$48 sps:$4 sm:$0xff]  }
  0x82   :  { %2513 = vmatmul.mubr.bf16.vlgmr.msra.gmra.mxu0 %v4146_v12 }
  0x83   :  { %2556 = vmatmul.mubr.bf16.vlgmr.msra.gmra.mxu1 %v4148_v13  ;;  %2567 = vmatpush1.bf16.msra.mxu0 %v3514_v18  ;;  %v3604_v18 = vld [vmem:[%s5240_s1 + $0x310] ss:$48 sps:$4 sm:$0xff]  }
  0x84   :  { %2610 = vmatpush1.bf16.msra.mxu1 %v3517_v19  ;;  %2568 = vmatprep.subr.bf16.mxu0 %v3522_v20  ;;  %v3607_v19 = vld [vmem:[%s5240_s1 + $0x910] ss:$48 sps:$4 sm:$0xff]   ;;  %v3612_v20 = vld [vmem:[%s5240_s1 + $0x2bc] ss:$48 sps:$4 sm:$0xff]  }
  0x85   :  { %2611 = vmatprep.subr.bf16.mxu1 %v3525_v21  ;;  %2598 = vmatprep.mubr.bf16.mxu0 %v4077_v53  ;;  %v3615_v21 = vld [vmem:[%s5240_s1 + $0x8bc] ss:$48 sps:$4 sm:$0xff]  }
  0x86   :  { %2641 = vmatprep.mubr.bf16.mxu1 %v4079_v54 }
  0x87   :  { %2569 = vmatpush1.bf16.msra.mxu0 %v3520_v22  ;;  %v3610_v22 = vld [vmem:[%s5240_s1 + $0x2b8] ss:$48 sps:$4 sm:$0xff]  }
  0x88   :  { %2612 = vmatpush1.bf16.msra.mxu1 %v3523_v23  ;;  %2570 = vmatprep.subr.bf16.mxu0 %v3528_v24  ;;  %v3613_v23 = vld [vmem:[%s5240_s1 + $0x8b8] ss:$48 sps:$4 sm:$0xff]   ;;  %v3618_v24 = vld [vmem:[%s5240_s1 + $0x25c] ss:$48 sps:$4 sm:$0xff]  }
  0x89   :  { %2613 = vmatprep.subr.bf16.mxu1 %v3531_v25  ;;  %v3621_v25 = vld [vmem:[%s5240_s1 + $0x85c] ss:$48 sps:$4 sm:$0xff]  }
  0x8b   :  { %2571 = vmatpush1.bf16.msra.mxu0 %v3526_v26  ;;  %v3616_v26 = vld [vmem:[%s5240_s1 + $0x258] ss:$48 sps:$4 sm:$0xff]  }
  0x8c   :  { %2614 = vmatpush1.bf16.msra.mxu1 %v3529_v27  ;;  %2572 = vmatprep.subr.bf16.mxu0 %v3534_v28  ;;  %v3619_v27 = vld [vmem:[%s5240_s1 + $0x858] ss:$48 sps:$4 sm:$0xff]   ;;  %v3624_v28 = vld [vmem:[%s5240_s1 + $0x1fc] ss:$48 sps:$4 sm:$0xff]  }
  0x8d   :  { %2615 = vmatprep.subr.bf16.mxu1 %v3537_v29  ;;  %v3627_v29 = vld [vmem:[%s5240_s1 + $0x7fc] ss:$48 sps:$4 sm:$0xff]  }
  0x8f   :  { %2573 = vmatpush1.bf16.msra.mxu0 %v3532_v30  ;;  %v3622_v30 = vld [vmem:[%s5240_s1 + $0x1f8] ss:$48 sps:$4 sm:$0xff]  }
  0x90   :  { %2616 = vmatpush1.bf16.msra.mxu1 %v3535_v31  ;;  %2574 = vmatprep.subr.bf16.mxu0 %v3540_v32  ;;  %v3625_v31 = vld [vmem:[%s5240_s1 + $0x7f8] ss:$48 sps:$4 sm:$0xff]   ;;  %v3630_v32 = vld [vmem:[%s5240_s1 + $0x19c] ss:$48 sps:$4 sm:$0xff]  }
  0x91   :  { %2617 = vmatprep.subr.bf16.mxu1 %v3543_v33  ;;  %v3633_v33 = vld [vmem:[%s5240_s1 + $0x79c] ss:$48 sps:$4 sm:$0xff]  }
  0x93   :  { %2575 = vmatpush1.bf16.msra.mxu0 %v3538_v34  ;;  %v3628_v34 = vld [vmem:[%s5240_s1 + $0x198] ss:$48 sps:$4 sm:$0xff]  }
  0x94   :  { %2618 = vmatpush1.bf16.msra.mxu1 %v3541_v35  ;;  %2576 = vmatprep.subr.bf16.mxu0 %v3546_v36  ;;  %v3631_v35 = vld [vmem:[%s5240_s1 + $0x798] ss:$48 sps:$4 sm:$0xff]   ;;  %v3636_v36 = vld [vmem:[%s5240_s1 + $0x13c] ss:$48 sps:$4 sm:$0xff]  }
  0x95   :  { %2619 = vmatprep.subr.bf16.mxu1 %v3549_v37  ;;  %v3639_v37 = vld [vmem:[%s5240_s1 + $0x73c] ss:$48 sps:$4 sm:$0xff]  }
  0x97   :  { %2577 = vmatpush1.bf16.msra.mxu0 %v3544_v38  ;;  %v3634_v38 = vld [vmem:[%s5240_s1 + $0x138] ss:$48 sps:$4 sm:$0xff]  }
  0x98   :  { %2620 = vmatpush1.bf16.msra.mxu1 %v3547_v39  ;;  %2578 = vmatprep.subr.bf16.mxu0 %v3552_v40  ;;  %v3637_v39 = vld [vmem:[%s5240_s1 + $0x738] ss:$48 sps:$4 sm:$0xff]   ;;  %v3642_v40 = vld [vmem:[%s5240_s1 + $0xdc] ss:$48 sps:$4 sm:$0xff]  }
  0x99   :  { %2621 = vmatprep.subr.bf16.mxu1 %v3555_v41  ;;  %v3645_v41 = vld [vmem:[%s5240_s1 + $0x6dc] ss:$48 sps:$4 sm:$0xff]  }
  0x9b   :  { %2579 = vmatpush1.bf16.msra.mxu0 %v3550_v42  ;;  %v3640_v42 = vld [vmem:[%s5240_s1 + $0xd8] ss:$48 sps:$4 sm:$0xff]  }
  0x9c   :  { %2622 = vmatpush1.bf16.msra.mxu1 %v3553_v43  ;;  %2580 = vmatprep.subr.bf16.mxu0 %v3558_v44  ;;  %v3643_v43 = vld [vmem:[%s5240_s1 + $0x6d8] ss:$48 sps:$4 sm:$0xff]   ;;  %v3648_v44 = vld [vmem:[%s5240_s1 + $0x7c] ss:$48 sps:$4 sm:$0xff]  }
  0x9d   :  { %2623 = vmatprep.subr.bf16.mxu1 %v3561_v45  ;;  %v3651_v45 = vld [vmem:[%s5240_s1 + $0x67c] ss:$48 sps:$4 sm:$0xff]  }
  0x9f   :  { %2581 = vmatpush1.bf16.msra.mxu0 %v3556_v46  ;;  %v3646_v46 = vld [vmem:[%s5240_s1 + $0x78] ss:$48 sps:$4 sm:$0xff]  }
  0xa0   :  { %2624 = vmatpush1.bf16.msra.mxu1 %v3559_v47  ;;  %2582 = vmatprep.subr.bf16.mxu0 %v3564_v48  ;;  %v3649_v47 = vld [vmem:[%s5240_s1 + $0x678] ss:$48 sps:$4 sm:$0xff]   ;;  %v3654_v48 = vld [vmem:[%s5240_s1 + $0x1c] ss:$48 sps:$4 sm:$0xff]  }
  0xa1   :  { %2625 = vmatprep.subr.bf16.mxu1 %v3567_v49  ;;  %v3657_v49 = vld [vmem:[%s5240_s1 + $0x61c] ss:$48 sps:$4 sm:$0xff]  }
  0xa3   :  { %2583 = vmatpush2.bf16.msra.mxu0 %v3562_v50  ;;  %v3652_v50 = vld [vmem:[%s5240_s1 + $0x18] ss:$48 sps:$4 sm:$0xff]  }
  0xa4   :  { %2626 = vmatpush2.bf16.msra.mxu1 %v3565_v51  ;;  %2584 = vmatprep.subr.bf16.mxu0 %v3570_v52  ;;  %v3655_v51 = vld [vmem:[%s5240_s1 + $0x618] ss:$48 sps:$4 sm:$0xff]   ;;  %v3660_v52 = vld [vmem:[%s5240_s1 + $0x5bc] ss:$48 sps:$4 sm:$0xff]  }
  0xa5   :  { %2627 = vmatprep.subr.bf16.mxu1 %v3573_v55  ;;  %v3663_v55 = vld [vmem:[%s5240_s1 + $0xbbc] ss:$48 sps:$4 sm:$0xff]  }
  0xa7   :  { %2585 = vmatpush2.bf16.msra.mxu0 %v3568_v56  ;;  %v3658_v56 = vld [vmem:[%s5240_s1 + $0x5b8] ss:$48 sps:$4 sm:$0xff]  }
  0xa8   :  { %2628 = vmatpush2.bf16.msra.mxu1 %v3571_v57  ;;  %2586 = vmatprep.subr.bf16.mxu0 %v3576_v58  ;;  %v3661_v57 = vld [vmem:[%s5240_s1 + $0xbb8] ss:$48 sps:$4 sm:$0xff]   ;;  %v3666_v58 = vld [vmem:[%s5240_s1 + $0x55c] ss:$48 sps:$4 sm:$0xff]  }
  0xa9   :  { %2629 = vmatprep.subr.bf16.mxu1 %v3579_v59  ;;  %v3669_v59 = vld [vmem:[%s5240_s1 + $0xb5c] ss:$48 sps:$4 sm:$0xff]  }
  0xab   :  { %2587 = vmatpush2.bf16.msra.mxu0 %v3574_v60  ;;  %v3664_v60 = vld [vmem:[%s5240_s1 + $0x558] ss:$48 sps:$4 sm:$0xff]  }
  0xac   :  { %2630 = vmatpush2.bf16.msra.mxu1 %v3577_v61  ;;  %2588 = vmatprep.subr.bf16.mxu0 %v3582_v62  ;;  %v3667_v61 = vld [vmem:[%s5240_s1 + $0xb58] ss:$48 sps:$4 sm:$0xff]   ;;  %v3672_v62 = vld [vmem:[%s5240_s1 + $0x4fc] ss:$48 sps:$4 sm:$0xff]  }
  0xad   :  { %2631 = vmatprep.subr.bf16.mxu1 %v3585_v63  ;;  %v3675_v63 = vld [vmem:[%s5240_s1 + $0xafc] ss:$48 sps:$4 sm:$0xff]  }
  0xaf   :  { %2589 = vmatpush2.bf16.msra.mxu0 %v3580_v0  ;;  %v3670_v0 = vld [vmem:[%s5240_s1 + $0x4f8] ss:$48 sps:$4 sm:$0xff]  }
  0xb0   :  { %2632 = vmatpush2.bf16.msra.mxu1 %v3583_v1  ;;  %2590 = vmatprep.subr.bf16.mxu0 %v3588_v2  ;;  %v3673_v1 = vld [vmem:[%s5240_s1 + $0xaf8] ss:$48 sps:$4 sm:$0xff]   ;;  %v3678_v2 = vld [vmem:[%s5240_s1 + $0x49c] ss:$48 sps:$4 sm:$0xff]  }
  0xb1   :  { %2633 = vmatprep.subr.bf16.mxu1 %v3591_v3  ;;  %v3681_v3 = vld [vmem:[%s5240_s1 + $0xa9c] ss:$48 sps:$4 sm:$0xff]  }
  0xb3   :  { %2591 = vmatpush2.bf16.msra.mxu0 %v3586_v4  ;;  %v3676_v4 = vld [vmem:[%s5240_s1 + $0x498] ss:$48 sps:$4 sm:$0xff]  }
  0xb4   :  { %2634 = vmatpush2.bf16.msra.mxu1 %v3589_v5  ;;  %2592 = vmatprep.subr.bf16.mxu0 %v3594_v6  ;;  %v3679_v5 = vld [vmem:[%s5240_s1 + $0xa98] ss:$48 sps:$4 sm:$0xff]   ;;  %v3684_v6 = vld [vmem:[%s5240_s1 + $0x43c] ss:$48 sps:$4 sm:$0xff]  }
  0xb5   :  { %2635 = vmatprep.subr.bf16.mxu1 %v3597_v7  ;;  %v3687_v7 = vld [vmem:[%s5240_s1 + $0xa3c] ss:$48 sps:$4 sm:$0xff]  }
  0xb7   :  { %2593 = vmatpush2.bf16.msra.mxu0 %v3592_v8  ;;  %v3682_v8 = vld [vmem:[%s5240_s1 + $0x438] ss:$48 sps:$4 sm:$0xff]  }
  0xb8   :  { %2636 = vmatpush2.bf16.msra.mxu1 %v3595_v9  ;;  %2594 = vmatprep.subr.bf16.mxu0 %v3600_v10  ;;  %v3685_v9 = vld [vmem:[%s5240_s1 + $0xa38] ss:$48 sps:$4 sm:$0xff]   ;;  %v3690_v10 = vld [vmem:[%s5240_s1 + $0x3dc] ss:$48 sps:$4 sm:$0xff]  }
  0xb9   :  { %2637 = vmatprep.subr.bf16.mxu1 %v3603_v11  ;;  %v3693_v11 = vld [vmem:[%s5240_s1 + $0x9dc] ss:$48 sps:$4 sm:$0xff]  }
  0xbb   :  { %2595 = vmatpush2.bf16.msra.mxu0 %v3598_v14  ;;  %v3688_v14 = vld [vmem:[%s5240_s1 + $0x3d8] ss:$48 sps:$4 sm:$0xff]  }
  0xbc   :  { %2638 = vmatpush2.bf16.msra.mxu1 %v3601_v15  ;;  %2596 = vmatprep.subr.bf16.mxu0 %v3606_v16  ;;  %v3691_v15 = vld [vmem:[%s5240_s1 + $0x9d8] ss:$48 sps:$4 sm:$0xff]   ;;  %v414_v16 = vlaneseq }
  0xbd   :  { %2639 = vmatprep.subr.bf16.mxu1 %v3609_v17  ;;  %v3696_v17 = vld [vmem:[%s5240_s1 + $0x37c] ss:$48 sps:$4 sm:$0xff]  }
  0xbf   :  { %2597 = vmatpush2.bf16.msra.mxu0 %v3604_v18  ;;  %v3699_v18 = vld [vmem:[%s5240_s1 + $0x97c] ss:$48 sps:$4 sm:$0xff]  }
  0xc0   :  { %2640 = vmatpush2.bf16.msra.mxu1 %v3607_v19  ;;  %2652 = vmatprep.subr.bf16.mxu0 %v3612_v20  ;;  %v3694_v19 = vld [vmem:[%s5240_s1 + $0x378] ss:$48 sps:$4 sm:$0xff]  }
  0xc1   :  { %2695 = vmatprep.subr.bf16.mxu1 %v3615_v21  ;;  %v3697_v20 = vld [vmem:[%s5240_s1 + $0x978] ss:$48 sps:$4 sm:$0xff]   ;;  %v4720_v21 = vshrl.u32 %v414_v16, 7  ;;  %v3753_v16 = vld [vmem:[%s5240_s1 + $0x624] ss:$48 sps:$4 sm:$0xff]  }
  0xc2   :  { %2599 = vmatmul.mubr.bf16.vlgmr.msra.gmra.mxu0 %v4146_v12 }
  0xc3   :  { %2642 = vmatmul.mubr.bf16.vlgmr.msra.gmra.mxu1 %v4148_v13  ;;  %2653 = vmatpush1.bf16.msra.mxu0 %v3610_v22  ;;  %v3702_v22 = vld [vmem:[%s5240_s1 + $0x31c] ss:$48 sps:$4 sm:$0xff]  }
  0xc4   :  { %2696 = vmatpush1.bf16.msra.mxu1 %v3613_v23  ;;  %2654 = vmatprep.subr.bf16.mxu0 %v3618_v24  ;;  %v3705_v23 = vld [vmem:[%s5240_s1 + $0x91c] ss:$48 sps:$4 sm:$0xff]   ;;  %v3700_v24 = vld [vmem:[%s5240_s1 + $0x318] ss:$48 sps:$4 sm:$0xff]  }
  0xc5   :  { %2697 = vmatprep.subr.bf16.mxu1 %v3621_v25  ;;  %2684 = vmatprep.mubr.bf16.mxu0 %v4077_v53  ;;  %v3703_v25 = vld [vmem:[%s5240_s1 + $0x918] ss:$48 sps:$4 sm:$0xff]  }
  0xc6   :  { %2727 = vmatprep.mubr.bf16.mxu1 %v4079_v54 }
  0xc7   :  { %2655 = vmatpush1.bf16.msra.mxu0 %v3616_v26  ;;  %v4737_v26 = vld [vmem:[%s5242_s2] sm:$0xff] }
  0xc8   :  { %2698 = vmatpush1.bf16.msra.mxu1 %v3619_v27  ;;  %2656 = vmatprep.subr.bf16.mxu0 %v3624_v28  ;;  %v416_v27 = vsub.s32 0, %v4720_v21  ;;  %v3708_v28 = vld [vmem:[%s5240_s1 + $0x2c4] ss:$48 sps:$4 sm:$0xff]  }
  0xc9   :  { %2699 = vmatprep.subr.bf16.mxu1 %v3627_v29  ;;  %v3711_v29 = vld [vmem:[%s5240_s1 + $0x8c4] ss:$48 sps:$4 sm:$0xff]  }
  0xcb   :  { %2657 = vmatpush1.bf16.msra.mxu0 %v3622_v30  ;;  %v420_v30 = vsub.s32 1, %v4720_v21 }
  0xcc   :  { %2700 = vmatpush1.bf16.msra.mxu1 %v3625_v31  ;;  %2658 = vmatprep.subr.bf16.mxu0 %v3630_v32  ;;  %v3706_v31 = vld [vmem:[%s5240_s1 + $0x2c0] ss:$48 sps:$4 sm:$0xff]   ;;  %v417_v32 = vrot.slane %v4737_v26, %v416_v27 }
  0xcd   :  { %2701 = vmatprep.subr.bf16.mxu1 %v3633_v33  ;;  %v3709_v33 = vld [vmem:[%s5240_s1 + $0x8c0] ss:$48 sps:$4 sm:$0xff]  }
  0xcf   :  { %2659 = vmatpush1.bf16.msra.mxu0 %v3628_v34  ;;  %v3714_v34 = vld [vmem:[%s5240_s1 + $0x264] ss:$48 sps:$4 sm:$0xff]  }
  0xd0   :  { %2702 = vmatpush1.bf16.msra.mxu1 %v3631_v35  ;;  %2660 = vmatprep.subr.bf16.mxu0 %v3636_v36  ;;  %v3717_v35 = vld [vmem:[%s5240_s1 + $0x864] ss:$48 sps:$4 sm:$0xff]   ;;  %v421_v36 = vrot.slane %v4737_v26, %v420_v30 }
  0xd1   :  { %2703 = vmatprep.subr.bf16.mxu1 %v3639_v37 }
  0xd3   :  { %2661 = vmatpush1.bf16.msra.mxu0 %v3634_v38 }
  0xd4   :  { %2704 = vmatpush1.bf16.msra.mxu1 %v3637_v39  ;;  %2662 = vmatprep.subr.bf16.mxu0 %v3642_v40  ;;  %v3712_v40 = vld [vmem:[%s5240_s1 + $0x260] ss:$48 sps:$4 sm:$0xff]  }
  0xd5   :  { %2705 = vmatprep.subr.bf16.mxu1 %v3645_v41  ;;  %v3715_v41 = vld [vmem:[%s5240_s1 + $0x860] ss:$48 sps:$4 sm:$0xff]  }
  0xd7   :  { %2663 = vmatpush1.bf16.msra.mxu0 %v3640_v42 }
  0xd8   :  { %2706 = vmatpush1.bf16.msra.mxu1 %v3643_v43  ;;  %2664 = vmatprep.subr.bf16.mxu0 %v3648_v44  ;;  %v3720_v44 = vld [vmem:[%s5240_s1 + $0x204] ss:$48 sps:$4 sm:$0xff]  }
  0xd9   :  { %2707 = vmatprep.subr.bf16.mxu1 %v3651_v45  ;;  %v3723_v45 = vld [vmem:[%s5240_s1 + $0x804] ss:$48 sps:$4 sm:$0xff]  }
  0xdb   :  { %2665 = vmatpush1.bf16.msra.mxu0 %v3646_v46 }
  0xdc   :  { %2708 = vmatpush1.bf16.msra.mxu1 %v3649_v47  ;;  %2666 = vmatprep.subr.bf16.mxu0 %v3654_v48 }
  0xdd   :  { %2709 = vmatprep.subr.bf16.mxu1 %v3657_v49 }
  0xdf   :  { %2667 = vmatpush1.bf16.msra.mxu0 %v3652_v50 }
  0xe0   :  { %2710 = vmatpush1.bf16.msra.mxu1 %v3655_v51  ;;  %2668 = vmatprep.subr.bf16.mxu0 %v3660_v52  ;;  %v3718_v52 = vld [vmem:[%s5240_s1 + $0x200] ss:$48 sps:$4 sm:$0xff]  }
  0xe1   :  { %2711 = vmatprep.subr.bf16.mxu1 %v3663_v55  ;;  %v3721_v55 = vld [vmem:[%s5240_s1 + $0x800] ss:$48 sps:$4 sm:$0xff]  }
  0xe3   :  { %2669 = vmatpush2.bf16.msra.mxu0 %v3658_v56 }
  0xe4   :  { %2712 = vmatpush2.bf16.msra.mxu1 %v3661_v57  ;;  %2670 = vmatprep.subr.bf16.mxu0 %v3666_v58  ;;  %v3726_v57 = vld [vmem:[%s5240_s1 + $0x1a4] ss:$48 sps:$4 sm:$0xff]  }
  0xe5   :  { %2713 = vmatprep.subr.bf16.mxu1 %v3669_v59  ;;  %v3729_v58 = vld [vmem:[%s5240_s1 + $0x7a4] ss:$48 sps:$4 sm:$0xff]  }
  0xe7   :  { %2671 = vmatpush2.bf16.msra.mxu0 %v3664_v60 }
  0xe8   :  { %2714 = vmatpush2.bf16.msra.mxu1 %v3667_v61  ;;  %2672 = vmatprep.subr.bf16.mxu0 %v3672_v62 }
  0xe9   :  { %2715 = vmatprep.subr.bf16.mxu1 %v3675_v63  ;;  %v3724_v63 = vld [vmem:[%s5240_s1 + $0x1a0] ss:$48 sps:$4 sm:$0xff]  }
  0xeb   :  { %2673 = vmatpush2.bf16.msra.mxu0 %v3670_v0  ;;  %v3727_v0 = vld [vmem:[%s5240_s1 + $0x7a0] ss:$48 sps:$4 sm:$0xff]  }
  0xec   :  { %2716 = vmatpush2.bf16.msra.mxu1 %v3673_v1  ;;  %2674 = vmatprep.subr.bf16.mxu0 %v3678_v2  ;;  %v3732_v1 = vld [vmem:[%s5240_s1 + $0x144] ss:$48 sps:$4 sm:$0xff]  }
  0xed   :  { %2717 = vmatprep.subr.bf16.mxu1 %v3681_v3  ;;  %v3735_v2 = vld [vmem:[%s5240_s1 + $0x744] ss:$48 sps:$4 sm:$0xff]   ;;  %v3730_v3 = vld [vmem:[%s5240_s1 + $0x140] ss:$48 sps:$4 sm:$0xff]  }
  0xef   :  { %2675 = vmatpush2.bf16.msra.mxu0 %v3676_v4  ;;  %v3733_v4 = vld [vmem:[%s5240_s1 + $0x740] ss:$48 sps:$4 sm:$0xff]  }
  0xf0   :  { %2718 = vmatpush2.bf16.msra.mxu1 %v3679_v5  ;;  %2676 = vmatprep.subr.bf16.mxu0 %v3684_v6  ;;  %v3738_v5 = vld [vmem:[%s5240_s1 + $0xe4] ss:$48 sps:$4 sm:$0xff]  }
  0xf1   :  { %2719 = vmatprep.subr.bf16.mxu1 %v3687_v7  ;;  %v3741_v6 = vld [vmem:[%s5240_s1 + $0x6e4] ss:$48 sps:$4 sm:$0xff]   ;;  %v3736_v7 = vld [vmem:[%s5240_s1 + $0xe0] ss:$48 sps:$4 sm:$0xff]  }
  0xf3   :  { %2677 = vmatpush2.bf16.msra.mxu0 %v3682_v8  ;;  %v3739_v8 = vld [vmem:[%s5240_s1 + $0x6e0] ss:$48 sps:$4 sm:$0xff]  }
  0xf4   :  { %2720 = vmatpush2.bf16.msra.mxu1 %v3685_v9  ;;  %2678 = vmatprep.subr.bf16.mxu0 %v3690_v10  ;;  %v3744_v9 = vld [vmem:[%s5240_s1 + $0x84] ss:$48 sps:$4 sm:$0xff]  }
  0xf5   :  { %2721 = vmatprep.subr.bf16.mxu1 %v3693_v11  ;;  %v3747_v10 = vld [vmem:[%s5240_s1 + $0x684] ss:$48 sps:$4 sm:$0xff]   ;;  %v3742_v11 = vld [vmem:[%s5240_s1 + $0x80] ss:$48 sps:$4 sm:$0xff]  }
  0xf7   :  { %2679 = vmatpush2.bf16.msra.mxu0 %v3688_v14  ;;  %v3745_v14 = vld [vmem:[%s5240_s1 + $0x680] ss:$48 sps:$4 sm:$0xff]  }
  0xf8   :  { %2722 = vmatpush2.bf16.msra.mxu1 %v3691_v15  ;;  %2680 = vmatprep.subr.bf16.mxu0 %v3696_v17  ;;  %v3750_v15 = vld [vmem:[%s5240_s1 + $0x24] ss:$48 sps:$4 sm:$0xff]   ;;  %v3748_v17 = vld [vmem:[%s5240_s1 + $0x20] ss:$48 sps:$4 sm:$0xff]  }
  0xf9   :  { %2723 = vmatprep.subr.bf16.mxu1 %v3699_v18  ;;  %v3751_v18 = vld [vmem:[%s5240_s1 + $0x620] ss:$48 sps:$4 sm:$0xff]  }
  0xfb   :  { %2681 = vmatpush2.bf16.msra.mxu0 %v3694_v19  ;;  %v3756_v19 = vld [vmem:[%s5240_s1 + $0x5c4] ss:$48 sps:$4 sm:$0xff]  }
  0xfc   :  { %2724 = vmatpush2.bf16.msra.mxu1 %v3697_v20  ;;  %2682 = vmatprep.subr.bf16.mxu0 %v3702_v22  ;;  %v3759_v20 = vld [vmem:[%s5240_s1 + $0xbc4] ss:$48 sps:$4 sm:$0xff]   ;;  %v3754_v22 = vld [vmem:[%s5240_s1 + $0x5c0] ss:$48 sps:$4 sm:$0xff]  }
  0xfd   :  { %2725 = vmatprep.subr.bf16.mxu1 %v3705_v23  ;;  %v3757_v23 = vld [vmem:[%s5240_s1 + $0xbc0] ss:$48 sps:$4 sm:$0xff]  }
  0xff   :  { %2683 = vmatpush2.bf16.msra.mxu0 %v3700_v24  ;;  %v3762_v24 = vld [vmem:[%s5240_s1 + $0x564] ss:$48 sps:$4 sm:$0xff]  }
 0x100   :  { %2726 = vmatpush2.bf16.msra.mxu1 %v3703_v25  ;;  %2738 = vmatprep.subr.bf16.mxu0 %v3708_v28  ;;  %v3765_v25 = vld [vmem:[%s5240_s1 + $0xb64] ss:$48 sps:$4 sm:$0xff]   ;;  %v3760_v28 = vld [vmem:[%s5240_s1 + $0x560] ss:$48 sps:$4 sm:$0xff]  }
 0x101   :  { %2781 = vmatprep.subr.bf16.mxu1 %v3711_v29  ;;  %v3763_v29 = vld [vmem:[%s5240_s1 + $0xb60] ss:$48 sps:$4 sm:$0xff]  }
 0x102   :  { %v2428_v37 = vpop.f32.mrf.mxu0  ;;  %2685 = vmatmul.mubr.bf16.vlgmr.msra.gmra.mxu0 %v4146_v12 }
 0x103   :  { %v2471_v38 = vpop.f32.mrf.mxu1  ;;  %2728 = vmatmul.mubr.bf16.vlgmr.msra.gmra.mxu1 %v4148_v13  ;;  %v2429_v39 = vadd.f32 %v2428_v37, %v417_v32  ;;  %2739 = vmatpush1.bf16.msra.mxu0 %v3706_v31  ;;  %v3768_v31 = vld [vmem:[%s5240_s1 + $0x504] ss:$48 sps:$4 sm:$0xff]   ;;  %v3772_v37 = vld [vmem:[%s5240_s1 + $0x4a0] ss:$48 sps:$4 sm:$0xff]  }
 0x104   :  { %2782 = vmatpush1.bf16.msra.mxu1 %v3709_v33  ;;  %v2430_v42 = vpop.f32.mrf.mxu0  ;;  %2740 = vmatprep.subr.bf16.mxu0 %v3714_v34  ;;  %v3766_v33 = vld [vmem:[%s5240_s1 + $0x500] ss:$48 sps:$4 sm:$0xff]  }
 0x105   :  { %v2473_v43 = vpop.f32.mrf.mxu1  ;;  %2783 = vmatprep.subr.bf16.mxu1 %v3717_v35  ;;  %v2472_v46 = vadd.f32 %v2471_v38, %v2429_v39  ;;  %v2431_v47 = vadd.f32 %v2430_v42, %v421_v36  ;;  %2770 = vmatprep.mubr.bf16.mxu0 %v4077_v53  ;;  %v3769_v34 = vld [vmem:[%s5240_s1 + $0xb00] ss:$48 sps:$4 sm:$0xff]   ;;  %v3774_v35 = vld [vmem:[%s5240_s1 + $0x4a4] ss:$48 sps:$4 sm:$0xff]  }
 0x106   :  { %2813 = vmatprep.mubr.bf16.mxu1 %v4079_v54  ;;  %v2432_v48 = vpop.f32.mrf.mxu0  ;;  %v3775_v38 = vld [vmem:[%s5240_s1 + $0xaa0] ss:$48 sps:$4 sm:$0xff]   ;;  %v3780_v39 = vld [vmem:[%s5240_s1 + $0x444] ss:$48 sps:$4 sm:$0xff]  }
 0x107   :  { %v2475_v49 = vpop.f32.mrf.mxu1  ;;  %2910 = vst [vmem:[%s5243_s3] sm:$0xff] %v2472_v46  ;;  %v2474_v50 = vadd.f32 %v2473_v43, %v2431_v47  ;;  %v2433_v51 = vadd.f32 %v2432_v48, %v417_v32  ;;  %2741 = vmatpush1.bf16.msra.mxu0 %v3712_v40  ;;  %v3771_v32 = vld [vmem:[%s5240_s1 + $0xb04] ss:$48 sps:$4 sm:$0xff]   ;;  %v3781_v42 = vld [vmem:[%s5240_s1 + $0xa40] ss:$48 sps:$4 sm:$0xff]  }
 0x108   :  { %2784 = vmatpush1.bf16.msra.mxu1 %v3715_v41  ;;  %v2434_v56 = vpop.f32.mrf.mxu0  ;;  %2742 = vmatprep.subr.bf16.mxu0 %v3720_v44  ;;  %v3783_v40 = vld [vmem:[%s5240_s1 + $0xa44] ss:$48 sps:$4 sm:$0xff]   ;;  %v3778_v41 = vld [vmem:[%s5240_s1 + $0x440] ss:$48 sps:$4 sm:$0xff]  }
 0x109   :  { %2785 = vmatprep.subr.bf16.mxu1 %v3723_v45  ;;  %2911 = vst [vmem:[%s5243_s3 + $0x8] sm:$0xff] %v2474_v50  ;;  %v2476_v59 = vadd.f32 %v2475_v49, %v2433_v51  ;;  %v2435_v60 = vadd.f32 %v2434_v56, %v421_v36  ;;  %v2477_v61 = vpop.f32.mrf.mxu1  ;;  %v3777_v36 = vld [vmem:[%s5240_s1 + $0xaa4] ss:$48 sps:$4 sm:$0xff]   ;;  %v3784_v45 = vld [vmem:[%s5240_s1 + $0x3e0] ss:$48 sps:$4 sm:$0xff]  }
 0x10a   :  { %v3786_v43 = vld [vmem:[%s5240_s1 + $0x3e4] ss:$48 sps:$4 sm:$0xff]   ;;  %v3787_v46 = vld [vmem:[%s5240_s1 + $0x9e0] ss:$48 sps:$4 sm:$0xff]  }
 0x10b   :  { %2922 = vst [vmem:[%s5243_s3 + $0x60] sm:$0xff] %v2476_v59  ;;  %v2478_v62 = vadd.f32 %v2477_v61, %v2435_v60  ;;  %2743 = vmatpush1.bf16.msra.mxu0 %v3718_v52  ;;  %v3789_v44 = vld [vmem:[%s5240_s1 + $0x9e4] ss:$48 sps:$4 sm:$0xff]   ;;  %v3790_v49 = vld [vmem:[%s5240_s1 + $0x380] ss:$48 sps:$4 sm:$0xff]   ;;  %v428_v60 = vsub.s32 3, %v4720_v21 }
 0x10c   :  { %2786 = vmatpush1.bf16.msra.mxu1 %v3721_v55  ;;  %2744 = vmatprep.subr.bf16.mxu0 %v3726_v57  ;;  %v3792_v47 = vld [vmem:[%s5240_s1 + $0x384] ss:$48 sps:$4 sm:$0xff]   ;;  %v3793_v50 = vld [vmem:[%s5240_s1 + $0x980] ss:$48 sps:$4 sm:$0xff]   ;;  %v424_v57 = vsub.s32 2, %v4720_v21 }
 0x10d   :  { %2787 = vmatprep.subr.bf16.mxu1 %v3729_v58  ;;  %2923 = vst [vmem:[%s5243_s3 + $0x68] sm:$0xff] %v2478_v62  ;;  %v3795_v48 = vld [vmem:[%s5240_s1 + $0x984] ss:$48 sps:$4 sm:$0xff]   ;;  %v3796_v55 = vld [vmem:[%s5240_s1 + $0x320] ss:$48 sps:$4 sm:$0xff]  }
 0x10e   :  { %v3798_v51 = vld [vmem:[%s5240_s1 + $0x324] ss:$48 sps:$4 sm:$0xff]   ;;  %v3799_v56 = vld [vmem:[%s5240_s1 + $0x920] ss:$48 sps:$4 sm:$0xff]   ;;  %v3804_v58 = vld [vmem:[%s5240_s1 + $0x2cc] ss:$48 sps:$4 sm:$0xff]   ;;  %v425_v61 = vrot.slane %v4737_v26, %v424_v57 }
 0x10f   :  { %2745 = vmatpush1.bf16.msra.mxu0 %v3724_v63  ;;  %v3801_v52 = vld [vmem:[%s5240_s1 + $0x924] ss:$48 sps:$4 sm:$0xff]   ;;  %v3807_v59 = vld [vmem:[%s5240_s1 + $0x8cc] ss:$48 sps:$4 sm:$0xff]   ;;  %v3802_v62 = vld [vmem:[%s5240_s1 + $0x2c8] ss:$48 sps:$4 sm:$0xff]  }
 0x110   :  { %2788 = vmatpush1.bf16.msra.mxu1 %v3727_v0  ;;  %2746 = vmatprep.subr.bf16.mxu0 %v3732_v1  ;;  %v3805_v63 = vld [vmem:[%s5240_s1 + $0x8c8] ss:$48 sps:$4 sm:$0xff]   ;;  %v3810_v0 = vld [vmem:[%s5240_s1 + $0x26c] ss:$48 sps:$4 sm:$0xff]  }
 0x111   :  { %2789 = vmatprep.subr.bf16.mxu1 %v3735_v2  ;;  %v3813_v1 = vld [vmem:[%s5240_s1 + $0x86c] ss:$48 sps:$4 sm:$0xff]   ;;  %v429_v2 = vrot.slane %v4737_v26, %v428_v60 }
 0x113   :  { %2747 = vmatpush1.bf16.msra.mxu0 %v3730_v3 }
 0x114   :  { %2790 = vmatpush1.bf16.msra.mxu1 %v3733_v4  ;;  %2748 = vmatprep.subr.bf16.mxu0 %v3738_v5 }
 0x115   :  { %2791 = vmatprep.subr.bf16.mxu1 %v3741_v6  ;;  %v3808_v6 = vld [vmem:[%s5240_s1 + $0x268] ss:$48 sps:$4 sm:$0xff]  }
 0x117   :  { %2749 = vmatpush1.bf16.msra.mxu0 %v3736_v7  ;;  %v3811_v7 = vld [vmem:[%s5240_s1 + $0x868] ss:$48 sps:$4 sm:$0xff]  }
 0x118   :  { %2792 = vmatpush1.bf16.msra.mxu1 %v3739_v8  ;;  %2750 = vmatprep.subr.bf16.mxu0 %v3744_v9 }
 0x119   :  { %2793 = vmatprep.subr.bf16.mxu1 %v3747_v10  ;;  %v3816_v10 = vld [vmem:[%s5240_s1 + $0x20c] ss:$48 sps:$4 sm:$0xff]  }
 0x11b   :  { %2751 = vmatpush1.bf16.msra.mxu0 %v3742_v11  ;;  %v3819_v11 = vld [vmem:[%s5240_s1 + $0x80c] ss:$48 sps:$4 sm:$0xff]  }
 0x11c   :  { %2794 = vmatpush1.bf16.msra.mxu1 %v3745_v14  ;;  %2752 = vmatprep.subr.bf16.mxu0 %v3750_v15 }
 0x11d   :  { %2795 = vmatprep.subr.bf16.mxu1 %v3753_v16 }
 0x11f   :  { %2753 = vmatpush1.bf16.msra.mxu0 %v3748_v17 }
 0x120   :  { %2796 = vmatpush1.bf16.msra.mxu1 %v3751_v18  ;;  %2754 = vmatprep.subr.bf16.mxu0 %v3756_v19 }
 0x121   :  { %2797 = vmatprep.subr.bf16.mxu1 %v3759_v20  ;;  %v3814_v20 = vld [vmem:[%s5240_s1 + $0x208] ss:$48 sps:$4 sm:$0xff]  }
 0x123   :  { %2755 = vmatpush2.bf16.msra.mxu0 %v3754_v22 }
 0x124   :  { %2798 = vmatpush2.bf16.msra.mxu1 %v3757_v23  ;;  %2756 = vmatprep.subr.bf16.mxu0 %v3762_v24  ;;  %v3825_v23 = vld [vmem:[%s5240_s1 + $0x7ac] ss:$48 sps:$4 sm:$0xff]  }
 0x125   :  { %2799 = vmatprep.subr.bf16.mxu1 %v3765_v25 }
 0x127   :  { %2757 = vmatpush2.bf16.msra.mxu0 %v3760_v28 }
 0x128   :  { %2800 = vmatpush2.bf16.msra.mxu1 %v3763_v29  ;;  %2758 = vmatprep.subr.bf16.mxu0 %v3768_v31  ;;  %v3820_v31 = vld [vmem:[%s5240_s1 + $0x1a8] ss:$48 sps:$4 sm:$0xff]  }
 0x129   :  { %2801 = vmatprep.subr.bf16.mxu1 %v3771_v32  ;;  %v3823_v32 = vld [vmem:[%s5240_s1 + $0x7a8] ss:$48 sps:$4 sm:$0xff]  }
 0x12b   :  { %2759 = vmatpush2.bf16.msra.mxu0 %v3766_v33  ;;  %v3828_v33 = vld [vmem:[%s5240_s1 + $0x14c] ss:$48 sps:$4 sm:$0xff]  }
 0x12c   :  { %2802 = vmatpush2.bf16.msra.mxu1 %v3769_v34  ;;  %2760 = vmatprep.subr.bf16.mxu0 %v3774_v35  ;;  %v3831_v34 = vld [vmem:[%s5240_s1 + $0x74c] ss:$48 sps:$4 sm:$0xff]   ;;  %v3826_v35 = vld [vmem:[%s5240_s1 + $0x148] ss:$48 sps:$4 sm:$0xff]  }
 0x12d   :  { %2803 = vmatprep.subr.bf16.mxu1 %v3777_v36  ;;  %v3829_v36 = vld [vmem:[%s5240_s1 + $0x748] ss:$48 sps:$4 sm:$0xff]  }
 0x12f   :  { %2761 = vmatpush2.bf16.msra.mxu0 %v3772_v37  ;;  %v3834_v37 = vld [vmem:[%s5240_s1 + $0xec] ss:$48 sps:$4 sm:$0xff]  }
 0x130   :  { %2804 = vmatpush2.bf16.msra.mxu1 %v3775_v38  ;;  %2762 = vmatprep.subr.bf16.mxu0 %v3780_v39  ;;  %v3837_v38 = vld [vmem:[%s5240_s1 + $0x6ec] ss:$48 sps:$4 sm:$0xff]   ;;  %v3832_v39 = vld [vmem:[%s5240_s1 + $0xe8] ss:$48 sps:$4 sm:$0xff]  }
 0x131   :  { %2805 = vmatprep.subr.bf16.mxu1 %v3783_v40  ;;  %v3835_v40 = vld [vmem:[%s5240_s1 + $0x6e8] ss:$48 sps:$4 sm:$0xff]  }
 0x133   :  { %2763 = vmatpush2.bf16.msra.mxu0 %v3778_v41  ;;  %v3840_v41 = vld [vmem:[%s5240_s1 + $0x8c] ss:$48 sps:$4 sm:$0xff]  }
 0x134   :  { %2806 = vmatpush2.bf16.msra.mxu1 %v3781_v42  ;;  %2764 = vmatprep.subr.bf16.mxu0 %v3786_v43  ;;  %v3843_v42 = vld [vmem:[%s5240_s1 + $0x68c] ss:$48 sps:$4 sm:$0xff]   ;;  %v3838_v43 = vld [vmem:[%s5240_s1 + $0x88] ss:$48 sps:$4 sm:$0xff]  }
 0x135   :  { %2807 = vmatprep.subr.bf16.mxu1 %v3789_v44  ;;  %v3841_v44 = vld [vmem:[%s5240_s1 + $0x688] ss:$48 sps:$4 sm:$0xff]  }
 0x137   :  { %2765 = vmatpush2.bf16.msra.mxu0 %v3784_v45  ;;  %v3846_v45 = vld [vmem:[%s5240_s1 + $0x2c] ss:$48 sps:$4 sm:$0xff]  }
 0x138   :  { %2808 = vmatpush2.bf16.msra.mxu1 %v3787_v46  ;;  %2766 = vmatprep.subr.bf16.mxu0 %v3792_v47  ;;  %v3849_v46 = vld [vmem:[%s5240_s1 + $0x62c] ss:$48 sps:$4 sm:$0xff]   ;;  %v3844_v47 = vld [vmem:[%s5240_s1 + $0x28] ss:$48 sps:$4 sm:$0xff]  }
 0x139   :  { %2809 = vmatprep.subr.bf16.mxu1 %v3795_v48  ;;  %v3847_v48 = vld [vmem:[%s5240_s1 + $0x628] ss:$48 sps:$4 sm:$0xff]  }
 0x13b   :  { %2767 = vmatpush2.bf16.msra.mxu0 %v3790_v49  ;;  %v3852_v49 = vld [vmem:[%s5240_s1 + $0x5cc] ss:$48 sps:$4 sm:$0xff]  }
 0x13c   :  { %2810 = vmatpush2.bf16.msra.mxu1 %v3793_v50  ;;  %2768 = vmatprep.subr.bf16.mxu0 %v3798_v51  ;;  %v3855_v50 = vld [vmem:[%s5240_s1 + $0xbcc] ss:$48 sps:$4 sm:$0xff]   ;;  %v3850_v51 = vld [vmem:[%s5240_s1 + $0x5c8] ss:$48 sps:$4 sm:$0xff]  }
 0x13d   :  { %2811 = vmatprep.subr.bf16.mxu1 %v3801_v52  ;;  %v3853_v52 = vld [vmem:[%s5240_s1 + $0xbc8] ss:$48 sps:$4 sm:$0xff]  }
 0x13f   :  { %2769 = vmatpush2.bf16.msra.mxu0 %v3796_v55  ;;  %v3858_v55 = vld [vmem:[%s5240_s1 + $0x56c] ss:$48 sps:$4 sm:$0xff]  }
 0x140   :  { %2812 = vmatpush2.bf16.msra.mxu1 %v3799_v56  ;;  %2824 = vmatprep.subr.bf16.mxu0 %v3804_v58  ;;  %v3861_v56 = vld [vmem:[%s5240_s1 + $0xb6c] ss:$48 sps:$4 sm:$0xff]   ;;  %v3856_v58 = vld [vmem:[%s5240_s1 + $0x568] ss:$48 sps:$4 sm:$0xff]  }
 0x141   :  { %2867 = vmatprep.subr.bf16.mxu1 %v3807_v59  ;;  %v3859_v59 = vld [vmem:[%s5240_s1 + $0xb68] ss:$48 sps:$4 sm:$0xff]  }
 0x142   :  { %v2514_v3 = vpop.f32.mrf.mxu0  ;;  %2771 = vmatmul.mubr.bf16.vlgmr.msra.gmra.mxu0 %v4146_v12 }
 0x143   :  { %v2557_v4 = vpop.f32.mrf.mxu1  ;;  %2814 = vmatmul.mubr.bf16.vlgmr.msra.gmra.mxu1 %v4148_v13  ;;  %v2515_v5 = vadd.f32 %v2514_v3, %v425_v61  ;;  %2825 = vmatpush1.bf16.msra.mxu0 %v3802_v62  ;;  %v3867_v62 = vld [vmem:[%s5240_s1 + $0xb0c] ss:$48 sps:$4 sm:$0xff]   ;;  %v3868_v3 = vld [vmem:[%s5240_s1 + $0x4a8] ss:$48 sps:$4 sm:$0xff]  }
 0x144   :  { %2868 = vmatpush1.bf16.msra.mxu1 %v3805_v63  ;;  %v2516_v8 = vpop.f32.mrf.mxu0  ;;  %2826 = vmatprep.subr.bf16.mxu0 %v3810_v0  ;;  %v3862_v63 = vld [vmem:[%s5240_s1 + $0x508] ss:$48 sps:$4 sm:$0xff]  }
 0x145   :  { %v2559_v9 = vpop.f32.mrf.mxu1  ;;  %2869 = vmatprep.subr.bf16.mxu1 %v3813_v1  ;;  %v2558_v14 = vadd.f32 %v2557_v4, %v2515_v5  ;;  %v2517_v15 = vadd.f32 %v2516_v8, %v429_v2  ;;  %2856 = vmatprep.mubr.bf16.mxu0 %v4077_v53  ;;  %v3817_v53 = vld [vmem:[%s5240_s1 + $0x808] ss:$48 sps:$4 sm:$0xff]   ;;  %v3870_v1 = vld [vmem:[%s5240_s1 + $0x4ac] ss:$48 sps:$4 sm:$0xff]  }
 0x146   :  { %2899 = vmatprep.mubr.bf16.mxu1 %v4079_v54  ;;  %v2518_v16 = vpop.f32.mrf.mxu0  ;;  %v3822_v54 = vld [vmem:[%s5240_s1 + $0x1ac] ss:$48 sps:$4 sm:$0xff]   ;;  %v3865_v0 = vld [vmem:[%s5240_s1 + $0xb08] ss:$48 sps:$4 sm:$0xff]  }
 0x147   :  { %v2561_v17 = vpop.f32.mrf.mxu1  ;;  %2912 = vst [vmem:[%s5243_s3 + $0x10] sm:$0xff] %v2558_v14  ;;  %v2560_v18 = vadd.f32 %v2559_v9, %v2517_v15  ;;  %v2519_v19 = vadd.f32 %v2518_v16, %v425_v61  ;;  %2827 = vmatpush1.bf16.msra.mxu0 %v3808_v6  ;;  %v3864_v61 = vld [vmem:[%s5240_s1 + $0x50c] ss:$48 sps:$4 sm:$0xff]   ;;  %v3871_v4 = vld [vmem:[%s5240_s1 + $0xaa8] ss:$48 sps:$4 sm:$0xff]  }
 0x148   :  { %2870 = vmatpush1.bf16.msra.mxu1 %v3811_v7  ;;  %v2520_v22 = vpop.f32.mrf.mxu0  ;;  %2828 = vmatprep.subr.bf16.mxu0 %v3816_v10  ;;  %v3876_v5 = vld [vmem:[%s5240_s1 + $0x44c] ss:$48 sps:$4 sm:$0xff]   ;;  %v3874_v7 = vld [vmem:[%s5240_s1 + $0x448] ss:$48 sps:$4 sm:$0xff]  }
 0x149   :  { %2871 = vmatprep.subr.bf16.mxu1 %v3819_v11  ;;  %2913 = vst [vmem:[%s5243_s3 + $0x18] sm:$0xff] %v2560_v18  ;;  %v2562_v24 = vadd.f32 %v2561_v17, %v2519_v19  ;;  %v2521_v25 = vadd.f32 %v2520_v22, %v429_v2  ;;  %v2563_v28 = vpop.f32.mrf.mxu1  ;;  %v3873_v2 = vld [vmem:[%s5240_s1 + $0xaac] ss:$48 sps:$4 sm:$0xff]   ;;  %v3877_v8 = vld [vmem:[%s5240_s1 + $0xa48] ss:$48 sps:$4 sm:$0xff]  }
 0x14a   :  { %v3879_v6 = vld [vmem:[%s5240_s1 + $0xa4c] ss:$48 sps:$4 sm:$0xff]   ;;  %v3880_v11 = vld [vmem:[%s5240_s1 + $0x3e8] ss:$48 sps:$4 sm:$0xff]  }
 0x14b   :  { %2924 = vst [vmem:[%s5243_s3 + $0x70] sm:$0xff] %v2562_v24  ;;  %v2564_v29 = vadd.f32 %v2563_v28, %v2521_v25  ;;  %2829 = vmatpush1.bf16.msra.mxu0 %v3814_v20  ;;  %v3882_v9 = vld [vmem:[%s5240_s1 + $0x3ec] ss:$48 sps:$4 sm:$0xff]   ;;  %v3883_v14 = vld [vmem:[%s5240_s1 + $0x9e8] ss:$48 sps:$4 sm:$0xff]  }
 0x14c   :  { %2872 = vmatpush1.bf16.msra.mxu1 %v3817_v53  ;;  %2830 = vmatprep.subr.bf16.mxu0 %v3822_v54  ;;  %v3885_v10 = vld [vmem:[%s5240_s1 + $0x9ec] ss:$48 sps:$4 sm:$0xff]   ;;  %v3886_v17 = vld [vmem:[%s5240_s1 + $0x388] ss:$48 sps:$4 sm:$0xff]   ;;  %v432_v54 = vsub.s32 4, %v4720_v21 }
 0x14d   :  { %2873 = vmatprep.subr.bf16.mxu1 %v3825_v23  ;;  %2925 = vst [vmem:[%s5243_s3 + $0x78] sm:$0xff] %v2564_v29  ;;  %v3888_v15 = vld [vmem:[%s5240_s1 + $0x38c] ss:$48 sps:$4 sm:$0xff]   ;;  %v3889_v18 = vld [vmem:[%s5240_s1 + $0x988] ss:$48 sps:$4 sm:$0xff]   ;;  %v436_v23 = vsub.s32 5, %v4720_v21 }
 0x14e   :  { %v3891_v16 = vld [vmem:[%s5240_s1 + $0x98c] ss:$48 sps:$4 sm:$0xff]   ;;  %v3892_v53 = vld [vmem:[%s5240_s1 + $0x328] ss:$48 sps:$4 sm:$0xff]   ;;  %v433_v24 = vrot.slane %v4737_v26, %v432_v54 }
 0x14f   :  { %2831 = vmatpush1.bf16.msra.mxu0 %v3820_v31  ;;  %v3894_v19 = vld [vmem:[%s5240_s1 + $0x32c] ss:$48 sps:$4 sm:$0xff]   ;;  %v3895_v22 = vld [vmem:[%s5240_s1 + $0x928] ss:$48 sps:$4 sm:$0xff]   ;;  %v437_v25 = vrot.slane %v4737_v26, %v436_v23 }
 0x150   :  { %2874 = vmatpush1.bf16.msra.mxu1 %v3823_v32  ;;  %2832 = vmatprep.subr.bf16.mxu0 %v3828_v33  ;;  %v3897_v20 = vld [vmem:[%s5240_s1 + $0x92c] ss:$48 sps:$4 sm:$0xff]  }
 0x151   :  { %2875 = vmatprep.subr.bf16.mxu1 %v3831_v34 }
 0x153   :  { %2833 = vmatpush1.bf16.msra.mxu0 %v3826_v35 }
 0x154   :  { %2876 = vmatpush1.bf16.msra.mxu1 %v3829_v36  ;;  %2834 = vmatprep.subr.bf16.mxu0 %v3834_v37 }
 0x155   :  { %2877 = vmatprep.subr.bf16.mxu1 %v3837_v38 }
 0x157   :  { %2835 = vmatpush1.bf16.msra.mxu0 %v3832_v39 }
 0x158   :  { %2878 = vmatpush1.bf16.msra.mxu1 %v3835_v40  ;;  %2836 = vmatprep.subr.bf16.mxu0 %v3840_v41 }
 0x159   :  { %2879 = vmatprep.subr.bf16.mxu1 %v3843_v42 }
 0x15b   :  { %2837 = vmatpush1.bf16.msra.mxu0 %v3838_v43  ;;  %v440_v43 = vsub.s32 6, %v4720_v21 }
 0x15c   :  { %2880 = vmatpush1.bf16.msra.mxu1 %v3841_v44  ;;  %2838 = vmatprep.subr.bf16.mxu0 %v3846_v45  ;;  %v444_v44 = vsub.s32 7, %v4720_v21 }
 0x15d   :  { %2881 = vmatprep.subr.bf16.mxu1 %v3849_v46  ;;  %v441_v45 = vrot.slane %v4737_v26, %v440_v43 }
 0x15e   :  { %v445_v46 = vrot.slane %v4737_v26, %v444_v44 }
 0x15f   :  { %2839 = vmatpush1.bf16.msra.mxu0 %v3844_v47 }
 0x160   :  { %2882 = vmatpush1.bf16.msra.mxu1 %v3847_v48  ;;  %2840 = vmatprep.subr.bf16.mxu0 %v3852_v49 }
 0x161   :  { %2883 = vmatprep.subr.bf16.mxu1 %v3855_v50 }
 0x163   :  { %2841 = vmatpush2.bf16.msra.mxu0 %v3850_v51 }
 0x164   :  { %2884 = vmatpush2.bf16.msra.mxu1 %v3853_v52  ;;  %2842 = vmatprep.subr.bf16.mxu0 %v3858_v55 }
 0x165   :  { %2885 = vmatprep.subr.bf16.mxu1 %v3861_v56 }
 0x167   :  { %2843 = vmatpush2.bf16.msra.mxu0 %v3856_v58 }
 0x168   :  { %2886 = vmatpush2.bf16.msra.mxu1 %v3859_v59  ;;  %2844 = vmatprep.subr.bf16.mxu0 %v3864_v61 }
 0x169   :  { %2887 = vmatprep.subr.bf16.mxu1 %v3867_v62 }
 0x16b   :  { %2845 = vmatpush2.bf16.msra.mxu0 %v3862_v63 }
 0x16c   :  { %2888 = vmatpush2.bf16.msra.mxu1 %v3865_v0  ;;  %2846 = vmatprep.subr.bf16.mxu0 %v3870_v1 }
 0x16d   :  { %2889 = vmatprep.subr.bf16.mxu1 %v3873_v2  ;;  %v411_v2 = vld [vmem:[%s5242_s2 + $0x8] sm:$0xf] }
 0x16f   :  { %2847 = vmatpush2.bf16.msra.mxu0 %v3868_v3  ;;  %v449_v3 = vrot.slane %v411_v2, %v416_v27 }
 0x170   :  { %2890 = vmatpush2.bf16.msra.mxu1 %v3871_v4  ;;  %2848 = vmatprep.subr.bf16.mxu0 %v3876_v5  ;;  %v453_v4 = vrot.slane %v411_v2, %v420_v30 }
 0x171   :  { %2891 = vmatprep.subr.bf16.mxu1 %v3879_v6 }
 0x173   :  { %2849 = vmatpush2.bf16.msra.mxu0 %v3874_v7 }
 0x174   :  { %2892 = vmatpush2.bf16.msra.mxu1 %v3877_v8  ;;  %2850 = vmatprep.subr.bf16.mxu0 %v3882_v9 }
 0x175   :  { %2893 = vmatprep.subr.bf16.mxu1 %v3885_v10 }
 0x177   :  { %2851 = vmatpush2.bf16.msra.mxu0 %v3880_v11 }
 0x178   :  { %2894 = vmatpush2.bf16.msra.mxu1 %v3883_v14  ;;  %2852 = vmatprep.subr.bf16.mxu0 %v3888_v15 }
 0x179   :  { %2895 = vmatprep.subr.bf16.mxu1 %v3891_v16 }
 0x17b   :  { %2853 = vmatpush2.bf16.msra.mxu0 %v3886_v17 }
 0x17c   :  { %2896 = vmatpush2.bf16.msra.mxu1 %v3889_v18  ;;  %2854 = vmatprep.subr.bf16.mxu0 %v3894_v19 }
 0x17d   :  { %2897 = vmatprep.subr.bf16.mxu1 %v3897_v20 }
 0x17f   :  { %2855 = vmatpush2.bf16.msra.mxu0 %v3892_v53  ;;  %v457_v53 = vrot.slane %v411_v2, %v424_v57 }
 0x180   :  { %2898 = vmatpush2.bf16.msra.mxu1 %v3895_v22  ;;  %v461_v22 = vrot.slane %v411_v2, %v428_v60 }
 0x182   :  { %v2600_v28 = vpop.f32.mrf.mxu0  ;;  %2857 = vmatmul.mubr.bf16.vlgmr.msra.gmra.mxu0 %v4146_v12 }
 0x183   :  { %v2643_v29 = vpop.f32.mrf.mxu1  ;;  %2900 = vmatmul.mubr.bf16.vlgmr.msra.gmra.mxu1 %v4148_v13  ;;  %v2601_v31 = vadd.f32 %v2600_v28, %v433_v24 }
 0x184   :  { %v2602_v32 = vpop.f32.mrf.mxu0 }
 0x185   :  { %v2645_v33 = vpop.f32.mrf.mxu1  ;;  %v2644_v34 = vadd.f32 %v2643_v29, %v2601_v31  ;;  %v2603_v35 = vadd.f32 %v2602_v32, %v437_v25 }
 0x186   :  { %v2604_v36 = vpop.f32.mrf.mxu0 }
 0x187   :  { %v2647_v37 = vpop.f32.mrf.mxu1  ;;  %2914 = vst [vmem:[%s5243_s3 + $0x20] sm:$0xff] %v2644_v34  ;;  %v2646_v38 = vadd.f32 %v2645_v33, %v2603_v35  ;;  %v2605_v39 = vadd.f32 %v2604_v36, %v433_v24 }
 0x188   :  { %v2606_v40 = vpop.f32.mrf.mxu0 }
 0x189   :  { %2915 = vst [vmem:[%s5243_s3 + $0x28] sm:$0xff] %v2646_v38  ;;  %v2648_v12 = vadd.f32 %v2647_v37, %v2605_v39  ;;  %v2607_v13 = vadd.f32 %v2606_v40, %v437_v25  ;;  %v2649_v41 = vpop.f32.mrf.mxu1 }
 0x18b   :  { %2926 = vst [vmem:[%s5243_s3 + $0x80] sm:$0xff] %v2648_v12  ;;  %v2650_v42 = vadd.f32 %v2649_v41, %v2607_v13 }
 0x18d   :  { %2927 = vst [vmem:[%s5243_s3 + $0x88] sm:$0xff] %v2650_v42 }
 0x1c2   :  { %v2686_v47 = vpop.f32.mrf.mxu0 }
 0x1c3   :  { %v2729_v48 = vpop.f32.mrf.mxu1  ;;  %v2687_v49 = vadd.f32 %v2686_v47, %v441_v45 }
 0x1c4   :  { %v2688_v50 = vpop.f32.mrf.mxu0 }
 0x1c5   :  { %v2731_v51 = vpop.f32.mrf.mxu1  ;;  %v2730_v52 = vadd.f32 %v2729_v48, %v2687_v49  ;;  %v2689_v55 = vadd.f32 %v2688_v50, %v445_v46 }
 0x1c6   :  { %v2690_v56 = vpop.f32.mrf.mxu0 }
 0x1c7   :  { %v2733_v58 = vpop.f32.mrf.mxu1  ;;  %2916 = vst [vmem:[%s5243_s3 + $0x30] sm:$0xff] %v2730_v52  ;;  %v2732_v59 = vadd.f32 %v2731_v51, %v2689_v55  ;;  %v2691_v61 = vadd.f32 %v2690_v56, %v441_v45 }
 0x1c8   :  { %v2692_v62 = vpop.f32.mrf.mxu0 }
 0x1c9   :  { %2917 = vst [vmem:[%s5243_s3 + $0x38] sm:$0xff] %v2732_v59  ;;  %v2734_v26 = vadd.f32 %v2733_v58, %v2691_v61  ;;  %v2693_v63 = vadd.f32 %v2692_v62, %v445_v46  ;;  %v2735_v0 = vpop.f32.mrf.mxu1 }
 0x1cb   :  { %2928 = vst [vmem:[%s5243_s3 + $0x90] sm:$0xff] %v2734_v26  ;;  %v2736_v1 = vadd.f32 %v2735_v0, %v2693_v63 }
 0x1cd   :  { %2929 = vst [vmem:[%s5243_s3 + $0x98] sm:$0xff] %v2736_v1 }
 0x202   :  { %v2772_v5 = vpop.f32.mrf.mxu0 }
 0x203   :  { %v2815_v6 = vpop.f32.mrf.mxu1  ;;  %v2773_v7 = vadd.f32 %v2772_v5, %v449_v3 }
 0x204   :  { %v2774_v8 = vpop.f32.mrf.mxu0 }
 0x205   :  { %v2817_v9 = vpop.f32.mrf.mxu1  ;;  %v2816_v10 = vadd.f32 %v2815_v6, %v2773_v7  ;;  %v2775_v11 = vadd.f32 %v2774_v8, %v453_v4 }
 0x206   :  { %v2776_v14 = vpop.f32.mrf.mxu0 }
 0x207   :  { %v2819_v15 = vpop.f32.mrf.mxu1  ;;  %2918 = vst [vmem:[%s5243_s3 + $0x40] sm:$0xff] %v2816_v10  ;;  %v2818_v16 = vadd.f32 %v2817_v9, %v2775_v11  ;;  %v2777_v17 = vadd.f32 %v2776_v14, %v449_v3 }
 0x208   :  { %v2778_v18 = vpop.f32.mrf.mxu0 }
 0x209   :  { %2919 = vst [vmem:[%s5243_s3 + $0x48] sm:$0xff] %v2818_v16  ;;  %v2820_v27 = vadd.f32 %v2819_v15, %v2777_v17  ;;  %v2779_v30 = vadd.f32 %v2778_v18, %v453_v4  ;;  %v2821_v19 = vpop.f32.mrf.mxu1 }
 0x20b   :  { %2930 = vst [vmem:[%s5243_s3 + $0xa0] sm:$0xff] %v2820_v27  ;;  %v2822_v20 = vadd.f32 %v2821_v19, %v2779_v30 }
 0x20d   :  { %2931 = vst [vmem:[%s5243_s3 + $0xa8] sm:$0xff] %v2822_v20 }
 0x242   :  { %v2858_v54 = vpop.f32.mrf.mxu0 }
 0x243   :  { %v2901_v23 = vpop.f32.mrf.mxu1  ;;  %v2859_v24 = vadd.f32 %v2858_v54, %v457_v53 }
 0x244   :  { %v2860_v25 = vpop.f32.mrf.mxu0 }
 0x245   :  { %v2903_v28 = vpop.f32.mrf.mxu1  ;;  %v2902_v29 = vadd.f32 %v2901_v23, %v2859_v24  ;;  %v2861_v31 = vadd.f32 %v2860_v25, %v461_v22 }
 0x246   :  { %v2862_v32 = vpop.f32.mrf.mxu0 }
 0x247   :  { %v2905_v33 = vpop.f32.mrf.mxu1  ;;  %2920 = vst [vmem:[%s5243_s3 + $0x50] sm:$0xff] %v2902_v29  ;;  %v2904_v34 = vadd.f32 %v2903_v28, %v2861_v31  ;;  %v2863_v35 = vadd.f32 %v2862_v32, %v457_v53 }
 0x248   :  { %v2864_v36 = vpop.f32.mrf.mxu0 }
 0x249   :  { %2921 = vst [vmem:[%s5243_s3 + $0x58] sm:$0xff] %v2904_v34  ;;  %v2906_v21 = vadd.f32 %v2905_v33, %v2863_v35  ;;  %v2865_v57 = vadd.f32 %v2864_v36, %v461_v22  ;;  %v2907_v60 = vpop.f32.mrf.mxu1 }
 0x24b   :  { %2932 = vst [vmem:[%s5243_s3 + $0xb0] sm:$0xff] %v2906_v21  ;;  %v2908_v37 = vadd.f32 %v2907_v60, %v2865_v57 }
 0x24d   :  { %2933 = vst [vmem:[%s5243_s3 + $0xb8] sm:$0xff] %v2908_v37 }

// kernel: matching_model_forward.13
= control target key start
LH: loop header
LB: loop body
LE: loop exit
PB: predicated region body
PF: predicated region fallthrough
CT: control target
= control target key end

     0   :  { %10 = vsyncpa [#allocation3], 0  ;;  %vm18_vm0 = vcmask 130048   ;;  %v278_v1 = vmov 0.0   ;;  %vm279_vm1 = vmmov 0   ;;  %s335_s0 = inlined_call_operand.vmem [shape: f32[2,16], index: 0, kind: input, shape index: {}]   ;;  %s336_s1 = inlined_call_operand.vmem [shape: f32[2,16], index: 1, kind: input, shape index: {}]   ;;  %s337_s2 = inlined_call_operand.hbm [shape: f32[2,2], index: 2, kind: output, shape index: {0}]   ;;  %s338_s3 = inlined_call_operand.hbm [shape: f32[1,1], index: 3, kind: output, shape index: {1}]   ;;  %s339_s4 = inlined_call_operand.hbm [shape: f32[1,1], index: 4, kind: output, shape index: {2}]  }
   0x1   :  { %v17_v0 = vld [vmem:[%s336_s1] sm:$0x3]  ;;  %200 = vmatprep.subr.mxu0 %v278_v1  ;;  %202 = vmatprep.mubr.msk.f32.mxu0 %vm279_vm1, %v278_v1 }
   0x2   :  { %11 = vsyncpa [#allocation5], 0  ;;  %201 = vmatpush3.xpose.msk.msra.mxu0 %vm18_vm0, %v17_v0  ;;  %v16_v2 = vld [vmem:[%s335_s0] sm:$0x3]  ;;  %vm95_vm2 = vcmask 9216   ;;  %v109_v9 = vlaneseq  ;;  %vm126_vm4 = vcmask 1041408  }
   0x3   :  { %vm136_vm6 = vcmask 0   ;;  %s280_s0 = smov [#allocation2]  }
   0x4   :  { %v110_v10 = vshrl.u32 %v109_v9, 7  ;;  %v112_v11 = vand.u32 127, %v109_v9  ;;  %s160_s1 = sshll.u32 %s280_s0, 4  ;;  %s161_s1 = int_to_ptr.vmem [resolvable:$true] %s160_s1 }
   0x5   :  { %203 = vmatmul.mubr.msk.f32.vlgmr.msra.gmra.mxu0 %vm18_vm0, %v16_v2  ;;  %s214_s19 = scalar_lea.vmem %s161_s1, 32  ;;  %p219_p1 = scmp.lt.s32.totalorder %s161_s1, %s161_s1 }
   0x6   :  { %vm113_vm3 = vcmp.eq.s32.totalorder %v110_v10, %v112_v11  ;;  %p215_p0 = scmp.ne.s32.totalorder %s161_s1, %s214_s19  ;;  %p220_p2 = scmp.lt.s32.totalorder %s214_s19, %s214_s19 }
   0x8   :  { %p221_p3 = por %p220_p2, %p219_p1 }
   0xa   :  { %p222_p4 = pnand %p221_p3, %p215_p0 }
  0xc5   :  { %v91_v3 = vpop.f32.mrf.mxu0 }
  0xc6   :  { %v97_v4 = vsel %vm95_vm2, %v91_v3, -inf  ;;  %96 = vst.msk [vmem:[#allocation2] sm:$0x3] %vm95_vm2, %v91_v3  ;;  %v138_v14 = vsel %vm113_vm3, %v91_v3, -1e+30 }
  0xc7   :  { %98 = vmax.xlane.f32.xlu0 %v97_v4  ;;  %v204_v5 = vpop.f32.mrf.mxu0  ;;  %v139_v15 = vsel %vm95_vm2, %v138_v14, -inf }
 0x150   :  { %v99_v6 = vpop.xlane.xlu0 %98 }
 0x151   :  { %v100_v7 = vsub.f32 %v91_v3, %v99_v6 }
 0x153   :  { %v101_v8 = vmul.f32 1.442695, %v100_v7 }
 0x155   :  { %210 = vpow2.f32 %v101_v8 }
 0x162   :  { %v211_v12 = vpop.eup %210 }
 0x163   :  { %v103_v13 = vsel %vm95_vm2, %v211_v12, 0.0 }
 0x164   :  { %104 = vadd.xlane.f32.xlu0 %v103_v13 }
 0x168   :  { %140 = vmax.xlane.f32.xlu0 %v139_v15 }
 0x1ed   :  { %v105_v16 = vpop.xlane.xlu0 %104 }
 0x1ee   :  { %212 = vlog2.f32 %v105_v16 }
 0x1f1   :  { %v141_v17 = vpop.xlane.xlu0 %140 }
 0x1f2   :  { %vm142_vm5 = vcmp.ge.f32.partialorder %v141_v17, %v99_v6 }
 0x1f3   :  { %v197_v18 = vsel %vm142_vm5, 1.0, %v278_v1 }
 0x1f4   :  { %v145_v19 = vsel %vm126_vm4, %v197_v18, 0.0 }
 0x1f5   :  { %v146_v20 = vrot.slane %v145_v19, 4 }
 0x1f7   :  { %v147_v21 = vadd.f32 %v146_v20, %v145_v19 }
 0x1f9   :  { %v148_v22 = vrot.slane %v147_v21, 2 }
 0x1fb   :  { %v213_v23 = vpop.eup %212  ;;  %v149_v24 = vadd.f32 %v148_v22, %v147_v21 }
 0x1fc   :  { %v107_v25 = vmul.f32 0.6931472, %v213_v23 }
 0x1fd   :  { %v150_v26 = vrot.slane %v149_v24, 1 }
 0x1fe   :  { %v108_v27 = vsub.f32 %v100_v7, %v107_v25 }
 0x1ff   :  { %v151_v28 = vadd.f32 %v150_v26, %v149_v24 }
 0x200   :  { %v114_v29 = vsel %vm113_vm3, %v108_v27, 0.0  ;;  %v119_v32 = vsel %vm95_vm2, %v108_v27, 0.0 }
 0x201   :  { %v115_v30 = vsel %vm95_vm2, %v114_v29, 0.0  ;;  %v152_v31 = vmul.f32 0.5, %v151_v28 }
 0x202   :  { %116 = vadd.xlane.f32.xlu1 %v115_v30 }
 0x203   :  { %153 = vst.msk [vmem:[#allocation6] sm:$0x1] %vm136_vm6, %v152_v31 }
 0x206   :  { %120 = vadd.xlane.f32.xlu1 %v119_v32 }
 0x207   :  { %225 = shalt.err (!%p222_p4)
}
 0x208   :  { %163 = dma.vmem_to_hbm [thread:$0]  %s161_s1, 32, %s337_s2, [#allocation3]  }
 0x209   :  { %s281_s22 = smov [#allocation4]   ;;  %s282_s24 = smov [#allocation6]  }
 0x20a   :  { %s170_s23 = sshll.u32 %s281_s22, 4  ;;  %s180_s25 = sshll.u32 %s282_s24, 4  ;;  %s171_s23 = int_to_ptr.vmem [resolvable:$true] %s170_s23  ;;  %s181_s25 = int_to_ptr.vmem [resolvable:$true] %s180_s25 }
 0x20b   :  { %s234_s2 = scalar_lea.vmem %s171_s23, 16  ;;  %s238_s26 = scalar_lea.vmem %s171_s23, 32 }
 0x20c   :  { %p235_p5 = scmp.ne.s32.totalorder %s171_s23, %s234_s2  ;;  %p239_p6 = scmp.lt.s32.totalorder %s171_s23, %s171_s23 }
 0x20d   :  { %p240_p7 = scmp.lt.s32.totalorder %s238_s26, %s234_s2 }
 0x20f   :  { %p241_p8 = por %p240_p7, %p239_p6 }
 0x211   :  { %p242_p9 = pnand %p241_p8, %p235_p5 }
 0x28b   :  { %v117_v33 = vpop.xlane.xlu1 %116 }
 0x28c   :  { %v118_v34 = vsub.f32 0.0, %v117_v33 }
 0x28e   :  { %v123_v37 = vmul.f32 0.9, %v118_v34 }
 0x28f   :  { %v121_v35 = vpop.xlane.xlu1 %120 }
 0x290   :  { %v122_v36 = vsub.f32 0.0, %v121_v35 }
 0x292   :  { %v124_v38 = vmul.f32 0.05, %v122_v36 }
 0x294   :  { %v125_v39 = vadd.f32 %v124_v38, %v123_v37 }
 0x296   :  { %v127_v40 = vsel %vm126_vm4, %v125_v39, 0.0 }
 0x297   :  { %v128_v41 = vrot.slane %v127_v40, 4 }
 0x299   :  { %v129_v42 = vadd.f32 %v128_v41, %v127_v40 }
 0x29b   :  { %v130_v43 = vrot.slane %v129_v42, 2 }
 0x29d   :  { %v131_v44 = vadd.f32 %v130_v43, %v129_v42 }
 0x29f   :  { %v132_v45 = vrot.slane %v131_v44, 1 }
 0x2a1   :  { %v133_v46 = vadd.f32 %v132_v45, %v131_v44 }
 0x2a3   :  { %v135_v47 = vmul.f32 0.5, %v133_v46 }
 0x2a5   :  { %137 = vst.msk [vmem:[#allocation4] sm:$0x1] %vm136_vm6, %v135_v47 }
 0x2a6   :  { %245 = shalt.err (!%p242_p9)
}
 0x2a7   :  { %173 = dma.vmem_to_hbm [thread:$0]  %s171_s23, 16, %s338_s3, [#allocation5]  }
 0x2a8   :  { %s254_s29 = scalar_lea.vmem %s181_s25, 16  ;;  %s258_s30 = scalar_lea.vmem %s181_s25, 32 }
 0x2a9   :  { %p255_p10 = scmp.ne.s32.totalorder %s181_s25, %s254_s29  ;;  %p259_p11 = scmp.lt.s32.totalorder %s181_s25, %s181_s25 }
 0x2aa   :  { %p260_p12 = scmp.lt.s32.totalorder %s258_s30, %s254_s29 }
 0x2ac   :  { %p261_p13 = por %p260_p12, %p259_p11 }
 0x2ae   :  { %p262_p0 = pnand %p261_p13, %p255_p10 }
 0x2b0   :  { %265 = shalt.err (!%p262_p0)
}
 0x2b1   :  { %183 = dma.vmem_to_hbm [thread:$0]  %s181_s25, 16, %s339_s4, [#allocation5]  }
 0x2b2   :  { %274 = dma.done.wait [#allocation3], 32  }
 0x2b3   :  { %275 = vsyncadd [#allocation3], 4294967264 }
 0x2b4   :  { %276 = dma.done.wait [#allocation5], 32  }
 0x2b5   :  { %277 = vsyncadd [#allocation5], 4294967264 }
 0x2b6   :  { %193 = vsyncpa [#allocation3], 1 }
 0x2b7   :  { %194 = vsyncpa [#allocation5], 1 }

</bundles_post_ra>
